<compile_context>
chip_gen: v7x
topology: tpu7x:2x2x1
jax: 0.10.0
libtpu: 0.0.40
codegen_flags: <defaults>
</compile_context>

<pallas_src>
import functools

import jax
import jax.numpy as jnp
from jax import lax
from jax.experimental import pallas as pl
from jax.experimental.pallas import tpu as pltpu

N_LAYERS = 6  # cfg.LSTM_layers


def _pick_lane_tile(n):
    for t in (2048, 1024, 512, 256, 128):
        if n % t == 0:
            return t
    return n


# ----------------------------------------------------------------------------
# 1x1 conv (embed / fc):  (Cout, Cin) @ (Cin, B*HW), lane dim = B*HW
# ----------------------------------------------------------------------------
def _conv1x1_kernel(x_ref, w_ref, b_ref, o_ref):
    acc = jnp.dot(w_ref[...], x_ref[...].astype(jnp.bfloat16),
                  preferred_element_type=jnp.float32)
    o_ref[...] = (acc + b_ref[...]).astype(o_ref.dtype)


def conv1x1(x, w, b, out_dtype):
    """x: (Cin, N) -> (Cout, N) in out_dtype."""
    Cin, N = x.shape
    Cout = w.shape[0]
    Cp = max(8, ((Cout + 7) // 8) * 8)          # sublane-dense output stores
    if Cp != Cout:
        w = jnp.pad(w, ((0, Cp - Cout), (0, 0)))
        b = jnp.pad(b, ((0, Cp - Cout),))
    t = _pick_lane_tile(N)
    out = pl.pallas_call(
        _conv1x1_kernel,
        out_shape=jax.ShapeDtypeStruct((Cp, N), out_dtype),
        grid=(N // t,),
        in_specs=[
            pl.BlockSpec((Cin, t), lambda i: (0, i)),
            pl.BlockSpec((Cp, Cin), lambda i: (0, 0)),
            pl.BlockSpec((Cp, 1), lambda i: (0, 0)),
        ],
        out_specs=pl.BlockSpec((Cp, t), lambda i: (0, i)),
        compiler_params=pltpu.CompilerParams(
            dimension_semantics=("parallel",)),
    )(x, w.astype(jnp.bfloat16), b.reshape(Cp, 1).astype(jnp.float32))
    return out[:Cout] if Cp != Cout else out


# ----------------------------------------------------------------------------
# CMS-LSTM cell (ConvLSTM gate core) — staged taps + one big-K MXU matmul
# ----------------------------------------------------------------------------
def _cms_cell_kernel(x_ref, h_ref, c_ref, w_ref, b_ref, mask_ref,
                     h_out_ref, c_out_ref, slab_ref, stage_ref,
                     *, H, W, g, Ch, padl):
    # x_ref/h_ref : (Ch, N) bf16, c_ref: (Ch, N) f32, with N = g*H*W (g images
    #               folded onto the lane axis).
    # w_ref       : (4Ch, 18Ch) bf16 — per-tap [x|h] weights, taps outer.
    # b_ref       : (4Ch, 1) f32.
    # mask_ref    : (9, N) bf16 per-tap validity masks (image boundaries).
    # slab_ref    : (2Ch, N + 2*padl) bf16 flat zero-haloed [x; h] slab.
    # stage_ref   : (18Ch, N) bf16 staged shifted windows.
    N = g * H * W

    # Zero the halo strips (lane-aligned), copy x/h in (lane-aligned writes).
    slab_ref[:, 0:padl] = jnp.zeros((2 * Ch, padl), jnp.bfloat16)
    slab_ref[:, padl + N:padl + N + padl] = jnp.zeros((2 * Ch, padl),
                                                      jnp.bfloat16)
    slab_ref[0:Ch, padl:padl + N] = x_ref[...]
    slab_ref[Ch:2 * Ch, padl:padl + N] = h_ref[...]

    # Stage the 9 shifted [x|h] windows; masks zero out-of-image positions
    # (top/bottom/left/right borders and batch-fold boundaries).
    k = 0
    for dy in (-1, 0, 1):
        for dx in (-1, 0, 1):
            s = padl + dy * W + dx
            win = slab_ref[:, s:s + N]
            if not (dy == 0 and dx == 0):
                win = win * mask_ref[k:k + 1, :]
            stage_ref[k * 2 * Ch:(k + 1) * 2 * Ch, :] = win
            k += 1

    # Single MXU matmul: (4Ch, 18Ch) @ (18Ch, N) -> f32 gates.
    gates = jnp.dot(w_ref[...], stage_ref[...],
                    preferred_element_type=jnp.float32) + b_ref[...]

    def sig(z):                                   # sigmoid via tanh: 1 EUP op
        return 0.5 * jnp.tanh(0.5 * z) + 0.5

    i = sig(gates[0 * Ch:1 * Ch, :])
    f = sig(gates[1 * Ch:2 * Ch, :])
    gg = jnp.tanh(gates[2 * Ch:3 * Ch, :])
    o = sig(gates[3 * Ch:4 * Ch, :])

    c_new = f * c_ref[...] + i * gg
    h_out_ref[...] = (o * jnp.tanh(c_new)).astype(h_out_ref.dtype)
    c_out_ref[...] = c_new


def _pick_group(B, HW):
    # If a single image is already lane-dense keep grid=(B,) (pipeline depth /
    # megacore sharding); otherwise fold the whole batch onto the lane axis.
    return 1 if HW % 128 == 0 else B


def _make_tap_masks(H, W, g):
    p = jnp.arange(g * H * W, dtype=jnp.int32) % (H * W)
    y, x = p // W, p % W
    rows = []
    for dy in (-1, 0, 1):
        for dx in (-1, 0, 1):
            rows.append((y + dy >= 0) & (y + dy < H) &
                        (x + dx >= 0) & (x + dx < W))
    return jnp.stack(rows, axis=0).astype(jnp.bfloat16)     # (9, g*H*W)


def cms_lstm_cell(x, h_prev, c_prev, w2d, bias, H, W):
    """x, h_prev: (Ch, B*HW) bf16; c_prev: (Ch, B*HW) f32."""
    Ch, Ntot = c_prev.shape
    HW = H * W
    B = Ntot // HW
    g = _pick_group(B, HW)
    N = g * HW
    padl = ((W + 1 + 127) // 128) * 128          # lane-aligned halo offset
    masks = _make_tap_masks(H, W, g)             # constant-folded under jit

    kernel = functools.partial(_cms_cell_kernel, H=H, W=W, g=g, Ch=Ch,
                               padl=padl)
    return pl.pallas_call(
        kernel,
        out_shape=(jax.ShapeDtypeStruct((Ch, Ntot), jnp.bfloat16),
                   jax.ShapeDtypeStruct((Ch, Ntot), jnp.float32)),
        grid=(Ntot // N,),
        in_specs=[
            pl.BlockSpec((Ch, N), lambda i: (0, i)),
            pl.BlockSpec((Ch, N), lambda i: (0, i)),
            pl.BlockSpec((Ch, N), lambda i: (0, i)),
            pl.BlockSpec((4 * Ch, 18 * Ch), lambda i: (0, 0)),
            pl.BlockSpec((4 * Ch, 1), lambda i: (0, 0)),
            pl.BlockSpec((9, N), lambda i: (0, 0)),
        ],
        out_specs=(pl.BlockSpec((Ch, N), lambda i: (0, i)),
                   pl.BlockSpec((Ch, N), lambda i: (0, i))),
        scratch_shapes=[
            pltpu.VMEM((2 * Ch, N + 2 * padl), jnp.bfloat16),  # padded [x;h]
            pltpu.VMEM((18 * Ch, N), jnp.bfloat16),            # staged taps
        ],
        compiler_params=pltpu.CompilerParams(
            dimension_semantics=("parallel",)),
    )(x, h_prev, c_prev, w2d, bias.reshape(4 * Ch, 1), masks)


# ----------------------------------------------------------------------------
# JAX glue on the folded (C, B*HW) layout: pooling / bilinear upsampling
# ----------------------------------------------------------------------------
def maxpool2x2(x, H, W):
    C, N = x.shape
    B = N // (H * W)
    y = x.reshape(C, B, H // 2, 2, W // 2, 2).max(axis=(3, 5))
    return y.reshape(C, B * (H // 2) * (W // 2))


def _upsample2x_axis(x, axis):
    # nn.Upsample(scale_factor=2, mode='bilinear', align_corners=False),
    # separable per axis: weights 0.25/0.75 with border clamp.
    n = x.shape[axis]
    first = lax.slice_in_dim(x, 0, 1, axis=axis)
    last = lax.slice_in_dim(x, n - 1, n, axis=axis)
    xl = jnp.concatenate([first, lax.slice_in_dim(x, 0, n - 1, axis=axis)],
                         axis=axis)
    xr = jnp.concatenate([lax.slice_in_dim(x, 1, n, axis=axis), last],
                         axis=axis)
    even = 0.25 * xl + 0.75 * x
    odd = 0.75 * x + 0.25 * xr
    out = jnp.stack([even, odd], axis=axis + 1)
    shp = list(x.shape)
    shp[axis] = 2 * n
    return out.reshape(shp)


def upsample_bilinear_2x(x, H, W):
    C, N = x.shape
    B = N // (H * W)
    y = x.reshape(C, B, H, W)
    y = _upsample2x_axis(_upsample2x_axis(y, 2), 3)
    return y.reshape(C, B * 4 * H * W)


# ----------------------------------------------------------------------------
# Parameters (deterministic synthetic init)
# ----------------------------------------------------------------------------
def init_params(key, in_ch, hidden, out_ch):
    keys = jax.random.split(key, 2 + N_LAYERS)
    scale = 0.05
    params = {
        "embed_w": (jax.random.normal(keys[0], (hidden, in_ch)) * scale
                    ).astype(jnp.bfloat16),
        "embed_b": jnp.zeros((hidden,), jnp.float32),
        "fc_w": (jax.random.normal(keys[1], (out_ch, hidden)) * scale
                 ).astype(jnp.bfloat16),
        "fc_b": jnp.zeros((out_ch,), jnp.float32),
        "cells": [],
    }
    for l in range(N_LAYERS):
        # (4*hidden gate channels, 9 taps * [x|h] channels) — big-K layout
        w2d = (jax.random.normal(keys[2 + l], (4 * hidden, 9 * 2 * hidden))
               * scale).astype(jnp.bfloat16)
        bias = jnp.zeros((4 * hidden,), jnp.float32)
        params["cells"].append((w2d, bias))
    return params


# ----------------------------------------------------------------------------
# MS_CMS_LSTM forward
# ----------------------------------------------------------------------------
def ms_cms_lstm_forward(params, x_nchw, m, layer_hiddens, hidden):
    B, Cin, H, W = x_nchw.shape
    # NCHW -> channel-first with batch folded onto the lane axis: (Cin, B*H*W)
    x = jnp.transpose(x_nchw, (1, 0, 2, 3)).reshape(Cin, B * H * W)
    x = conv1x1(x, params["embed_w"], params["embed_b"], jnp.bfloat16)  # embed

    sizes = [(H, W), (H // 2, W // 2), (H // 4, W // 4),
             (H // 4, W // 4), (H // 2, W // 2), (H, W)]

    next_layer_hiddens = []
    out = []
    for l in range(N_LAYERS):
        w2d, bias = params["cells"][l]
        Hl, Wl = sizes[l]
        Nl = B * Hl * Wl
        if layer_hiddens is not None:
            h_prev, c_prev = layer_hiddens[l]
        else:
            h_prev = jnp.zeros((hidden, Nl), jnp.bfloat16)
            c_prev = jnp.zeros((hidden, Nl), jnp.float32)

        h_new, c_new = cms_lstm_cell(x, h_prev, c_prev, w2d, bias, Hl, Wl)
        x = h_new
        out.append(x)

        if l == 0 or l == 1:
            x = maxpool2x2(x, Hl, Wl)
        elif l == 3:
            x = upsample_bilinear_2x(x, Hl, Wl) + out[1]
        elif l == 4:
            x = upsample_bilinear_2x(x, Hl, Wl) + out[0]

        next_layer_hiddens.append((h_new, c_new))

    x = conv1x1(x, params["fc_w"], params["fc_b"], jnp.float32)  # fc
    Cout = params["fc_w"].shape[0]
    x_out = jnp.transpose(x.reshape(Cout, B, H, W), (1, 0, 2, 3))  # -> NCHW

    decouple_loss = jnp.zeros((N_LAYERS, B, hidden), jnp.float32)
    return x_out, m, next_layer_hiddens, decouple_loss


# ----------------------------------------------------------------------------
# Demo
# ----------------------------------------------------------------------------
if __name__ == "__main__":
    B, C_IN, H, W = 2, 4, 16, 16
    HIDDEN = 32   # cfg.lstm_hidden_state
    C_OUT = 4

    key = jax.random.PRNGKey(0)
    k_x, k_m, k_p = jax.random.split(key, 3)

    x = jax.random.normal(k_x, (B, C_IN, H, W), jnp.float32)     # NCHW
    m = jax.random.normal(k_m, (B, HIDDEN, H, W), jnp.float32)   # passthrough
    params = init_params(k_p, C_IN, HIDDEN, C_OUT)

    fwd = jax.jit(functools.partial(ms_cms_lstm_forward, hidden=HIDDEN))

    # First step (hidden states initialized to zero inside the forward).
    x_out, m_out, next_hiddens, dloss = fwd(params, x, m, None)
    jax.block_until_ready(x_out)
    jax.block_until_ready(m_out)
    jax.block_until_ready(dloss)
    for h, c in next_hiddens:
        jax.block_until_ready(h)
        jax.block_until_ready(c)

    assert x_out.shape == (B, C_OUT, H, W)
    assert x_out.dtype == jnp.float32
    assert dloss.shape == (N_LAYERS, B, HIDDEN)
    assert next_hiddens[1][0].shape == (HIDDEN, B * (H // 2) * (W // 2))
    assert next_hiddens[2][0].shape == (HIDDEN, B * (H // 4) * (W // 4))
    assert bool(jnp.all(jnp.isfinite(x_out)))

    # Second step exercises the recurrent layer_hiddens path.
    x_out2, _, _, _ = fwd(params, x, m_out, next_hiddens)
    jax.block_until_ready(x_out2)
    assert x_out2.shape == (B, C_OUT, H, W)
    assert bool(jnp.all(jnp.isfinite(x_out2)))

    print("KERNEL_OK")
</pallas_src>

<mosaic_0001>
module attributes {stable_mosaic.version = 11 : i64} {
  func.func @_conv1x1_kernel(%arg0: i32, %arg1: memref<4x512xf32, #tpu.memory_space<vmem>>, %arg2: memref<32x4xbf16, #tpu.memory_space<vmem>>, %arg3: memref<32x1xf32, #tpu.memory_space<vmem>>, %arg4: memref<32x512xbf16, #tpu.memory_space<vmem>>) attributes {dimension_semantics = [#tpu.dimension_semantics<parallel>], iteration_bounds = array<i64: 1>, scalar_prefetch = 0 : i64, scratch_operands = 0 : i64, tpu.core_type = #tpu.core_type<tc>, window_params = [{transform_indices = @transform_0, window_bounds = array<i64: 4, 512>}, {pipeline_mode = #tpu.pipeline_mode<synchronous>, transform_indices = @transform_1, window_bounds = array<i64: 32, 4>}, {pipeline_mode = #tpu.pipeline_mode<synchronous>, transform_indices = @transform_2, window_bounds = array<i64: 32, 1>}, {transform_indices = @transform_3, window_bounds = array<i64: 32, 512>}]} {
    %c0 = arith.constant 0 : index
    %c0_0 = arith.constant 0 : index
    %0 = vector.load %arg2[%c0, %c0_0] : memref<32x4xbf16, #tpu.memory_space<vmem>>, vector<32x4xbf16>
    %c0_1 = arith.constant 0 : index
    %c0_2 = arith.constant 0 : index
    %1 = vector.load %arg1[%c0_1, %c0_2] : memref<4x512xf32, #tpu.memory_space<vmem>>, vector<4x512xf32>
    %2 = arith.truncf %1 : vector<4x512xf32> to vector<4x512xbf16>
    %cst = arith.constant dense<0.000000e+00> : vector<32x512xf32>
    %3 = tpu.matmul %0, %2, %cst {dimension_numbers = #tpu.dot_dimension_numbers<[1], [0], [0], [1], [0, 0, 1, 1], [], []>} : vector<32x4xbf16>, vector<4x512xbf16>, vector<32x512xf32> -> vector<32x512xf32>
    %c0_3 = arith.constant 0 : index
    %c0_4 = arith.constant 0 : index
    %4 = vector.load %arg3[%c0_3, %c0_4] : memref<32x1xf32, #tpu.memory_space<vmem>>, vector<32x1xf32>
    %5 = vector.broadcast %4 : vector<32x1xf32> to vector<32x512xf32>
    %6 = arith.addf %3, %5 : vector<32x512xf32>
    %7 = arith.truncf %6 : vector<32x512xf32> to vector<32x512xbf16>
    %c0_5 = arith.constant 0 : index
    %c0_6 = arith.constant 0 : index
    %8 = vector.load %arg4[%c0_5, %c0_6] : memref<32x512xbf16, #tpu.memory_space<vmem>>, vector<32x512xbf16>
    tpu.vector_store %arg4[%c0_5, %c0_6], %7 {strides = array<i32>} : memref<32x512xbf16, #tpu.memory_space<vmem>>, vector<32x512xbf16>,
    return
  }
  func.func @transform_0(%arg0: i32) -> (i32, i32) {
    %c0_i32 = arith.constant 0 : i32
    %c0_i32_0 = arith.constant 0 : i32
    return %c0_i32, %arg0 : i32, i32
  }
  func.func @transform_1(%arg0: i32) -> (i32, i32) {
    %c0_i32 = arith.constant 0 : i32
    %c0_i32_0 = arith.constant 0 : i32
    %c0_i32_1 = arith.constant 0 : i32
    return %c0_i32, %c0_i32_0 : i32, i32
  }
  func.func @transform_2(%arg0: i32) -> (i32, i32) {
    %c0_i32 = arith.constant 0 : i32
    %c0_i32_0 = arith.constant 0 : i32
    %c0_i32_1 = arith.constant 0 : i32
    return %c0_i32, %c0_i32_0 : i32, i32
  }
  func.func @transform_3(%arg0: i32) -> (i32, i32) {
    %c0_i32 = arith.constant 0 : i32
    %c0_i32_0 = arith.constant 0 : i32
    return %c0_i32, %arg0 : i32, i32
  }
}

module attributes {stable_mosaic.version = 11 : i64} {
  func.func @_cms_cell_kernel(%arg0: i32, %arg1: memref<32x256xbf16, #tpu.memory_space<vmem>>, %arg2: memref<32x256xbf16, #tpu.memory_space<vmem>>, %arg3: memref<32x256xf32, #tpu.memory_space<vmem>>, %arg4: memref<128x576xbf16, #tpu.memory_space<vmem>>, %arg5: memref<128x1xf32, #tpu.memory_space<vmem>>, %arg6: memref<9x256xbf16, #tpu.memory_space<vmem>>, %arg7: memref<32x256xbf16, #tpu.memory_space<vmem>>, %arg8: memref<32x256xf32, #tpu.memory_space<vmem>>, %arg9: memref<64x512xbf16, #tpu.memory_space<vmem>>, %arg10: memref<576x256xbf16, #tpu.memory_space<vmem>>) attributes {dimension_semantics = [#tpu.dimension_semantics<parallel>], iteration_bounds = array<i64: 2>, scalar_prefetch = 0 : i64, scratch_operands = 2 : i64, tpu.core_type = #tpu.core_type<tc>, window_params = [{transform_indices = @transform_0, window_bounds = array<i64: 32, 256>}, {transform_indices = @transform_1, window_bounds = array<i64: 32, 256>}, {transform_indices = @transform_2, window_bounds = array<i64: 32, 256>}, {pipeline_mode = #tpu.pipeline_mode<synchronous>, transform_indices = @transform_3, window_bounds = array<i64: 128, 576>}, {pipeline_mode = #tpu.pipeline_mode<synchronous>, transform_indices = @transform_4, window_bounds = array<i64: 128, 1>}, {pipeline_mode = #tpu.pipeline_mode<synchronous>, transform_indices = @transform_5, window_bounds = array<i64: 9, 256>}, {transform_indices = @transform_6, window_bounds = array<i64: 32, 256>}, {transform_indices = @transform_7, window_bounds = array<i64: 32, 256>}]} {
    %cst = arith.constant 0.000000e+00 : bf16
    %0 = vector.broadcast %cst : bf16 to vector<64x128xbf16>
    %c0 = arith.constant 0 : index
    %c0_0 = arith.constant 0 : index
    %1 = vector.load %arg9[%c0, %c0_0] : memref<64x512xbf16, #tpu.memory_space<vmem>>, vector<64x128xbf16>
    tpu.vector_store %arg9[%c0, %c0_0], %0 {strides = array<i32>} : memref<64x512xbf16, #tpu.memory_space<vmem>>, vector<64x128xbf16>,
    %cst_1 = arith.constant 0.000000e+00 : bf16
    %2 = vector.broadcast %cst_1 : bf16 to vector<64x128xbf16>
    %c0_2 = arith.constant 0 : index
    %c384 = arith.constant 384 : index
    %3 = vector.load %arg9[%c0_2, %c384] : memref<64x512xbf16, #tpu.memory_space<vmem>>, vector<64x128xbf16>
    tpu.vector_store %arg9[%c0_2, %c384], %2 {strides = array<i32>} : memref<64x512xbf16, #tpu.memory_space<vmem>>, vector<64x128xbf16>,
    %c0_3 = arith.constant 0 : index
    %c0_4 = arith.constant 0 : index
    %4 = vector.load %arg1[%c0_3, %c0_4] : memref<32x256xbf16, #tpu.memory_space<vmem>>, vector<32x256xbf16>
    %c0_5 = arith.constant 0 : index
    %c128 = arith.constant 128 : index
    %5 = vector.load %arg9[%c0_5, %c128] : memref<64x512xbf16, #tpu.memory_space<vmem>>, vector<32x256xbf16>
    tpu.vector_store %arg9[%c0_5, %c128], %4 {strides = array<i32>} : memref<64x512xbf16, #tpu.memory_space<vmem>>, vector<32x256xbf16>,
    %c0_6 = arith.constant 0 : index
    %c0_7 = arith.constant 0 : index
    %6 = vector.load %arg2[%c0_6, %c0_7] : memref<32x256xbf16, #tpu.memory_space<vmem>>, vector<32x256xbf16>
    %c32 = arith.constant 32 : index
    %c128_8 = arith.constant 128 : index
    %7 = vector.load %arg9[%c32, %c128_8] : memref<64x512xbf16, #tpu.memory_space<vmem>>, vector<32x256xbf16>
    tpu.vector_store %arg9[%c32, %c128_8], %6 {strides = array<i32>} : memref<64x512xbf16, #tpu.memory_space<vmem>>, vector<32x256xbf16>,
    %c0_9 = arith.constant 0 : index
    %c111 = arith.constant 111 : index
    %8 = vector.load %arg9[%c0_9, %c111] : memref<64x512xbf16, #tpu.memory_space<vmem>>, vector<64x256xbf16>
    %c0_10 = arith.constant 0 : index
    %c0_11 = arith.constant 0 : index
    %9 = vector.load %arg6[%c0_10, %c0_11] : memref<9x256xbf16, #tpu.memory_space<vmem>>, vector<1x256xbf16>
    %10 = vector.broadcast %9 : vector<1x256xbf16> to vector<64x256xbf16>
    %11 = arith.mulf %8, %10 : vector<64x256xbf16>
    %c0_12 = arith.constant 0 : index
    %c0_13 = arith.constant 0 : index
    %12 = vector.load %arg10[%c0_12, %c0_13] : memref<576x256xbf16, #tpu.memory_space<vmem>>, vector<64x256xbf16>
    tpu.vector_store %arg10[%c0_12, %c0_13], %11 {strides = array<i32>} : memref<576x256xbf16, #tpu.memory_space<vmem>>, vector<64x256xbf16>,
    %c0_14 = arith.constant 0 : index
    %c112 = arith.constant 112 : index
    %13 = vector.load %arg9[%c0_14, %c112] : memref<64x512xbf16, #tpu.memory_space<vmem>>, vector<64x256xbf16>
    %c1 = arith.constant 1 : index
    %c0_15 = arith.constant 0 : index
    %14 = vector.load %arg6[%c1, %c0_15] : memref<9x256xbf16, #tpu.memory_space<vmem>>, vector<1x256xbf16>
    %15 = vector.broadcast %14 : vector<1x256xbf16> to vector<64x256xbf16>
    %16 = arith.mulf %13, %15 : vector<64x256xbf16>
    %c64 = arith.constant 64 : index
    %c0_16 = arith.constant 0 : index
    %17 = vector.load %arg10[%c64, %c0_16] : memref<576x256xbf16, #tpu.memory_space<vmem>>, vector<64x256xbf16>
    tpu.vector_store %arg10[%c64, %c0_16], %16 {strides = array<i32>} : memref<576x256xbf16, #tpu.memory_space<vmem>>, vector<64x256xbf16>,
    %c0_17 = arith.constant 0 : index
    %c113 = arith.constant 113 : index
    %18 = vector.load %arg9[%c0_17, %c113] : memref<64x512xbf16, #tpu.memory_space<vmem>>, vector<64x256xbf16>
    %c2 = arith.constant 2 : index
    %c0_18 = arith.constant 0 : index
    %19 = vector.load %arg6[%c2, %c0_18] : memref<9x256xbf16, #tpu.memory_space<vmem>>, vector<1x256xbf16>
    %20 = vector.broadcast %19 : vector<1x256xbf16> to vector<64x256xbf16>
    %21 = arith.mulf %18, %20 : vector<64x256xbf16>
    %c128_19 = arith.constant 128 : index
    %c0_20 = arith.constant 0 : index
    %22 = vector.load %arg10[%c128_19, %c0_20] : memref<576x256xbf16, #tpu.memory_space<vmem>>, vector<64x256xbf16>
    tpu.vector_store %arg10[%c128_19, %c0_20], %21 {strides = array<i32>} : memref<576x256xbf16, #tpu.memory_space<vmem>>, vector<64x256xbf16>,
    %c0_21 = arith.constant 0 : index
    %c127 = arith.constant 127 : index
    %23 = vector.load %arg9[%c0_21, %c127] : memref<64x512xbf16, #tpu.memory_space<vmem>>, vector<64x256xbf16>
    %c3 = arith.constant 3 : index
    %c0_22 = arith.constant 0 : index
    %24 = vector.load %arg6[%c3, %c0_22] : memref<9x256xbf16, #tpu.memory_space<vmem>>, vector<1x256xbf16>
    %25 = vector.broadcast %24 : vector<1x256xbf16> to vector<64x256xbf16>
    %26 = arith.mulf %23, %25 : vector<64x256xbf16>
    %c192 = arith.constant 192 : index
    %c0_23 = arith.constant 0 : index
    %27 = vector.load %arg10[%c192, %c0_23] : memref<576x256xbf16, #tpu.memory_space<vmem>>, vector<64x256xbf16>
    tpu.vector_store %arg10[%c192, %c0_23], %26 {strides = array<i32>} : memref<576x256xbf16, #tpu.memory_space<vmem>>, vector<64x256xbf16>,
    %c0_24 = arith.constant 0 : index
    %c128_25 = arith.constant 128 : index
    %28 = vector.load %arg9[%c0_24, %c128_25] : memref<64x512xbf16, #tpu.memory_space<vmem>>, vector<64x256xbf16>
    %c256 = arith.constant 256 : index
    %c0_26 = arith.constant 0 : index
    %29 = vector.load %arg10[%c256, %c0_26] : memref<576x256xbf16, #tpu.memory_space<vmem>>, vector<64x256xbf16>
    tpu.vector_store %arg10[%c256, %c0_26], %28 {strides = array<i32>} : memref<576x256xbf16, #tpu.memory_space<vmem>>, vector<64x256xbf16>,
    %c0_27 = arith.constant 0 : index
    %c129 = arith.constant 129 : index
    %30 = vector.load %arg9[%c0_27, %c129] : memref<64x512xbf16, #tpu.memory_space<vmem>>, vector<64x256xbf16>
    %c5 = arith.constant 5 : index
    %c0_28 = arith.constant 0 : index
    %31 = vector.load %arg6[%c5, %c0_28] : memref<9x256xbf16, #tpu.memory_space<vmem>>, vector<1x256xbf16>
    %32 = vector.broadcast %31 : vector<1x256xbf16> to vector<64x256xbf16>
    %33 = arith.mulf %30, %32 : vector<64x256xbf16>
    %c320 = arith.constant 320 : index
    %c0_29 = arith.constant 0 : index
    %34 = vector.load %arg10[%c320, %c0_29] : memref<576x256xbf16, #tpu.memory_space<vmem>>, vector<64x256xbf16>
    tpu.vector_store %arg10[%c320, %c0_29], %33 {strides = array<i32>} : memref<576x256xbf16, #tpu.memory_space<vmem>>, vector<64x256xbf16>,
    %c0_30 = arith.constant 0 : index
    %c143 = arith.constant 143 : index
    %35 = vector.load %arg9[%c0_30, %c143] : memref<64x512xbf16, #tpu.memory_space<vmem>>, vector<64x256xbf16>
    %c6 = arith.constant 6 : index
    %c0_31 = arith.constant 0 : index
    %36 = vector.load %arg6[%c6, %c0_31] : memref<9x256xbf16, #tpu.memory_space<vmem>>, vector<1x256xbf16>
    %37 = vector.broadcast %36 : vector<1x256xbf16> to vector<64x256xbf16>
    %38 = arith.mulf %35, %37 : vector<64x256xbf16>
    %c384_32 = arith.constant 384 : index
    %c0_33 = arith.constant 0 : index
    %39 = vector.load %arg10[%c384_32, %c0_33] : memref<576x256xbf16, #tpu.memory_space<vmem>>, vector<64x256xbf16>
    tpu.vector_store %arg10[%c384_32, %c0_33], %38 {strides = array<i32>} : memref<576x256xbf16, #tpu.memory_space<vmem>>, vector<64x256xbf16>,
    %c0_34 = arith.constant 0 : index
    %c144 = arith.constant 144 : index
    %40 = vector.load %arg9[%c0_34, %c144] : memref<64x512xbf16, #tpu.memory_space<vmem>>, vector<64x256xbf16>
    %c7 = arith.constant 7 : index
    %c0_35 = arith.constant 0 : index
    %41 = vector.load %arg6[%c7, %c0_35] : memref<9x256xbf16, #tpu.memory_space<vmem>>, vector<1x256xbf16>
    %42 = vector.broadcast %41 : vector<1x256xbf16> to vector<64x256xbf16>
    %43 = arith.mulf %40, %42 : vector<64x256xbf16>
    %c448 = arith.constant 448 : index
    %c0_36 = arith.constant 0 : index
    %44 = vector.load %arg10[%c448, %c0_36] : memref<576x256xbf16, #tpu.memory_space<vmem>>, vector<64x256xbf16>
    tpu.vector_store %arg10[%c448, %c0_36], %43 {strides = array<i32>} : memref<576x256xbf16, #tpu.memory_space<vmem>>, vector<64x256xbf16>,
    %c0_37 = arith.constant 0 : index
    %c145 = arith.constant 145 : index
    %45 = vector.load %arg9[%c0_37, %c145] : memref<64x512xbf16, #tpu.memory_space<vmem>>, vector<64x256xbf16>
    %c8 = arith.constant 8 : index
    %c0_38 = arith.constant 0 : index
    %46 = vector.load %arg6[%c8, %c0_38] : memref<9x256xbf16, #tpu.memory_space<vmem>>, vector<1x256xbf16>
    %47 = vector.broadcast %46 : vector<1x256xbf16> to vector<64x256xbf16>
    %48 = arith.mulf %45, %47 : vector<64x256xbf16>
    %c512 = arith.constant 512 : index
    %c0_39 = arith.constant 0 : index
    %49 = vector.load %arg10[%c512, %c0_39] : memref<576x256xbf16, #tpu.memory_space<vmem>>, vector<64x256xbf16>
    tpu.vector_store %arg10[%c512, %c0_39], %48 {strides = array<i32>} : memref<576x256xbf16, #tpu.memory_space<vmem>>, vector<64x256xbf16>,
    %c0_40 = arith.constant 0 : index
    %c0_41 = arith.constant 0 : index
    %50 = vector.load %arg4[%c0_40, %c0_41] : memref<128x576xbf16, #tpu.memory_space<vmem>>, vector<128x576xbf16>
    %c0_42 = arith.constant 0 : index
    %c0_43 = arith.constant 0 : index
    %51 = vector.load %arg10[%c0_42, %c0_43] : memref<576x256xbf16, #tpu.memory_space<vmem>>, vector<576x256xbf16>
    %cst_44 = arith.constant dense<0.000000e+00> : vector<128x256xf32>
    %52 = tpu.matmul %50, %51, %cst_44 {dimension_numbers = #tpu.dot_dimension_numbers<[1], [0], [0], [1], [0, 0, 1, 1], [], []>} : vector<128x576xbf16>, vector<576x256xbf16>, vector<128x256xf32> -> vector<128x256xf32>
    %c0_45 = arith.constant 0 : index
    %c0_46 = arith.constant 0 : index
    %53 = vector.load %arg5[%c0_45, %c0_46] : memref<128x1xf32, #tpu.memory_space<vmem>>, vector<128x1xf32>
    %54 = vector.broadcast %53 : vector<128x1xf32> to vector<128x256xf32>
    %55 = arith.addf %52, %54 : vector<128x256xf32>
    %56 = vector.extract_strided_slice %55 {offsets = [0, 0], sizes = [32, 256], strides = [1, 1]} : vector<128x256xf32> to vector<32x256xf32>
    %cst_47 = arith.constant 5.000000e-01 : f32
    %57 = vector.broadcast %cst_47 : f32 to vector<32x256xf32>
    %58 = arith.mulf %57, %56 : vector<32x256xf32>
    %59 = math.tanh %58 : vector<32x256xf32>
    %cst_48 = arith.constant 5.000000e-01 : f32
    %60 = vector.broadcast %cst_48 : f32 to vector<32x256xf32>
    %61 = arith.mulf %60, %59 : vector<32x256xf32>
    %cst_49 = arith.constant 5.000000e-01 : f32
    %62 = vector.broadcast %cst_49 : f32 to vector<32x256xf32>
    %63 = arith.addf %61, %62 : vector<32x256xf32>
    %64 = vector.extract_strided_slice %55 {offsets = [32, 0], sizes = [32, 256], strides = [1, 1]} : vector<128x256xf32> to vector<32x256xf32>
    %cst_50 = arith.constant 5.000000e-01 : f32
    %65 = vector.broadcast %cst_50 : f32 to vector<32x256xf32>
    %66 = arith.mulf %65, %64 : vector<32x256xf32>
    %67 = math.tanh %66 : vector<32x256xf32>
    %cst_51 = arith.constant 5.000000e-01 : f32
    %68 = vector.broadcast %cst_51 : f32 to vector<32x256xf32>
    %69 = arith.mulf %68, %67 : vector<32x256xf32>
    %cst_52 = arith.constant 5.000000e-01 : f32
    %70 = vector.broadcast %cst_52 : f32 to vector<32x256xf32>
    %71 = arith.addf %69, %70 : vector<32x256xf32>
    %72 = vector.extract_strided_slice %55 {offsets = [64, 0], sizes = [32, 256], strides = [1, 1]} : vector<128x256xf32> to vector<32x256xf32>
    %73 = math.tanh %72 : vector<32x256xf32>
    %74 = vector.extract_strided_slice %55 {offsets = [96, 0], sizes = [32, 256], strides = [1, 1]} : vector<128x256xf32> to vector<32x256xf32>
    %cst_53 = arith.constant 5.000000e-01 : f32
    %75 = vector.broadcast %cst_53 : f32 to vector<32x256xf32>
    %76 = arith.mulf %75, %74 : vector<32x256xf32>
    %77 = math.tanh %76 : vector<32x256xf32>
    %cst_54 = arith.constant 5.000000e-01 : f32
    %78 = vector.broadcast %cst_54 : f32 to vector<32x256xf32>
    %79 = arith.mulf %78, %77 : vector<32x256xf32>
    %cst_55 = arith.constant 5.000000e-01 : f32
    %80 = vector.broadcast %cst_55 : f32 to vector<32x256xf32>
    %81 = arith.addf %79, %80 : vector<32x256xf32>
    %c0_56 = arith.constant 0 : index
    %c0_57 = arith.constant 0 : index
    %82 = vector.load %arg3[%c0_56, %c0_57] : memref<32x256xf32, #tpu.memory_space<vmem>>, vector<32x256xf32>
    %83 = arith.mulf %71, %82 : vector<32x256xf32>
    %84 = arith.mulf %63, %73 : vector<32x256xf32>
    %85 = arith.addf %83, %84 : vector<32x256xf32>
    %86 = math.tanh %85 : vector<32x256xf32>
    %87 = arith.mulf %81, %86 : vector<32x256xf32>
    %88 = arith.truncf %87 : vector<32x256xf32> to vector<32x256xbf16>
    %c0_58 = arith.constant 0 : index
    %c0_59 = arith.constant 0 : index
    %89 = vector.load %arg7[%c0_58, %c0_59] : memref<32x256xbf16, #tpu.memory_space<vmem>>, vector<32x256xbf16>
    tpu.vector_store %arg7[%c0_58, %c0_59], %88 {strides = array<i32>} : memref<32x256xbf16, #tpu.memory_space<vmem>>, vector<32x256xbf16>,
    %c0_60 = arith.constant 0 : index
    %c0_61 = arith.constant 0 : index
    %90 = vector.load %arg8[%c0_60, %c0_61] : memref<32x256xf32, #tpu.memory_space<vmem>>, vector<32x256xf32>
    tpu.vector_store %arg8[%c0_60, %c0_61], %85 {strides = array<i32>} : memref<32x256xf32, #tpu.memory_space<vmem>>, vector<32x256xf32>,
    return
  }
  func.func @transform_0(%arg0: i32) -> (i32, i32) {
    %c0_i32 = arith.constant 0 : i32
    %c0_i32_0 = arith.constant 0 : i32
    return %c0_i32, %arg0 : i32, i32
  }
  func.func @transform_1(%arg0: i32) -> (i32, i32) {
    %c0_i32 = arith.constant 0 : i32
    %c0_i32_0 = arith.constant 0 : i32
    return %c0_i32, %arg0 : i32, i32
  }
  func.func @transform_2(%arg0: i32) -> (i32, i32) {
    %c0_i32 = arith.constant 0 : i32
    %c0_i32_0 = arith.constant 0 : i32
    return %c0_i32, %arg0 : i32, i32
  }
  func.func @transform_3(%arg0: i32) -> (i32, i32) {
    %c0_i32 = arith.constant 0 : i32
    %c0_i32_0 = arith.constant 0 : i32
    %c0_i32_1 = arith.constant 0 : i32
    return %c0_i32, %c0_i32_0 : i32, i32
  }
  func.func @transform_4(%arg0: i32) -> (i32, i32) {
    %c0_i32 = arith.constant 0 : i32
    %c0_i32_0 = arith.constant 0 : i32
    %c0_i32_1 = arith.constant 0 : i32
    return %c0_i32, %c0_i32_0 : i32, i32
  }
  func.func @transform_5(%arg0: i32) -> (i32, i32) {
    %c0_i32 = arith.constant 0 : i32
    %c0_i32_0 = arith.constant 0 : i32
    %c0_i32_1 = arith.constant 0 : i32
    return %c0_i32, %c0_i32_0 : i32, i32
  }
  func.func @transform_6(%arg0: i32) -> (i32, i32) {
    %c0_i32 = arith.constant 0 : i32
    %c0_i32_0 = arith.constant 0 : i32
    return %c0_i32, %arg0 : i32, i32
  }
  func.func @transform_7(%arg0: i32) -> (i32, i32) {
    %c0_i32 = arith.constant 0 : i32
    %c0_i32_0 = arith.constant 0 : i32
    return %c0_i32, %arg0 : i32, i32
  }
}

module attributes {stable_mosaic.version = 11 : i64} {
  func.func @_cms_cell_kernel(%arg0: i32, %arg1: memref<32x128xbf16, #tpu.memory_space<vmem>>, %arg2: memref<32x128xbf16, #tpu.memory_space<vmem>>, %arg3: memref<32x128xf32, #tpu.memory_space<vmem>>, %arg4: memref<128x576xbf16, #tpu.memory_space<vmem>>, %arg5: memref<128x1xf32, #tpu.memory_space<vmem>>, %arg6: memref<9x128xbf16, #tpu.memory_space<vmem>>, %arg7: memref<32x128xbf16, #tpu.memory_space<vmem>>, %arg8: memref<32x128xf32, #tpu.memory_space<vmem>>, %arg9: memref<64x384xbf16, #tpu.memory_space<vmem>>, %arg10: memref<576x128xbf16, #tpu.memory_space<vmem>>) attributes {dimension_semantics = [#tpu.dimension_semantics<parallel>], iteration_bounds = array<i64: 1>, scalar_prefetch = 0 : i64, scratch_operands = 2 : i64, tpu.core_type = #tpu.core_type<tc>, window_params = [{transform_indices = @transform_0, window_bounds = array<i64: 32, 128>}, {transform_indices = @transform_1, window_bounds = array<i64: 32, 128>}, {transform_indices = @transform_2, window_bounds = array<i64: 32, 128>}, {pipeline_mode = #tpu.pipeline_mode<synchronous>, transform_indices = @transform_3, window_bounds = array<i64: 128, 576>}, {pipeline_mode = #tpu.pipeline_mode<synchronous>, transform_indices = @transform_4, window_bounds = array<i64: 128, 1>}, {pipeline_mode = #tpu.pipeline_mode<synchronous>, transform_indices = @transform_5, window_bounds = array<i64: 9, 128>}, {transform_indices = @transform_6, window_bounds = array<i64: 32, 128>}, {transform_indices = @transform_7, window_bounds = array<i64: 32, 128>}]} {
    %cst = arith.constant 0.000000e+00 : bf16
    %0 = vector.broadcast %cst : bf16 to vector<64x128xbf16>
    %c0 = arith.constant 0 : index
    %c0_0 = arith.constant 0 : index
    %1 = vector.load %arg9[%c0, %c0_0] : memref<64x384xbf16, #tpu.memory_space<vmem>>, vector<64x128xbf16>
    tpu.vector_store %arg9[%c0, %c0_0], %0 {strides = array<i32>} : memref<64x384xbf16, #tpu.memory_space<vmem>>, vector<64x128xbf16>,
    %cst_1 = arith.constant 0.000000e+00 : bf16
    %2 = vector.broadcast %cst_1 : bf16 to vector<64x128xbf16>
    %c0_2 = arith.constant 0 : index
    %c256 = arith.constant 256 : index
    %3 = vector.load %arg9[%c0_2, %c256] : memref<64x384xbf16, #tpu.memory_space<vmem>>, vector<64x128xbf16>
    tpu.vector_store %arg9[%c0_2, %c256], %2 {strides = array<i32>} : memref<64x384xbf16, #tpu.memory_space<vmem>>, vector<64x128xbf16>,
    %c0_3 = arith.constant 0 : index
    %c0_4 = arith.constant 0 : index
    %4 = vector.load %arg1[%c0_3, %c0_4] : memref<32x128xbf16, #tpu.memory_space<vmem>>, vector<32x128xbf16>
    %c0_5 = arith.constant 0 : index
    %c128 = arith.constant 128 : index
    %5 = vector.load %arg9[%c0_5, %c128] : memref<64x384xbf16, #tpu.memory_space<vmem>>, vector<32x128xbf16>
    tpu.vector_store %arg9[%c0_5, %c128], %4 {strides = array<i32>} : memref<64x384xbf16, #tpu.memory_space<vmem>>, vector<32x128xbf16>,
    %c0_6 = arith.constant 0 : index
    %c0_7 = arith.constant 0 : index
    %6 = vector.load %arg2[%c0_6, %c0_7] : memref<32x128xbf16, #tpu.memory_space<vmem>>, vector<32x128xbf16>
    %c32 = arith.constant 32 : index
    %c128_8 = arith.constant 128 : index
    %7 = vector.load %arg9[%c32, %c128_8] : memref<64x384xbf16, #tpu.memory_space<vmem>>, vector<32x128xbf16>
    tpu.vector_store %arg9[%c32, %c128_8], %6 {strides = array<i32>} : memref<64x384xbf16, #tpu.memory_space<vmem>>, vector<32x128xbf16>,
    %c0_9 = arith.constant 0 : index
    %c119 = arith.constant 119 : index
    %8 = vector.load %arg9[%c0_9, %c119] : memref<64x384xbf16, #tpu.memory_space<vmem>>, vector<64x128xbf16>
    %c0_10 = arith.constant 0 : index
    %c0_11 = arith.constant 0 : index
    %9 = vector.load %arg6[%c0_10, %c0_11] : memref<9x128xbf16, #tpu.memory_space<vmem>>, vector<1x128xbf16>
    %10 = vector.broadcast %9 : vector<1x128xbf16> to vector<64x128xbf16>
    %11 = arith.mulf %8, %10 : vector<64x128xbf16>
    %c0_12 = arith.constant 0 : index
    %c0_13 = arith.constant 0 : index
    %12 = vector.load %arg10[%c0_12, %c0_13] : memref<576x128xbf16, #tpu.memory_space<vmem>>, vector<64x128xbf16>
    tpu.vector_store %arg10[%c0_12, %c0_13], %11 {strides = array<i32>} : memref<576x128xbf16, #tpu.memory_space<vmem>>, vector<64x128xbf16>,
    %c0_14 = arith.constant 0 : index
    %c120 = arith.constant 120 : index
    %13 = vector.load %arg9[%c0_14, %c120] : memref<64x384xbf16, #tpu.memory_space<vmem>>, vector<64x128xbf16>
    %c1 = arith.constant 1 : index
    %c0_15 = arith.constant 0 : index
    %14 = vector.load %arg6[%c1, %c0_15] : memref<9x128xbf16, #tpu.memory_space<vmem>>, vector<1x128xbf16>
    %15 = vector.broadcast %14 : vector<1x128xbf16> to vector<64x128xbf16>
    %16 = arith.mulf %13, %15 : vector<64x128xbf16>
    %c64 = arith.constant 64 : index
    %c0_16 = arith.constant 0 : index
    %17 = vector.load %arg10[%c64, %c0_16] : memref<576x128xbf16, #tpu.memory_space<vmem>>, vector<64x128xbf16>
    tpu.vector_store %arg10[%c64, %c0_16], %16 {strides = array<i32>} : memref<576x128xbf16, #tpu.memory_space<vmem>>, vector<64x128xbf16>,
    %c0_17 = arith.constant 0 : index
    %c121 = arith.constant 121 : index
    %18 = vector.load %arg9[%c0_17, %c121] : memref<64x384xbf16, #tpu.memory_space<vmem>>, vector<64x128xbf16>
    %c2 = arith.constant 2 : index
    %c0_18 = arith.constant 0 : index
    %19 = vector.load %arg6[%c2, %c0_18] : memref<9x128xbf16, #tpu.memory_space<vmem>>, vector<1x128xbf16>
    %20 = vector.broadcast %19 : vector<1x128xbf16> to vector<64x128xbf16>
    %21 = arith.mulf %18, %20 : vector<64x128xbf16>
    %c128_19 = arith.constant 128 : index
    %c0_20 = arith.constant 0 : index
    %22 = vector.load %arg10[%c128_19, %c0_20] : memref<576x128xbf16, #tpu.memory_space<vmem>>, vector<64x128xbf16>
    tpu.vector_store %arg10[%c128_19, %c0_20], %21 {strides = array<i32>} : memref<576x128xbf16, #tpu.memory_space<vmem>>, vector<64x128xbf16>,
    %c0_21 = arith.constant 0 : index
    %c127 = arith.constant 127 : index
    %23 = vector.load %arg9[%c0_21, %c127] : memref<64x384xbf16, #tpu.memory_space<vmem>>, vector<64x128xbf16>
    %c3 = arith.constant 3 : index
    %c0_22 = arith.constant 0 : index
    %24 = vector.load %arg6[%c3, %c0_22] : memref<9x128xbf16, #tpu.memory_space<vmem>>, vector<1x128xbf16>
    %25 = vector.broadcast %24 : vector<1x128xbf16> to vector<64x128xbf16>
    %26 = arith.mulf %23, %25 : vector<64x128xbf16>
    %c192 = arith.constant 192 : index
    %c0_23 = arith.constant 0 : index
    %27 = vector.load %arg10[%c192, %c0_23] : memref<576x128xbf16, #tpu.memory_space<vmem>>, vector<64x128xbf16>
    tpu.vector_store %arg10[%c192, %c0_23], %26 {strides = array<i32>} : memref<576x128xbf16, #tpu.memory_space<vmem>>, vector<64x128xbf16>,
    %c0_24 = arith.constant 0 : index
    %c128_25 = arith.constant 128 : index
    %28 = vector.load %arg9[%c0_24, %c128_25] : memref<64x384xbf16, #tpu.memory_space<vmem>>, vector<64x128xbf16>
    %c256_26 = arith.constant 256 : index
    %c0_27 = arith.constant 0 : index
    %29 = vector.load %arg10[%c256_26, %c0_27] : memref<576x128xbf16, #tpu.memory_space<vmem>>, vector<64x128xbf16>
    tpu.vector_store %arg10[%c256_26, %c0_27], %28 {strides = array<i32>} : memref<576x128xbf16, #tpu.memory_space<vmem>>, vector<64x128xbf16>,
    %c0_28 = arith.constant 0 : index
    %c129 = arith.constant 129 : index
    %30 = vector.load %arg9[%c0_28, %c129] : memref<64x384xbf16, #tpu.memory_space<vmem>>, vector<64x128xbf16>
    %c5 = arith.constant 5 : index
    %c0_29 = arith.constant 0 : index
    %31 = vector.load %arg6[%c5, %c0_29] : memref<9x128xbf16, #tpu.memory_space<vmem>>, vector<1x128xbf16>
    %32 = vector.broadcast %31 : vector<1x128xbf16> to vector<64x128xbf16>
    %33 = arith.mulf %30, %32 : vector<64x128xbf16>
    %c320 = arith.constant 320 : index
    %c0_30 = arith.constant 0 : index
    %34 = vector.load %arg10[%c320, %c0_30] : memref<576x128xbf16, #tpu.memory_space<vmem>>, vector<64x128xbf16>
    tpu.vector_store %arg10[%c320, %c0_30], %33 {strides = array<i32>} : memref<576x128xbf16, #tpu.memory_space<vmem>>, vector<64x128xbf16>,
    %c0_31 = arith.constant 0 : index
    %c135 = arith.constant 135 : index
    %35 = vector.load %arg9[%c0_31, %c135] : memref<64x384xbf16, #tpu.memory_space<vmem>>, vector<64x128xbf16>
    %c6 = arith.constant 6 : index
    %c0_32 = arith.constant 0 : index
    %36 = vector.load %arg6[%c6, %c0_32] : memref<9x128xbf16, #tpu.memory_space<vmem>>, vector<1x128xbf16>
    %37 = vector.broadcast %36 : vector<1x128xbf16> to vector<64x128xbf16>
    %38 = arith.mulf %35, %37 : vector<64x128xbf16>
    %c384 = arith.constant 384 : index
    %c0_33 = arith.constant 0 : index
    %39 = vector.load %arg10[%c384, %c0_33] : memref<576x128xbf16, #tpu.memory_space<vmem>>, vector<64x128xbf16>
    tpu.vector_store %arg10[%c384, %c0_33], %38 {strides = array<i32>} : memref<576x128xbf16, #tpu.memory_space<vmem>>, vector<64x128xbf16>,
    %c0_34 = arith.constant 0 : index
    %c136 = arith.constant 136 : index
    %40 = vector.load %arg9[%c0_34, %c136] : memref<64x384xbf16, #tpu.memory_space<vmem>>, vector<64x128xbf16>
    %c7 = arith.constant 7 : index
    %c0_35 = arith.constant 0 : index
    %41 = vector.load %arg6[%c7, %c0_35] : memref<9x128xbf16, #tpu.memory_space<vmem>>, vector<1x128xbf16>
    %42 = vector.broadcast %41 : vector<1x128xbf16> to vector<64x128xbf16>
    %43 = arith.mulf %40, %42 : vector<64x128xbf16>
    %c448 = arith.constant 448 : index
    %c0_36 = arith.constant 0 : index
    %44 = vector.load %arg10[%c448, %c0_36] : memref<576x128xbf16, #tpu.memory_space<vmem>>, vector<64x128xbf16>
    tpu.vector_store %arg10[%c448, %c0_36], %43 {strides = array<i32>} : memref<576x128xbf16, #tpu.memory_space<vmem>>, vector<64x128xbf16>,
    %c0_37 = arith.constant 0 : index
    %c137 = arith.constant 137 : index
    %45 = vector.load %arg9[%c0_37, %c137] : memref<64x384xbf16, #tpu.memory_space<vmem>>, vector<64x128xbf16>
    %c8 = arith.constant 8 : index
    %c0_38 = arith.constant 0 : index
    %46 = vector.load %arg6[%c8, %c0_38] : memref<9x128xbf16, #tpu.memory_space<vmem>>, vector<1x128xbf16>
    %47 = vector.broadcast %46 : vector<1x128xbf16> to vector<64x128xbf16>
    %48 = arith.mulf %45, %47 : vector<64x128xbf16>
    %c512 = arith.constant 512 : index
    %c0_39 = arith.constant 0 : index
    %49 = vector.load %arg10[%c512, %c0_39] : memref<576x128xbf16, #tpu.memory_space<vmem>>, vector<64x128xbf16>
    tpu.vector_store %arg10[%c512, %c0_39], %48 {strides = array<i32>} : memref<576x128xbf16, #tpu.memory_space<vmem>>, vector<64x128xbf16>,
    %c0_40 = arith.constant 0 : index
    %c0_41 = arith.constant 0 : index
    %50 = vector.load %arg4[%c0_40, %c0_41] : memref<128x576xbf16, #tpu.memory_space<vmem>>, vector<128x576xbf16>
    %c0_42 = arith.constant 0 : index
    %c0_43 = arith.constant 0 : index
    %51 = vector.load %arg10[%c0_42, %c0_43] : memref<576x128xbf16, #tpu.memory_space<vmem>>, vector<576x128xbf16>
    %cst_44 = arith.constant dense<0.000000e+00> : vector<128x128xf32>
    %52 = tpu.matmul %50, %51, %cst_44 {dimension_numbers = #tpu.dot_dimension_numbers<[1], [0], [0], [1], [0, 0, 1, 1], [], []>} : vector<128x576xbf16>, vector<576x128xbf16>, vector<128x128xf32> -> vector<128x128xf32>
    %c0_45 = arith.constant 0 : index
    %c0_46 = arith.constant 0 : index
    %53 = vector.load %arg5[%c0_45, %c0_46] : memref<128x1xf32, #tpu.memory_space<vmem>>, vector<128x1xf32>
    %54 = vector.broadcast %53 : vector<128x1xf32> to vector<128x128xf32>
    %55 = arith.addf %52, %54 : vector<128x128xf32>
    %56 = vector.extract_strided_slice %55 {offsets = [0, 0], sizes = [32, 128], strides = [1, 1]} : vector<128x128xf32> to vector<32x128xf32>
    %cst_47 = arith.constant 5.000000e-01 : f32
    %57 = vector.broadcast %cst_47 : f32 to vector<32x128xf32>
    %58 = arith.mulf %57, %56 : vector<32x128xf32>
    %59 = math.tanh %58 : vector<32x128xf32>
    %cst_48 = arith.constant 5.000000e-01 : f32
    %60 = vector.broadcast %cst_48 : f32 to vector<32x128xf32>
    %61 = arith.mulf %60, %59 : vector<32x128xf32>
    %cst_49 = arith.constant 5.000000e-01 : f32
    %62 = vector.broadcast %cst_49 : f32 to vector<32x128xf32>
    %63 = arith.addf %61, %62 : vector<32x128xf32>
    %64 = vector.extract_strided_slice %55 {offsets = [32, 0], sizes = [32, 128], strides = [1, 1]} : vector<128x128xf32> to vector<32x128xf32>
    %cst_50 = arith.constant 5.000000e-01 : f32
    %65 = vector.broadcast %cst_50 : f32 to vector<32x128xf32>
    %66 = arith.mulf %65, %64 : vector<32x128xf32>
    %67 = math.tanh %66 : vector<32x128xf32>
    %cst_51 = arith.constant 5.000000e-01 : f32
    %68 = vector.broadcast %cst_51 : f32 to vector<32x128xf32>
    %69 = arith.mulf %68, %67 : vector<32x128xf32>
    %cst_52 = arith.constant 5.000000e-01 : f32
    %70 = vector.broadcast %cst_52 : f32 to vector<32x128xf32>
    %71 = arith.addf %69, %70 : vector<32x128xf32>
    %72 = vector.extract_strided_slice %55 {offsets = [64, 0], sizes = [32, 128], strides = [1, 1]} : vector<128x128xf32> to vector<32x128xf32>
    %73 = math.tanh %72 : vector<32x128xf32>
    %74 = vector.extract_strided_slice %55 {offsets = [96, 0], sizes = [32, 128], strides = [1, 1]} : vector<128x128xf32> to vector<32x128xf32>
    %cst_53 = arith.constant 5.000000e-01 : f32
    %75 = vector.broadcast %cst_53 : f32 to vector<32x128xf32>
    %76 = arith.mulf %75, %74 : vector<32x128xf32>
    %77 = math.tanh %76 : vector<32x128xf32>
    %cst_54 = arith.constant 5.000000e-01 : f32
    %78 = vector.broadcast %cst_54 : f32 to vector<32x128xf32>
    %79 = arith.mulf %78, %77 : vector<32x128xf32>
    %cst_55 = arith.constant 5.000000e-01 : f32
    %80 = vector.broadcast %cst_55 : f32 to vector<32x128xf32>
    %81 = arith.addf %79, %80 : vector<32x128xf32>
    %c0_56 = arith.constant 0 : index
    %c0_57 = arith.constant 0 : index
    %82 = vector.load %arg3[%c0_56, %c0_57] : memref<32x128xf32, #tpu.memory_space<vmem>>, vector<32x128xf32>
    %83 = arith.mulf %71, %82 : vector<32x128xf32>
    %84 = arith.mulf %63, %73 : vector<32x128xf32>
    %85 = arith.addf %83, %84 : vector<32x128xf32>
    %86 = math.tanh %85 : vector<32x128xf32>
    %87 = arith.mulf %81, %86 : vector<32x128xf32>
    %88 = arith.truncf %87 : vector<32x128xf32> to vector<32x128xbf16>
    %c0_58 = arith.constant 0 : index
    %c0_59 = arith.constant 0 : index
    %89 = vector.load %arg7[%c0_58, %c0_59] : memref<32x128xbf16, #tpu.memory_space<vmem>>, vector<32x128xbf16>
    tpu.vector_store %arg7[%c0_58, %c0_59], %88 {strides = array<i32>} : memref<32x128xbf16, #tpu.memory_space<vmem>>, vector<32x128xbf16>,
    %c0_60 = arith.constant 0 : index
    %c0_61 = arith.constant 0 : index
    %90 = vector.load %arg8[%c0_60, %c0_61] : memref<32x128xf32, #tpu.memory_space<vmem>>, vector<32x128xf32>
    tpu.vector_store %arg8[%c0_60, %c0_61], %85 {strides = array<i32>} : memref<32x128xf32, #tpu.memory_space<vmem>>, vector<32x128xf32>,
    return
  }
  func.func @transform_0(%arg0: i32) -> (i32, i32) {
    %c0_i32 = arith.constant 0 : i32
    %c0_i32_0 = arith.constant 0 : i32
    return %c0_i32, %arg0 : i32, i32
  }
  func.func @transform_1(%arg0: i32) -> (i32, i32) {
    %c0_i32 = arith.constant 0 : i32
    %c0_i32_0 = arith.constant 0 : i32
    return %c0_i32, %arg0 : i32, i32
  }
  func.func @transform_2(%arg0: i32) -> (i32, i32) {
    %c0_i32 = arith.constant 0 : i32
    %c0_i32_0 = arith.constant 0 : i32
    return %c0_i32, %arg0 : i32, i32
  }
  func.func @transform_3(%arg0: i32) -> (i32, i32) {
    %c0_i32 = arith.constant 0 : i32
    %c0_i32_0 = arith.constant 0 : i32
    %c0_i32_1 = arith.constant 0 : i32
    return %c0_i32, %c0_i32_0 : i32, i32
  }
  func.func @transform_4(%arg0: i32) -> (i32, i32) {
    %c0_i32 = arith.constant 0 : i32
    %c0_i32_0 = arith.constant 0 : i32
    %c0_i32_1 = arith.constant 0 : i32
    return %c0_i32, %c0_i32_0 : i32, i32
  }
  func.func @transform_5(%arg0: i32) -> (i32, i32) {
    %c0_i32 = arith.constant 0 : i32
    %c0_i32_0 = arith.constant 0 : i32
    %c0_i32_1 = arith.constant 0 : i32
    return %c0_i32, %c0_i32_0 : i32, i32
  }
  func.func @transform_6(%arg0: i32) -> (i32, i32) {
    %c0_i32 = arith.constant 0 : i32
    %c0_i32_0 = arith.constant 0 : i32
    return %c0_i32, %arg0 : i32, i32
  }
  func.func @transform_7(%arg0: i32) -> (i32, i32) {
    %c0_i32 = arith.constant 0 : i32
    %c0_i32_0 = arith.constant 0 : i32
    return %c0_i32, %arg0 : i32, i32
  }
}

module attributes {stable_mosaic.version = 11 : i64} {
  func.func @_cms_cell_kernel(%arg0: i32, %arg1: memref<32x32xbf16, #tpu.memory_space<vmem>>, %arg2: memref<32x32xbf16, #tpu.memory_space<vmem>>, %arg3: memref<32x32xf32, #tpu.memory_space<vmem>>, %arg4: memref<128x576xbf16, #tpu.memory_space<vmem>>, %arg5: memref<128x1xf32, #tpu.memory_space<vmem>>, %arg6: memref<9x32xbf16, #tpu.memory_space<vmem>>, %arg7: memref<32x32xbf16, #tpu.memory_space<vmem>>, %arg8: memref<32x32xf32, #tpu.memory_space<vmem>>, %arg9: memref<64x288xbf16, #tpu.memory_space<vmem>>, %arg10: memref<576x32xbf16, #tpu.memory_space<vmem>>) attributes {dimension_semantics = [#tpu.dimension_semantics<parallel>], iteration_bounds = array<i64: 1>, scalar_prefetch = 0 : i64, scratch_operands = 2 : i64, tpu.core_type = #tpu.core_type<tc>, window_params = [{transform_indices = @transform_0, window_bounds = array<i64: 32, 32>}, {transform_indices = @transform_1, window_bounds = array<i64: 32, 32>}, {transform_indices = @transform_2, window_bounds = array<i64: 32, 32>}, {pipeline_mode = #tpu.pipeline_mode<synchronous>, transform_indices = @transform_3, window_bounds = array<i64: 128, 576>}, {pipeline_mode = #tpu.pipeline_mode<synchronous>, transform_indices = @transform_4, window_bounds = array<i64: 128, 1>}, {pipeline_mode = #tpu.pipeline_mode<synchronous>, transform_indices = @transform_5, window_bounds = array<i64: 9, 32>}, {transform_indices = @transform_6, window_bounds = array<i64: 32, 32>}, {transform_indices = @transform_7, window_bounds = array<i64: 32, 32>}]} {
    %cst = arith.constant 0.000000e+00 : bf16
    %0 = vector.broadcast %cst : bf16 to vector<64x128xbf16>
    %c0 = arith.constant 0 : index
    %c0_0 = arith.constant 0 : index
    %1 = vector.load %arg9[%c0, %c0_0] : memref<64x288xbf16, #tpu.memory_space<vmem>>, vector<64x128xbf16>
    tpu.vector_store %arg9[%c0, %c0_0], %0 {strides = array<i32>} : memref<64x288xbf16, #tpu.memory_space<vmem>>, vector<64x128xbf16>,
    %cst_1 = arith.constant 0.000000e+00 : bf16
    %2 = vector.broadcast %cst_1 : bf16 to vector<64x128xbf16>
    %c0_2 = arith.constant 0 : index
    %c160 = arith.constant 160 : index
    %3 = vector.load %arg9[%c0_2, %c160] : memref<64x288xbf16, #tpu.memory_space<vmem>>, vector<64x128xbf16>
    tpu.vector_store %arg9[%c0_2, %c160], %2 {strides = array<i32>} : memref<64x288xbf16, #tpu.memory_space<vmem>>, vector<64x128xbf16>,
    %c0_3 = arith.constant 0 : index
    %c0_4 = arith.constant 0 : index
    %4 = vector.load %arg1[%c0_3, %c0_4] : memref<32x32xbf16, #tpu.memory_space<vmem>>, vector<32x32xbf16>
    %c0_5 = arith.constant 0 : index
    %c128 = arith.constant 128 : index
    %5 = vector.load %arg9[%c0_5, %c128] : memref<64x288xbf16, #tpu.memory_space<vmem>>, vector<32x32xbf16>
    tpu.vector_store %arg9[%c0_5, %c128], %4 {strides = array<i32>} : memref<64x288xbf16, #tpu.memory_space<vmem>>, vector<32x32xbf16>,
    %c0_6 = arith.constant 0 : index
    %c0_7 = arith.constant 0 : index
    %6 = vector.load %arg2[%c0_6, %c0_7] : memref<32x32xbf16, #tpu.memory_space<vmem>>, vector<32x32xbf16>
    %c32 = arith.constant 32 : index
    %c128_8 = arith.constant 128 : index
    %7 = vector.load %arg9[%c32, %c128_8] : memref<64x288xbf16, #tpu.memory_space<vmem>>, vector<32x32xbf16>
    tpu.vector_store %arg9[%c32, %c128_8], %6 {strides = array<i32>} : memref<64x288xbf16, #tpu.memory_space<vmem>>, vector<32x32xbf16>,
    %c0_9 = arith.constant 0 : index
    %c123 = arith.constant 123 : index
    %8 = vector.load %arg9[%c0_9, %c123] : memref<64x288xbf16, #tpu.memory_space<vmem>>, vector<64x32xbf16>
    %c0_10 = arith.constant 0 : index
    %c0_11 = arith.constant 0 : index
    %9 = vector.load %arg6[%c0_10, %c0_11] : memref<9x32xbf16, #tpu.memory_space<vmem>>, vector<1x32xbf16>
    %10 = vector.broadcast %9 : vector<1x32xbf16> to vector<64x32xbf16>
    %11 = arith.mulf %8, %10 : vector<64x32xbf16>
    %c0_12 = arith.constant 0 : index
    %c0_13 = arith.constant 0 : index
    %12 = vector.load %arg10[%c0_12, %c0_13] : memref<576x32xbf16, #tpu.memory_space<vmem>>, vector<64x32xbf16>
    tpu.vector_store %arg10[%c0_12, %c0_13], %11 {strides = array<i32>} : memref<576x32xbf16, #tpu.memory_space<vmem>>, vector<64x32xbf16>,
    %c0_14 = arith.constant 0 : index
    %c124 = arith.constant 124 : index
    %13 = vector.load %arg9[%c0_14, %c124] : memref<64x288xbf16, #tpu.memory_space<vmem>>, vector<64x32xbf16>
    %c1 = arith.constant 1 : index
    %c0_15 = arith.constant 0 : index
    %14 = vector.load %arg6[%c1, %c0_15] : memref<9x32xbf16, #tpu.memory_space<vmem>>, vector<1x32xbf16>
    %15 = vector.broadcast %14 : vector<1x32xbf16> to vector<64x32xbf16>
    %16 = arith.mulf %13, %15 : vector<64x32xbf16>
    %c64 = arith.constant 64 : index
    %c0_16 = arith.constant 0 : index
    %17 = vector.load %arg10[%c64, %c0_16] : memref<576x32xbf16, #tpu.memory_space<vmem>>, vector<64x32xbf16>
    tpu.vector_store %arg10[%c64, %c0_16], %16 {strides = array<i32>} : memref<576x32xbf16, #tpu.memory_space<vmem>>, vector<64x32xbf16>,
    %c0_17 = arith.constant 0 : index
    %c125 = arith.constant 125 : index
    %18 = vector.load %arg9[%c0_17, %c125] : memref<64x288xbf16, #tpu.memory_space<vmem>>, vector<64x32xbf16>
    %c2 = arith.constant 2 : index
    %c0_18 = arith.constant 0 : index
    %19 = vector.load %arg6[%c2, %c0_18] : memref<9x32xbf16, #tpu.memory_space<vmem>>, vector<1x32xbf16>
    %20 = vector.broadcast %19 : vector<1x32xbf16> to vector<64x32xbf16>
    %21 = arith.mulf %18, %20 : vector<64x32xbf16>
    %c128_19 = arith.constant 128 : index
    %c0_20 = arith.constant 0 : index
    %22 = vector.load %arg10[%c128_19, %c0_20] : memref<576x32xbf16, #tpu.memory_space<vmem>>, vector<64x32xbf16>
    tpu.vector_store %arg10[%c128_19, %c0_20], %21 {strides = array<i32>} : memref<576x32xbf16, #tpu.memory_space<vmem>>, vector<64x32xbf16>,
    %c0_21 = arith.constant 0 : index
    %c127 = arith.constant 127 : index
    %23 = vector.load %arg9[%c0_21, %c127] : memref<64x288xbf16, #tpu.memory_space<vmem>>, vector<64x32xbf16>
    %c3 = arith.constant 3 : index
    %c0_22 = arith.constant 0 : index
    %24 = vector.load %arg6[%c3, %c0_22] : memref<9x32xbf16, #tpu.memory_space<vmem>>, vector<1x32xbf16>
    %25 = vector.broadcast %24 : vector<1x32xbf16> to vector<64x32xbf16>
    %26 = arith.mulf %23, %25 : vector<64x32xbf16>
    %c192 = arith.constant 192 : index
    %c0_23 = arith.constant 0 : index
    %27 = vector.load %arg10[%c192, %c0_23] : memref<576x32xbf16, #tpu.memory_space<vmem>>, vector<64x32xbf16>
    tpu.vector_store %arg10[%c192, %c0_23], %26 {strides = array<i32>} : memref<576x32xbf16, #tpu.memory_space<vmem>>, vector<64x32xbf16>,
    %c0_24 = arith.constant 0 : index
    %c128_25 = arith.constant 128 : index
    %28 = vector.load %arg9[%c0_24, %c128_25] : memref<64x288xbf16, #tpu.memory_space<vmem>>, vector<64x32xbf16>
    %c256 = arith.constant 256 : index
    %c0_26 = arith.constant 0 : index
    %29 = vector.load %arg10[%c256, %c0_26] : memref<576x32xbf16, #tpu.memory_space<vmem>>, vector<64x32xbf16>
    tpu.vector_store %arg10[%c256, %c0_26], %28 {strides = array<i32>} : memref<576x32xbf16, #tpu.memory_space<vmem>>, vector<64x32xbf16>,
    %c0_27 = arith.constant 0 : index
    %c129 = arith.constant 129 : index
    %30 = vector.load %arg9[%c0_27, %c129] : memref<64x288xbf16, #tpu.memory_space<vmem>>, vector<64x32xbf16>
    %c5 = arith.constant 5 : index
    %c0_28 = arith.constant 0 : index
    %31 = vector.load %arg6[%c5, %c0_28] : memref<9x32xbf16, #tpu.memory_space<vmem>>, vector<1x32xbf16>
    %32 = vector.broadcast %31 : vector<1x32xbf16> to vector<64x32xbf16>
    %33 = arith.mulf %30, %32 : vector<64x32xbf16>
    %c320 = arith.constant 320 : index
    %c0_29 = arith.constant 0 : index
    %34 = vector.load %arg10[%c320, %c0_29] : memref<576x32xbf16, #tpu.memory_space<vmem>>, vector<64x32xbf16>
    tpu.vector_store %arg10[%c320, %c0_29], %33 {strides = array<i32>} : memref<576x32xbf16, #tpu.memory_space<vmem>>, vector<64x32xbf16>,
    %c0_30 = arith.constant 0 : index
    %c131 = arith.constant 131 : index
    %35 = vector.load %arg9[%c0_30, %c131] : memref<64x288xbf16, #tpu.memory_space<vmem>>, vector<64x32xbf16>
    %c6 = arith.constant 6 : index
    %c0_31 = arith.constant 0 : index
    %36 = vector.load %arg6[%c6, %c0_31] : memref<9x32xbf16, #tpu.memory_space<vmem>>, vector<1x32xbf16>
    %37 = vector.broadcast %36 : vector<1x32xbf16> to vector<64x32xbf16>
    %38 = arith.mulf %35, %37 : vector<64x32xbf16>
    %c384 = arith.constant 384 : index
    %c0_32 = arith.constant 0 : index
    %39 = vector.load %arg10[%c384, %c0_32] : memref<576x32xbf16, #tpu.memory_space<vmem>>, vector<64x32xbf16>
    tpu.vector_store %arg10[%c384, %c0_32], %38 {strides = array<i32>} : memref<576x32xbf16, #tpu.memory_space<vmem>>, vector<64x32xbf16>,
    %c0_33 = arith.constant 0 : index
    %c132 = arith.constant 132 : index
    %40 = vector.load %arg9[%c0_33, %c132] : memref<64x288xbf16, #tpu.memory_space<vmem>>, vector<64x32xbf16>
    %c7 = arith.constant 7 : index
    %c0_34 = arith.constant 0 : index
    %41 = vector.load %arg6[%c7, %c0_34] : memref<9x32xbf16, #tpu.memory_space<vmem>>, vector<1x32xbf16>
    %42 = vector.broadcast %41 : vector<1x32xbf16> to vector<64x32xbf16>
    %43 = arith.mulf %40, %42 : vector<64x32xbf16>
    %c448 = arith.constant 448 : index
    %c0_35 = arith.constant 0 : index
    %44 = vector.load %arg10[%c448, %c0_35] : memref<576x32xbf16, #tpu.memory_space<vmem>>, vector<64x32xbf16>
    tpu.vector_store %arg10[%c448, %c0_35], %43 {strides = array<i32>} : memref<576x32xbf16, #tpu.memory_space<vmem>>, vector<64x32xbf16>,
    %c0_36 = arith.constant 0 : index
    %c133 = arith.constant 133 : index
    %45 = vector.load %arg9[%c0_36, %c133] : memref<64x288xbf16, #tpu.memory_space<vmem>>, vector<64x32xbf16>
    %c8 = arith.constant 8 : index
    %c0_37 = arith.constant 0 : index
    %46 = vector.load %arg6[%c8, %c0_37] : memref<9x32xbf16, #tpu.memory_space<vmem>>, vector<1x32xbf16>
    %47 = vector.broadcast %46 : vector<1x32xbf16> to vector<64x32xbf16>
    %48 = arith.mulf %45, %47 : vector<64x32xbf16>
    %c512 = arith.constant 512 : index
    %c0_38 = arith.constant 0 : index
    %49 = vector.load %arg10[%c512, %c0_38] : memref<576x32xbf16, #tpu.memory_space<vmem>>, vector<64x32xbf16>
    tpu.vector_store %arg10[%c512, %c0_38], %48 {strides = array<i32>} : memref<576x32xbf16, #tpu.memory_space<vmem>>, vector<64x32xbf16>,
    %c0_39 = arith.constant 0 : index
    %c0_40 = arith.constant 0 : index
    %50 = vector.load %arg4[%c0_39, %c0_40] : memref<128x576xbf16, #tpu.memory_space<vmem>>, vector<128x576xbf16>
    %c0_41 = arith.constant 0 : index
    %c0_42 = arith.constant 0 : index
    %51 = vector.load %arg10[%c0_41, %c0_42] : memref<576x32xbf16, #tpu.memory_space<vmem>>, vector<576x32xbf16>
    %cst_43 = arith.constant dense<0.000000e+00> : vector<128x32xf32>
    %52 = tpu.matmul %50, %51, %cst_43 {dimension_numbers = #tpu.dot_dimension_numbers<[1], [0], [0], [1], [0, 0, 1, 1], [], []>} : vector<128x576xbf16>, vector<576x32xbf16>, vector<128x32xf32> -> vector<128x32xf32>
    %c0_44 = arith.constant 0 : index
    %c0_45 = arith.constant 0 : index
    %53 = vector.load %arg5[%c0_44, %c0_45] : memref<128x1xf32, #tpu.memory_space<vmem>>, vector<128x1xf32>
    %54 = vector.broadcast %53 : vector<128x1xf32> to vector<128x32xf32>
    %55 = arith.addf %52, %54 : vector<128x32xf32>
    %56 = vector.extract_strided_slice %55 {offsets = [0, 0], sizes = [32, 32], strides = [1, 1]} : vector<128x32xf32> to vector<32x32xf32>
    %cst_46 = arith.constant 5.000000e-01 : f32
    %57 = vector.broadcast %cst_46 : f32 to vector<32x32xf32>
    %58 = arith.mulf %57, %56 : vector<32x32xf32>
    %59 = math.tanh %58 : vector<32x32xf32>
    %cst_47 = arith.constant 5.000000e-01 : f32
    %60 = vector.broadcast %cst_47 : f32 to vector<32x32xf32>
    %61 = arith.mulf %60, %59 : vector<32x32xf32>
    %cst_48 = arith.constant 5.000000e-01 : f32
    %62 = vector.broadcast %cst_48 : f32 to vector<32x32xf32>
    %63 = arith.addf %61, %62 : vector<32x32xf32>
    %64 = vector.extract_strided_slice %55 {offsets = [32, 0], sizes = [32, 32], strides = [1, 1]} : vector<128x32xf32> to vector<32x32xf32>
    %cst_49 = arith.constant 5.000000e-01 : f32
    %65 = vector.broadcast %cst_49 : f32 to vector<32x32xf32>
    %66 = arith.mulf %65, %64 : vector<32x32xf32>
    %67 = math.tanh %66 : vector<32x32xf32>
    %cst_50 = arith.constant 5.000000e-01 : f32
    %68 = vector.broadcast %cst_50 : f32 to vector<32x32xf32>
    %69 = arith.mulf %68, %67 : vector<32x32xf32>
    %cst_51 = arith.constant 5.000000e-01 : f32
    %70 = vector.broadcast %cst_51 : f32 to vector<32x32xf32>
    %71 = arith.addf %69, %70 : vector<32x32xf32>
    %72 = vector.extract_strided_slice %55 {offsets = [64, 0], sizes = [32, 32], strides = [1, 1]} : vector<128x32xf32> to vector<32x32xf32>
    %73 = math.tanh %72 : vector<32x32xf32>
    %74 = vector.extract_strided_slice %55 {offsets = [96, 0], sizes = [32, 32], strides = [1, 1]} : vector<128x32xf32> to vector<32x32xf32>
    %cst_52 = arith.constant 5.000000e-01 : f32
    %75 = vector.broadcast %cst_52 : f32 to vector<32x32xf32>
    %76 = arith.mulf %75, %74 : vector<32x32xf32>
    %77 = math.tanh %76 : vector<32x32xf32>
    %cst_53 = arith.constant 5.000000e-01 : f32
    %78 = vector.broadcast %cst_53 : f32 to vector<32x32xf32>
    %79 = arith.mulf %78, %77 : vector<32x32xf32>
    %cst_54 = arith.constant 5.000000e-01 : f32
    %80 = vector.broadcast %cst_54 : f32 to vector<32x32xf32>
    %81 = arith.addf %79, %80 : vector<32x32xf32>
    %c0_55 = arith.constant 0 : index
    %c0_56 = arith.constant 0 : index
    %82 = vector.load %arg3[%c0_55, %c0_56] : memref<32x32xf32, #tpu.memory_space<vmem>>, vector<32x32xf32>
    %83 = arith.mulf %71, %82 : vector<32x32xf32>
    %84 = arith.mulf %63, %73 : vector<32x32xf32>
    %85 = arith.addf %83, %84 : vector<32x32xf32>
    %86 = math.tanh %85 : vector<32x32xf32>
    %87 = arith.mulf %81, %86 : vector<32x32xf32>
    %88 = arith.truncf %87 : vector<32x32xf32> to vector<32x32xbf16>
    %c0_57 = arith.constant 0 : index
    %c0_58 = arith.constant 0 : index
    %89 = vector.load %arg7[%c0_57, %c0_58] : memref<32x32xbf16, #tpu.memory_space<vmem>>, vector<32x32xbf16>
    tpu.vector_store %arg7[%c0_57, %c0_58], %88 {strides = array<i32>} : memref<32x32xbf16, #tpu.memory_space<vmem>>, vector<32x32xbf16>,
    %c0_59 = arith.constant 0 : index
    %c0_60 = arith.constant 0 : index
    %90 = vector.load %arg8[%c0_59, %c0_60] : memref<32x32xf32, #tpu.memory_space<vmem>>, vector<32x32xf32>
    tpu.vector_store %arg8[%c0_59, %c0_60], %85 {strides = array<i32>} : memref<32x32xf32, #tpu.memory_space<vmem>>, vector<32x32xf32>,
    return
  }
  func.func @transform_0(%arg0: i32) -> (i32, i32) {
    %c0_i32 = arith.constant 0 : i32
    %c0_i32_0 = arith.constant 0 : i32
    return %c0_i32, %arg0 : i32, i32
  }
  func.func @transform_1(%arg0: i32) -> (i32, i32) {
    %c0_i32 = arith.constant 0 : i32
    %c0_i32_0 = arith.constant 0 : i32
    return %c0_i32, %arg0 : i32, i32
  }
  func.func @transform_2(%arg0: i32) -> (i32, i32) {
    %c0_i32 = arith.constant 0 : i32
    %c0_i32_0 = arith.constant 0 : i32
    return %c0_i32, %arg0 : i32, i32
  }
  func.func @transform_3(%arg0: i32) -> (i32, i32) {
    %c0_i32 = arith.constant 0 : i32
    %c0_i32_0 = arith.constant 0 : i32
    %c0_i32_1 = arith.constant 0 : i32
    return %c0_i32, %c0_i32_0 : i32, i32
  }
  func.func @transform_4(%arg0: i32) -> (i32, i32) {
    %c0_i32 = arith.constant 0 : i32
    %c0_i32_0 = arith.constant 0 : i32
    %c0_i32_1 = arith.constant 0 : i32
    return %c0_i32, %c0_i32_0 : i32, i32
  }
  func.func @transform_5(%arg0: i32) -> (i32, i32) {
    %c0_i32 = arith.constant 0 : i32
    %c0_i32_0 = arith.constant 0 : i32
    %c0_i32_1 = arith.constant 0 : i32
    return %c0_i32, %c0_i32_0 : i32, i32
  }
  func.func @transform_6(%arg0: i32) -> (i32, i32) {
    %c0_i32 = arith.constant 0 : i32
    %c0_i32_0 = arith.constant 0 : i32
    return %c0_i32, %arg0 : i32, i32
  }
  func.func @transform_7(%arg0: i32) -> (i32, i32) {
    %c0_i32 = arith.constant 0 : i32
    %c0_i32_0 = arith.constant 0 : i32
    return %c0_i32, %arg0 : i32, i32
  }
}

module attributes {stable_mosaic.version = 11 : i64} {
  func.func @_conv1x1_kernel(%arg0: i32, %arg1: memref<32x512xbf16, #tpu.memory_space<vmem>>, %arg2: memref<8x32xbf16, #tpu.memory_space<vmem>>, %arg3: memref<8x1xf32, #tpu.memory_space<vmem>>, %arg4: memref<8x512xf32, #tpu.memory_space<vmem>>) attributes {dimension_semantics = [#tpu.dimension_semantics<parallel>], iteration_bounds = array<i64: 1>, scalar_prefetch = 0 : i64, scratch_operands = 0 : i64, tpu.core_type = #tpu.core_type<tc>, window_params = [{transform_indices = @transform_0, window_bounds = array<i64: 32, 512>}, {pipeline_mode = #tpu.pipeline_mode<synchronous>, transform_indices = @transform_1, window_bounds = array<i64: 8, 32>}, {pipeline_mode = #tpu.pipeline_mode<synchronous>, transform_indices = @transform_2, window_bounds = array<i64: 8, 1>}, {transform_indices = @transform_3, window_bounds = array<i64: 8, 512>}]} {
    %c0 = arith.constant 0 : index
    %c0_0 = arith.constant 0 : index
    %0 = vector.load %arg2[%c0, %c0_0] : memref<8x32xbf16, #tpu.memory_space<vmem>>, vector<8x32xbf16>
    %c0_1 = arith.constant 0 : index
    %c0_2 = arith.constant 0 : index
    %1 = vector.load %arg1[%c0_1, %c0_2] : memref<32x512xbf16, #tpu.memory_space<vmem>>, vector<32x512xbf16>
    %cst = arith.constant dense<0.000000e+00> : vector<8x512xf32>
    %2 = tpu.matmul %0, %1, %cst {dimension_numbers = #tpu.dot_dimension_numbers<[1], [0], [0], [1], [0, 0, 1, 1], [], []>} : vector<8x32xbf16>, vector<32x512xbf16>, vector<8x512xf32> -> vector<8x512xf32>
    %c0_3 = arith.constant 0 : index
    %c0_4 = arith.constant 0 : index
    %3 = vector.load %arg3[%c0_3, %c0_4] : memref<8x1xf32, #tpu.memory_space<vmem>>, vector<8x1xf32>
    %4 = vector.broadcast %3 : vector<8x1xf32> to vector<8x512xf32>
    %5 = arith.addf %2, %4 : vector<8x512xf32>
    %c0_5 = arith.constant 0 : index
    %c0_6 = arith.constant 0 : index
    %6 = vector.load %arg4[%c0_5, %c0_6] : memref<8x512xf32, #tpu.memory_space<vmem>>, vector<8x512xf32>
    tpu.vector_store %arg4[%c0_5, %c0_6], %5 {strides = array<i32>} : memref<8x512xf32, #tpu.memory_space<vmem>>, vector<8x512xf32>,
    return
  }
  func.func @transform_0(%arg0: i32) -> (i32, i32) {
    %c0_i32 = arith.constant 0 : i32
    %c0_i32_0 = arith.constant 0 : i32
    return %c0_i32, %arg0 : i32, i32
  }
  func.func @transform_1(%arg0: i32) -> (i32, i32) {
    %c0_i32 = arith.constant 0 : i32
    %c0_i32_0 = arith.constant 0 : i32
    %c0_i32_1 = arith.constant 0 : i32
    return %c0_i32, %c0_i32_0 : i32, i32
  }
  func.func @transform_2(%arg0: i32) -> (i32, i32) {
    %c0_i32 = arith.constant 0 : i32
    %c0_i32_0 = arith.constant 0 : i32
    %c0_i32_1 = arith.constant 0 : i32
    return %c0_i32, %c0_i32_0 : i32, i32
  }
  func.func @transform_3(%arg0: i32) -> (i32, i32) {
    %c0_i32 = arith.constant 0 : i32
    %c0_i32_0 = arith.constant 0 : i32
    return %c0_i32, %arg0 : i32, i32
  }
}

</mosaic_0001>

<bundles_post_ra>
// kernel: ms_cms_lstm_forward.8
= control target key start
LH: loop header
LB: loop body
LE: loop exit
PB: predicated region body
PF: predicated region fallthrough
CT: control target
= control target key end

     0   :  { %vm72_vm0 = vcmask 1041408   ;;  %v282_v2 = vmov 0   ;;  %vm65_vm1 = vcmask 31744   ;;  %s355_s0 = inlined_call_operand.vmem [shape: f32[4,512], index: 0, kind: input, shape index: {}]   ;;  %s356_s1 = inlined_call_operand.vmem [shape: bf16[32,4], index: 1, kind: input, shape index: {}]   ;;  %s357_s2 = inlined_call_operand.vmem [shape: f32[32,1], index: 2, kind: input, shape index: {}]   ;;  %s358_s3 = inlined_call_operand.vmem [shape: bf16[32,512], index: 3, kind: output, shape index: {}]  }
   0x1   :  { %v19_v0 = vld [vmem:[%s355_s0] sm:$0xff]  ;;  %v20_v1 = vld [vmem:[%s355_s0 + $0x8] sm:$0xff]  ;;  %117 = vmatprep.mubr.bf16.mxu0 %v282_v2  ;;  %170 = vmatprep.mubr.bf16.mxu1 %v282_v2  ;;  %v33_v12 = vld [vmem:[%s357_s2 + $0x10] sm:$0xff] }
   0x2   :  { %v23_v3 = vcombine.high %v19_v0, %v19_v0  ;;  %v24_v4 = vcombine.high %v20_v1, %v20_v1  ;;  %v27_v5 = vpack.c.bf16 %v19_v0, %v19_v0  ;;  %v29_v6 = vpack.c.bf16 %v20_v1, %v20_v1  ;;  %276 = vset.pattern.permute.xlu0 %v282_v2  ;;  %v31_v7 = vld [vmem:[%s357_s2] sm:$0xff]  ;;  %v32_v13 = vld [vmem:[%s357_s2 + $0x8] sm:$0xff]  ;;  %v34_v15 = vld [vmem:[%s357_s2 + $0x18] sm:$0xff] }
   0x3   :  { %277 = vset.pattern.permute.xlu1 %v282_v2  ;;  %37 = vperm.xlu0 %276, %v31_v7   ;;  %v280_v14 = vld [vmem:[%s356_s1] sm:$0xff]   ;;  %v281_v16 = vld [vmem:[%s356_s1 + $0x8] sm:$0xff]  }
   0x4   :  { %v28_v8 = vpack.c.bf16 %v23_v3, %v23_v3  ;;  %v30_v9 = vpack.c.bf16 %v24_v4, %v24_v4  ;;  %v74_v10 = vsel %vm72_vm0, %v27_v5, 0  ;;  %v80_v11 = vsel %vm72_vm0, %v29_v6, 0  ;;  %47 = vperm.xlu1 %277, %v33_v12  }
   0x6   :  { %253 = vmatprep.subr.msk.bf16.mxu0 %vm72_vm0, %v28_v8  ;;  %256 = vmatprep.subr.msk.bf16.mxu1 %vm72_vm0, %v30_v9 }
   0x7   :  { %86 = vmatpush1.bf16.msra.mxu0 %v74_v10  ;;  %139 = vmatpush1.bf16.msra.mxu1 %v80_v11 }
   0x8   :  { %42 = vperm.xlu0 %276, %v32_v13   ;;  %52 = vperm.xlu1 %277, %v34_v15  }
   0xa   :  { %254 = vmatmul.mubr.msk.bf16.vlgmr.msra.gmra.mrb[0].mxu0 %vm65_vm1, %v280_v14  ;;  %257 = vmatmul.mubr.msk.bf16.vlgmr.msra.gmra.mrb[0].mxu1 %vm65_vm1, %v280_v14 }
   0xb   :  { %127 = vmatprep.mubr.bf16.mxu0 %v282_v2  ;;  %180 = vmatprep.mubr.bf16.mxu1 %v282_v2 }
  0x12   :  { %255 = vmatmul.mubr.msk.bf16.gmra.mrb[4].mxu0 %vm65_vm1, %v281_v16  ;;  %258 = vmatmul.mubr.msk.bf16.gmra.mrb[4].mxu1 %vm65_vm1, %v281_v16 }
  0x82   :  { %v38_v17 = vpop.permute.xlu0 %37 }
  0x83   :  { %v48_v19 = vpop.permute.xlu1 %47 }
  0x87   :  { %v43_v18 = vpop.permute.xlu0 %42  ;;  %v53_v40 = vpop.permute.xlu1 %52 }
  0xdd   :  { %v119_v20 = vpop.f32.mrb[0].mxu0  ;;  %v172_v21 = vpop.f32.mrb[0].mxu1 }
  0xde   :  { %v120_v22 = vadd.f32 %v119_v20, %v38_v17  ;;  %v173_v23 = vadd.f32 %v172_v21, %v38_v17  ;;  %v121_v24 = vpop.f32.mrb[1].mxu0  ;;  %v174_v25 = vpop.f32.mrb[1].mxu1 }
  0xdf   :  { %v122_v26 = vadd.f32 %v121_v24, %v38_v17  ;;  %v175_v27 = vadd.f32 %v174_v25, %v38_v17  ;;  %v123_v28 = vpop.f32.mrb[2].mxu0  ;;  %v176_v29 = vpop.f32.mrb[2].mxu1 }
  0xe0   :  { %v124_v30 = vadd.f32 %v123_v28, %v43_v18  ;;  %v177_v31 = vadd.f32 %v176_v29, %v43_v18  ;;  %v125_v32 = vpop.f32.mrb[3].mxu0  ;;  %v178_v33 = vpop.f32.mrb[3].mxu1 }
  0xe1   :  { %v267_v34 = vpack.c.bf16 %v122_v26, %v120_v22  ;;  %v268_v35 = vpack.c.bf16 %v175_v27, %v173_v23  ;;  %v126_v36 = vadd.f32 %v125_v32, %v43_v18  ;;  %v179_v37 = vadd.f32 %v178_v33, %v43_v18 }
  0xe3   :  { %239 = vst [vmem:[%s358_s3] sm:$0xff] %v267_v34  ;;  %240 = vst [vmem:[%s358_s3 + $0x8] sm:$0xff] %v268_v35  ;;  %v269_v38 = vpack.c.bf16 %v126_v36, %v124_v30  ;;  %v270_v39 = vpack.c.bf16 %v179_v37, %v177_v31 }
  0xe5   :  { %241 = vst [vmem:[%s358_s3 + $0x10] sm:$0xff] %v269_v38  ;;  %242 = vst [vmem:[%s358_s3 + $0x18] sm:$0xff] %v270_v39  ;;  %v129_v41 = vpop.f32.mrb[4].mxu0  ;;  %v182_v42 = vpop.f32.mrb[4].mxu1 }
  0xe6   :  { %v130_v43 = vadd.f32 %v129_v41, %v48_v19  ;;  %v183_v44 = vadd.f32 %v182_v42, %v48_v19  ;;  %v131_v45 = vpop.f32.mrb[5].mxu0  ;;  %v184_v46 = vpop.f32.mrb[5].mxu1 }
  0xe7   :  { %v132_v47 = vadd.f32 %v131_v45, %v48_v19  ;;  %v185_v48 = vadd.f32 %v184_v46, %v48_v19  ;;  %v133_v49 = vpop.f32.mrb[6].mxu0  ;;  %v186_v50 = vpop.f32.mrb[6].mxu1 }
  0xe8   :  { %v134_v51 = vadd.f32 %v133_v49, %v53_v40  ;;  %v187_v52 = vadd.f32 %v186_v50, %v53_v40  ;;  %v135_v53 = vpop.f32.mrb[7].mxu0  ;;  %v188_v54 = vpop.f32.mrb[7].mxu1 }
  0xe9   :  { %v271_v55 = vpack.c.bf16 %v132_v47, %v130_v43  ;;  %v272_v56 = vpack.c.bf16 %v185_v48, %v183_v44  ;;  %v136_v57 = vadd.f32 %v135_v53, %v53_v40  ;;  %v189_v58 = vadd.f32 %v188_v54, %v53_v40 }
  0xeb   :  { %243 = vst [vmem:[%s358_s3 + $0x20] sm:$0xff] %v271_v55  ;;  %244 = vst [vmem:[%s358_s3 + $0x28] sm:$0xff] %v272_v56  ;;  %v273_v59 = vpack.c.bf16 %v136_v57, %v134_v51  ;;  %v274_v60 = vpack.c.bf16 %v189_v58, %v187_v52 }
  0xed   :  { %245 = vst [vmem:[%s358_s3 + $0x30] sm:$0xff] %v273_v59  ;;  %246 = vst [vmem:[%s358_s3 + $0x38] sm:$0xff] %v274_v60 }

// kernel: ms_cms_lstm_forward.9
= control target key start
LH: loop header
LB: loop body
LE: loop exit
PB: predicated region body
PF: predicated region fallthrough
CT: control target
= control target key end

     0   :  { %13 = vsyncpa [#allocation9], 0  ;;  %s4163_s0 = inlined_call_operand.vmem [shape: bf16[32,512], index: 0, kind: input, shape index: {}]   ;;  %s4164_s1 = inlined_call_operand.vmem [shape: bf16[32,512], index: 1, kind: input, shape index: {}]   ;;  %s4165_s2 = inlined_call_operand.vmem [shape: f32[32,512], index: 2, kind: input, shape index: {}]   ;;  %s4166_s3 = inlined_call_operand.vmem [shape: bf16[128,576], index: 3, kind: input, shape index: {}]   ;;  %s4167_s4 = inlined_call_operand.vmem [shape: f32[128,1], index: 4, kind: input, shape index: {}]   ;;  %s4168_s5 = inlined_call_operand.vmem [shape: bf16[9,256], index: 5, kind: input, shape index: {}]   ;;  %s4169_s6 = inlined_call_operand.vmem [shape: bf16[32,512], index: 6, kind: output, shape index: {0}]   ;;  %s4170_s7 = inlined_call_operand.hbm [shape: f32[32,512], index: 7, kind: output, shape index: {1}]  }
   0x1   :  { %15 = vsyncpa [#allocation9 + $0x1], 0  ;;  %s3212_s24 = smov 0   ;;  %s3214_s25 = smov 0  }
   0x2   :  { %s3216_s26 = smov 0   ;;  %s3218_s27 = smov 0  }
   0x3 LB: > { %s3233_s28 = sadd.s32 4294967295, %s3158_s27   ;;  %s2634_s29 = sadd.s32 4294967294, %s3158_s27   ;;  %s3158_s27 = sphi %s3218_s27, %s4177_s27   ;;  %s3154_s26 = sphi %s3216_s26, %s4176_s26   ;;  %s3150_s25 = sphi %s3214_s25, %s4175_s25   ;;  %s3146_s24 = sphi %s3212_s24, %s4174_s24  }
   0x4   : > { %s3237_s30 = sadd.s32 1, %s3158_s27   ;;  %s28_s8 = sadd.s32 1, %s3154_s26 }
   0x5   : > { %s25_s9 = ssub.s32 %s3158_s27, %s3237_s30  ;;  %p35_p0 = scmp.ne.s32.totalorder %s3154_s26, %s3150_s25 }
   0x6   : > { %p26_p1 = scmp.eq.s32.totalorder %s25_s9, 0  ;;  %p36_p2 = scmp.eq.s32.totalorder %s3158_s27, 0 }
   0x7   : > { %p180_p3 = scmp.eq.s32.totalorder %s3233_s28, 1  ;;  %p211_p4 = scmp.ne.s32.totalorder %s3150_s25, %s3146_s24 }
   0x8   : > { %s3249_s10 = scalar_select %p26_p1, %s3154_s26, %s28_s8  }
   0x9   : > { %p3251_p5 = por %p36_p2, %p35_p0  ;;  %p3255_p6 = por %p180_p3, %p35_p0 }
   0xa   : > { %p212_p7 = scmp.eq.s32.totalorder %s2634_s29, 1  ;;  %p2636_p9 = scmp.ge.s32.totalorder %s3158_s27, 2 }
   0xc   : > { %p3259_p8 = por %p212_p7, %p211_p4  ;;  %237 = sbr.rel (%p2636_p9) target bundleno = 41 (0x29), region = 28 }
  0x13   : > { %240 = sbr.rel (!%p3251_p5) target bundleno = 26 (0x1a), region = 32  ;;  %s242_s14 = sand.u32 (%p3251_p5), 1, %s3154_s26  }
  0x14   : > { %s2736_s15 = sshll.u32 (%p3251_p5), %s3158_s27, 3  ;;  %s2637_s16 = sshll.u32 (%p3251_p5), %s242_s14, 5 }
  0x15   : > { %s247_s19 = scalar_lea.vmem (%p3251_p5), %s4163_s0, %s2736_s15  ;;  %s244_s20 = scalar_lea.vmem (%p3251_p5), [#allocation4], %s2637_s16 }
  0x16   : > { %v281_v0 = vld [vmem:[%s247_s19] sm:$0xff] (%p3251_p5)  ;;  %v283_v1 = vld [vmem:[%s247_s19 + $0x10] sm:$0xff] (%p3251_p5) }
  0x17   : > { %v285_v2 = vld [vmem:[%s247_s19 + $0x20] sm:$0xff] (%p3251_p5)  ;;  %282 = vst [vmem:[%s244_s20] sm:$0xff] (%p3251_p5), %v281_v0  ;;  %284 = vst [vmem:[%s244_s20 + $0x8] sm:$0xff] (%p3251_p5), %v283_v1  ;;  %v287_v3 = vld [vmem:[%s247_s19 + $0x30] sm:$0xff] (%p3251_p5) }
  0x18   : > { %286 = vst [vmem:[%s244_s20 + $0x10] sm:$0xff] (%p3251_p5), %v285_v2  ;;  %288 = vst [vmem:[%s244_s20 + $0x18] sm:$0xff] (%p3251_p5), %v287_v3 }
  0x1a PF: > { %294 = sbr.rel (!%p3251_p5) target bundleno = 33 (0x21), region = 70  ;;  %s296_s21 = sand.u32 (%p3251_p5), 1, %s3154_s26  }
  0x1b   : > { %s2737_s22 = sshll.u32 (%p3251_p5), %s3158_s27, 3  ;;  %s2640_s23 = sshll.u32 (%p3251_p5), %s296_s21, 5 }
  0x1c   : > { %s301_s9 = scalar_lea.vmem (%p3251_p5), %s4164_s1, %s2737_s22  ;;  %s298_s14 = scalar_lea.vmem (%p3251_p5), [#allocation5], %s2640_s23 }
  0x1d   : > { %v335_v4 = vld [vmem:[%s301_s9] sm:$0xff] (%p3251_p5)  ;;  %v337_v5 = vld [vmem:[%s301_s9 + $0x10] sm:$0xff] (%p3251_p5) }
  0x1e   : > { %v339_v6 = vld [vmem:[%s301_s9 + $0x20] sm:$0xff] (%p3251_p5)  ;;  %336 = vst [vmem:[%s298_s14] sm:$0xff] (%p3251_p5), %v335_v4  ;;  %338 = vst [vmem:[%s298_s14 + $0x8] sm:$0xff] (%p3251_p5), %v337_v5  ;;  %v341_v7 = vld [vmem:[%s301_s9 + $0x30] sm:$0xff] (%p3251_p5) }
  0x1f   : > { %340 = vst [vmem:[%s298_s14 + $0x10] sm:$0xff] (%p3251_p5), %v339_v6  ;;  %342 = vst [vmem:[%s298_s14 + $0x18] sm:$0xff] (%p3251_p5), %v341_v7 }
  0x21 PF: > { %348 = sbr.rel (!%p3251_p5) target bundleno = 41 (0x29), region = 108  ;;  %s350_s15 = sand.u32 (%p3251_p5), 1, %s3154_s26  }
  0x22   : > { %s2738_s16 = sshll.u32 (%p3251_p5), %s3158_s27, 4  ;;  %s2643_s17 = sshll.u32 (%p3251_p5), %s350_s15, 6 }
  0x23   : > { %s355_s20 = scalar_lea.vmem (%p3251_p5), %s4165_s2, %s2738_s16  ;;  %s352_s21 = scalar_lea.vmem (%p3251_p5), [#allocation6], %s2643_s17 }
  0x24   : > { %v368_v8 = vld [vmem:[%s355_s20] sm:$0xff] (%p3251_p5)  ;;  %v370_v9 = vld [vmem:[%s355_s20 + $0x8] sm:$0xff] (%p3251_p5) }
  0x25   : > { %v372_v10 = vld [vmem:[%s355_s20 + $0x20] sm:$0xff] (%p3251_p5)  ;;  %369 = vst [vmem:[%s352_s21] sm:$0xff] (%p3251_p5), %v368_v8  ;;  %371 = vst [vmem:[%s352_s21 + $0x8] sm:$0xff] (%p3251_p5), %v370_v9  ;;  %v374_v11 = vld [vmem:[%s355_s20 + $0x28] sm:$0xff] (%p3251_p5) }
  0x26   : > { %373 = vst [vmem:[%s352_s21 + $0x10] sm:$0xff] (%p3251_p5), %v372_v10  ;;  %v376_v12 = vld [vmem:[%s355_s20 + $0x40] sm:$0xff] (%p3251_p5)  ;;  %v378_v13 = vld [vmem:[%s355_s20 + $0x48] sm:$0xff] (%p3251_p5)  ;;  %375 = vst [vmem:[%s352_s21 + $0x18] sm:$0xff] (%p3251_p5), %v374_v11 }
  0x27   : > { %377 = vst [vmem:[%s352_s21 + $0x20] sm:$0xff] (%p3251_p5), %v376_v12  ;;  %379 = vst [vmem:[%s352_s21 + $0x28] sm:$0xff] (%p3251_p5), %v378_v13  ;;  %v380_v14 = vld [vmem:[%s355_s20 + $0x60] sm:$0xff] (%p3251_p5)  ;;  %v382_v15 = vld [vmem:[%s355_s20 + $0x68] sm:$0xff] (%p3251_p5) }
  0x28   : > { %381 = vst [vmem:[%s352_s21 + $0x30] sm:$0xff] %v380_v14  ;;  %383 = vst [vmem:[%s352_s21 + $0x38] sm:$0xff] %v382_v15 }
  0x29 PF: > { %p2646_p10 = scmp.ge.s32.totalorder %s3158_s27, 1  ;;  %p388_p11 = scmp.lt.s32.totalorder %s3158_s27, 3 }
  0x2b   : > { %p389_p12 = pnand %p2646_p10, %p388_p11 }
  0x2c   : > { %v534_v16 = vld [vmem:[%s4168_s5] sm:$0x11] (!%p389_p12)  ;;  %v543_v17 = vlaneseq (!%p389_p12)  ;;  %v1018_v23 = vld [vmem:[%s4168_s5] sm:$0x44] (!%p389_p12)  ;;  %v768_v33 = vld [vmem:[%s4168_s5] sm:$0x22] (!%p389_p12) }
  0x2d   : > { %392 = sbr.rel (%p389_p12) target bundleno = 818 (0x332), region = 131  ;;  %v650_v18 = vld [vmem:[%s4168_s5] sm:$0x11] (!%p389_p12)  ;;  %v2660_v19 = vcombine.low (!%p389_p12), %v534_v16, %v534_v16  ;;  %v2661_v20 = vcombine.high (!%p389_p12), %v534_v16, %v534_v16  ;;  %v2669_v25 = vcombine.high (!%p389_p12), %v1018_v23, %v1018_v23  ;;  %v2668_v26 = vcombine.low (!%p389_p12), %v1018_v23, %v1018_v23  ;;  %s3304_s16 = sand.u32 (!%p389_p12), 1, %s3150_s25   ;;  %v884_v47 = vld [vmem:[%s4168_s5] sm:$0x22] (!%p389_p12) }
  0x2e   : > { %v2662_v21 = vcombine.low (!%p389_p12), %v650_v18, %v650_v18  ;;  %v2663_v22 = vcombine.high (!%p389_p12), %v650_v18, %v650_v18  ;;  %v544_v24 = vshrl.u32 (!%p389_p12), %v543_v17, 7  ;;  %s3307_s17 = sshll.u32 (!%p389_p12), %s3304_s16, 5  ;;  %v2665_v39 = vcombine.high (!%p389_p12), %v768_v33, %v768_v33  ;;  %s3160_s19 = smov (!%p389_p12), 111   ;;  %v1134_v48 = vld [vmem:[%s4168_s5] sm:$0x88] (!%p389_p12) }
  0x2f   : > { %v541_v27 = vpack.i.b16 (!%p389_p12), %v2660_v19, %v2660_v19  ;;  %v548_v31 = vpack.i.b16 (!%p389_p12), %v2661_v20, %v2661_v20  ;;  %v1025_v32 = vshrl.u32 (!%p389_p12), %v2668_v26, 16  ;;  %v1033_v36 = vshrl.u32 (!%p389_p12), %v2669_v25, 16  ;;  %s3312_s18 = scalar_lea.vmem (!%p389_p12), [#allocation4], %s3307_s17  ;;  %s3161_s20 = smov (!%p389_p12), 112   ;;  %v1248_v55 = vld [vmem:[%s4168_s5] sm:$0x88] (!%p389_p12) }
  0x30   : > { %v657_v28 = vshrl.u32 (!%p389_p12), %v2662_v21, 16  ;;  %v665_v29 = vshrl.u32 (!%p389_p12), %v2663_v22, 16  ;;  %v3298_v30 = vsub.s32 (!%p389_p12), 0, %v544_v24  ;;  %v1030_v41 = vsub.s32 (!%p389_p12), 2, %v544_v24  ;;  %v3317_v44 = vld [vmem:[%s3312_s18 + $0x4] ss:$8 sps:$4 sm:$0xff] (!%p389_p12)  }
  0x31   : > { %v1026_v42 = vpack.i.b16 (!%p389_p12), %v1025_v32, %v1025_v32  ;;  %v2664_v43 = vcombine.low (!%p389_p12), %v768_v33, %v768_v33  ;;  %v1034_v46 = vpack.i.b16 (!%p389_p12), %v1033_v36, %v1033_v36  ;;  %s3325_s22 = scalar_lea.vmem (!%p389_p12), [#allocation5], %s3307_s17  ;;  %2020 = vmatprep.subr.bf16.mxu0 (!%p389_p12), %v3317_v44  ;;  %v779_v49 = vsub.s32 (!%p389_p12), 1, %v544_v24  ;;  %v3336_v56 = vld [vmem:[%s3312_s18 + $0x14] ss:$8 sps:$4 sm:$0xff] (!%p389_p12)   ;;  %v3339_v57 = vld [vmem:[%s3312_s18] ss:$8 sps:$4 sm:$0xff] (!%p389_p12)  }
  0x32   : > { %v658_v34 = vpack.i.b16 (!%p389_p12), %v657_v28, %v657_v28  ;;  %v666_v35 = vpack.i.b16 (!%p389_p12), %v665_v29, %v665_v29  ;;  %v546_v37 = vrot.slane (!%p389_p12), %v541_v27, %v3298_v30  ;;  %v553_v40 = vrot.slane (!%p389_p12), %v548_v31, %v3298_v30  ;;  %v3343_v61 = vld [vmem:[%s3312_s18 + $0x10] ss:$8 sps:$4 sm:$0xff] (!%p389_p12)   ;;  %2021 = vmatpush1.bf16.msra.mxu0 (!%p389_p12), %v3339_v57  ;;  %v3347_v63 = vld [vmem:[%s3325_s22 + $0x4] ss:$8 sps:$4 sm:$0xff] (!%p389_p12)   ;;  %s3162_s14 = smov (!%p389_p12), 1   ;;  %s3163_s11 = smov (!%p389_p12), 113  }
  0x33   : > { %v782_v50 = vpack.i.b16 (!%p389_p12), %v2665_v39, %v2665_v39  ;;  %v1031_v51 = vrot.slane (!%p389_p12), %v1026_v42, %v1030_v41  ;;  %v775_v52 = vpack.i.b16 (!%p389_p12), %v2664_v43, %v2664_v43  ;;  %v2670_v53 = vcombine.low (!%p389_p12), %v1134_v48, %v1134_v48  ;;  %2022 = vmatprep.subr.bf16.mxu0 (!%p389_p12), %v3336_v56  ;;  %v3353_v8 = vld [vmem:[%s3325_s22] ss:$8 sps:$4 sm:$0xff] (!%p389_p12)   ;;  %v3360_v10 = vld [vmem:[%s3325_s22 + $0x14] ss:$8 sps:$4 sm:$0xff] (!%p389_p12)   ;;  %v3366_v17 = vld [vmem:[%s3325_s22 + $0x10] ss:$8 sps:$4 sm:$0xff] (!%p389_p12)  }
  0x34   : > { %v663_v38 = vrot.slane %v658_v34, %v3298_v30  ;;  %556 = vrot.lane.b32.xlu0 %v546_v37, %s3160_s19  ;;  %v671_v45 = vrot.slane %v666_v35, %v3298_v30  ;;  %v2666_v54 = vcombine.low %v884_v47, %v884_v47  ;;  %v1039_v58 = vrot.slane %v1034_v46, %v1030_v41  ;;  %v1364_v9 = vld [vmem:[%s4168_s5 + $0x8] sm:$0x11]  ;;  %s3164_s23 = smov 15   ;;  %s3165_s29 = smov 127  }
  0x35   : > { %v2671_v59 = vcombine.high %v1134_v48, %v1134_v48  ;;  %v2667_v60 = vcombine.high %v884_v47, %v884_v47  ;;  %v787_v62 = vrot.slane %v782_v50, %v779_v49  ;;  %v780_v0 = vrot.slane %v775_v52, %v779_v49  ;;  %s3166_s8 = smov 16   ;;  %s3167_s9 = smov 17  }
  0x36   : > { %674 = vrot.lane.b32.xlu1 %v663_v38, %s3161_s20  ;;  %v1141_v1 = vpack.i.b16 %v2670_v53, %v2670_v53  ;;  %v891_v2 = vshrl.u32 %v2666_v54, 16  ;;  %v2672_v3 = vcombine.low %v1248_v55, %v1248_v55  ;;  %v1145_v4 = vsub.s32 3, %v544_v24  ;;  %2023 = vmatpush1.bf16.msra.mxu0 %v3343_v61  ;;  %s2649_s21 = sshll.u32 %s3304_s16, 6 }
  0x37   : > { %v1148_v5 = vpack.i.b16 %v2671_v59, %v2671_v59  ;;  %v899_v6 = vshrl.u32 %v2667_v60, 16  ;;  %v2673_v7 = vcombine.high %v1248_v55, %v1248_v55  ;;  %2024 = vmatprep.subr.bf16.mxu0 %v3347_v63  ;;  %v2675_v20 = vcombine.high %v1364_v9, %v1364_v9 }
  0x38   : > { %558 = vrot.lane.b32.xlu0 %v553_v40, %s3160_s19  ;;  %v1146_v11 = vrot.slane %v1141_v1, %v1145_v4  ;;  %v892_v12 = vpack.i.b16 %v891_v2, %v891_v2  ;;  %v1255_v13 = vshrl.u32 %v2672_v3, 16  ;;  %v2674_v23 = vcombine.low %v1364_v9, %v1364_v9 }
  0x39   : > { %v1153_v14 = vrot.slane %v1148_v5, %v1145_v4  ;;  %v900_v15 = vpack.i.b16 %v899_v6, %v899_v6  ;;  %v1263_v16 = vshrl.u32 %v2673_v7, 16  ;;  %v1378_v25 = vpack.i.b16 %v2675_v20, %v2675_v20 }
  0x3a   : > { %676 = vrot.lane.b32.xlu1 %v671_v45, %s3161_s20  ;;  %2025 = vmatpush1.bf16.msra.mxu0 %v3353_v8  ;;  %v897_v18 = vrot.slane %v892_v12, %v779_v49  ;;  %v1256_v19 = vpack.i.b16 %v1255_v13, %v1255_v13  ;;  %v1371_v27 = vpack.i.b16 %v2674_v23, %v2674_v23  ;;  %vm560_vm0 = vcmask 908288  }
  0x3b   : > { %2026 = vmatprep.subr.bf16.mxu0 %v3360_v10  ;;  %v905_v21 = vrot.slane %v900_v15, %v779_v49  ;;  %v1264_v22 = vpack.i.b16 %v1263_v16, %v1263_v16  ;;  %v1383_v28 = vrot.slane %v1378_v25, %v3298_v30  ;;  %vm794_vm1 = vcmask 924672  }
  0x3c   : > { %1042 = vrot.lane.b32.xlu0 %v1031_v51, %s3162_s14  ;;  %v1261_v24 = vrot.slane %v1256_v19, %v1145_v4  ;;  %v1376_v29 = vrot.slane %v1371_v27, %v3298_v30  ;;  %vm847_vm2 = vcmask 121856   ;;  %vm678_vm3 = vcmask 916480  }
  0x3d   : > { %v1269_v26 = vrot.slane %v1264_v22, %v1145_v4  ;;  %vm965_vm4 = vcmask 7168   ;;  %vm912_vm5 = vcmask 1039360   ;;  %vm731_vm6 = vcmask 130048  }
  0x3e   : > { %1044 = vrot.lane.b32.xlu1 %v1039_v58, %s3162_s14  ;;  %2027 = vmatpush1.bf16.msra.mxu0 %v3366_v17  ;;  %vm613_vm7 = vcmask 138240   ;;  %vm1882_vm8 = vcmask 523264  }
  0x40   : > { %790 = vrot.lane.b32.xlu0 %v780_v0, %s3163_s11 }
  0x42   : > { %792 = vrot.lane.b32.xlu1 %v787_v62, %s3163_s11 }
  0x44   : > { %1156 = vrot.lane.b32.xlu0 %v1146_v11, %s3164_s23 }
  0x46   : > { %1158 = vrot.lane.b32.xlu1 %v1153_v14, %s3164_s23 }
  0x48   : > { %908 = vrot.lane.b32.xlu0 %v897_v18, %s3165_s29 }
  0x4a   : > { %910 = vrot.lane.b32.xlu1 %v905_v21, %s3165_s29 }
  0x4c   : > { %1272 = vrot.lane.b32.xlu0 %v1261_v24, %s3166_s8 }
  0x4e   : > { %1274 = vrot.lane.b32.xlu1 %v1269_v26, %s3166_s8 }
  0x50   : > { %1388 = vrot.lane.b32.xlu0 %v1383_v28, %s3167_s9 }
  0x52   : > { %1386 = vrot.lane.b32.xlu1 %v1376_v29, %s3167_s9 }
  0xa6   : > { %v557_v31 = vpop.permute.xlu0 %556 }
  0xa7   : > { %v565_v32 = vmul.bf16 0, %v557_v31 }
  0xa8   : > { %v3381_v33 = vpop.permute.xlu1 %674 }
  0xa9   : > { %589 = vrot.lane.b32.xlu0 %v565_v32, %s3167_s9  ;;  %v683_v58 = vmul.bf16 0, %v3381_v33 }
  0xaa   : > { %v559_v34 = vpop.permute.xlu0 %558 }
  0xab   : > { %v570_v36 = vmul.bf16 %v3336_v56, %v559_v34  ;;  %v567_v37 = vmul.bf16 %v3317_v44, %v559_v34  ;;  %v576_v40 = vmul.bf16 %v3360_v10, %v559_v34  ;;  %v573_v41 = vmul.bf16 %v3347_v63, %v559_v34 }
  0xac   : > { %v3384_v35 = vpop.permute.xlu1 %676  ;;  %v561_v51 = vsel %vm560_vm0, %v557_v31, %v559_v34 }
  0xad   : > { %599 = vrot.lane.b32.xlu0 %v570_v36, %s3167_s9  ;;  %593 = vrot.lane.b32.xlu1 %v567_v37, %s3167_s9  ;;  %v566_v53 = vmul.bf16 %v3339_v57, %v561_v51  ;;  %v569_v54 = vmul.bf16 %v3343_v61, %v561_v51  ;;  %v572_v55 = vmul.bf16 %v3353_v8, %v561_v51 }
  0xae   : > { %v3390_v30 = vpop.permute.xlu0 %1042  ;;  %v575_v59 = vmul.bf16 %v3366_v17, %v561_v51  ;;  %v685_v62 = vmul.bf16 %v3317_v44, %v3384_v35  ;;  %v688_v1 = vmul.bf16 %v3336_v56, %v3384_v35  ;;  %v691_v3 = vmul.bf16 %v3347_v63, %v3384_v35 }
  0xaf   : > { %v1050_v0 = vmul.bf16 %v3339_v57, %v3390_v30  ;;  %v1053_v2 = vmul.bf16 %v3343_v61, %v3390_v30  ;;  %v1056_v4 = vmul.bf16 %v3353_v8, %v3390_v30  ;;  %v694_v5 = vmul.bf16 %v3360_v10, %v3384_v35 }
  0xb0   : > { %v3392_v38 = vpop.permute.xlu1 %1044  ;;  %v1059_v7 = vmul.bf16 %v3366_v17, %v3390_v30  ;;  %v679_v14 = vsel %vm678_vm3, %v3381_v33, %v3384_v35 }
  0xb1   : > { %601 = vrot.lane.b32.xlu0 %v565_v32, %s3167_s9  ;;  %595 = vrot.lane.b32.xlu1 %v565_v32, %s3167_s9  ;;  %v1052_v60 = vmul.bf16 0, %v3392_v38  ;;  %v684_v16 = vmul.bf16 %v3339_v57, %v679_v14  ;;  %v1046_v18 = vsel %vm965_vm4, %v3390_v30, %v3392_v38  ;;  %v687_v20 = vmul.bf16 %v3343_v61, %v679_v14 }
  0xb2   : > { %v791_v39 = vpop.permute.xlu0 %790  ;;  %v1051_v19 = vmul.bf16 %v3317_v44, %v1046_v18  ;;  %v1054_v21 = vmul.bf16 %v3336_v56, %v1046_v18  ;;  %v690_v22 = vmul.bf16 %v3353_v8, %v679_v14  ;;  %v1057_v23 = vmul.bf16 %v3347_v63, %v1046_v18 }
  0xb3   : > { %v3402_v43 = vmul.bf16 0, %v791_v39  ;;  %v693_v24 = vmul.bf16 %v3366_v17, %v679_v14  ;;  %v1060_v25 = vmul.bf16 %v3360_v10, %v1046_v18 }
  0xb4   : > { %v3398_v42 = vpop.permute.xlu1 %792 }
  0xb5   : > { %611 = vrot.lane.b32.xlu0 %v576_v40, %s3167_s9  ;;  %605 = vrot.lane.b32.xlu1 %v573_v41, %s3167_s9  ;;  %v801_v47 = vmul.bf16 %v3317_v44, %v3398_v42  ;;  %v804_v50 = vmul.bf16 %v3336_v56, %v3398_v42  ;;  %v795_v6 = vsel %vm794_vm1, %v791_v39, %v3398_v42 }
  0xb6   : > { %v3411_v48 = vpop.permute.xlu0 %1156  ;;  %v800_v9 = vmul.bf16 %v3339_v57, %v795_v6  ;;  %v803_v13 = vmul.bf16 %v3343_v61, %v795_v6  ;;  %v806_v26 = vmul.bf16 %v3353_v8, %v795_v6  ;;  %v807_v28 = vmul.bf16 %v3347_v63, %v3398_v42 }
  0xb7   : > { %v1164_v49 = vmul.bf16 %v3339_v57, %v3411_v48  ;;  %v1167_v52 = vmul.bf16 %v3343_v61, %v3411_v48  ;;  %v1170_v34 = vmul.bf16 %v3353_v8, %v3411_v48  ;;  %v809_v35 = vmul.bf16 %v3366_v17, %v795_v6 }
  0xb8   : > { %v1159_v45 = vpop.permute.xlu1 %1158  ;;  %v810_v37 = vmul.bf16 %v3360_v10, %v3398_v42 }
  0xb9   : > { %823 = vrot.lane.b32.xlu0 %v3402_v43, %s3164_s23  ;;  %607 = vrot.lane.b32.xlu1 %v565_v32, %s3167_s9  ;;  %v3407_v46 = vmul.bf16 0, %v1159_v45  ;;  %v1160_v11 = vsel %vm847_vm2, %v3411_v48, %v1159_v45  ;;  %v1173_v45 = vmul.bf16 %v3366_v17, %v3411_v48 }
  0xba   : > { %v1165_v12 = vmul.bf16 %v3317_v44, %v1160_v11  ;;  %v1168_v15 = vmul.bf16 %v3336_v56, %v1160_v11  ;;  %v909_v27 = vpop.permute.xlu0 %908  ;;  %v1171_v31 = vmul.bf16 %v3347_v63, %v1160_v11  ;;  %v1174_v39 = vmul.bf16 %v3360_v10, %v1160_v11 }
  0xbc   : > { %v3513_v29 = vpop.permute.xlu1 %910 }
  0xbd   : > { %1192 = vrot.lane.b32.xlu0 %v3407_v46, %s3163_s11  ;;  %827 = vrot.lane.b32.xlu1 %v801_v47, %s3164_s23  ;;  %v3538_v40 = vsel %vm912_vm5, %v909_v27, %v3513_v29  ;;  %v3549_v47 = vmul.bf16 0, %v909_v27 }
  0xbe   : > { %v3516_v32 = vpop.permute.xlu0 %1272  ;;  %v927_v27 = vmul.bf16 %v3366_v17, %v3538_v40 }
  0xc0   : > { %v1275_v33 = vpop.permute.xlu1 %1274 }
  0xc1   : > { %829 = vrot.lane.b32.xlu0 %v3402_v43, %s3164_s23  ;;  %1188 = vrot.lane.b32.xlu1 %v1164_v49, %s3163_s11  ;;  %v3557_v51 = vsel %vm731_vm6, %v3516_v32, %v1275_v33  ;;  %v3562_v48 = vmul.bf16 0, %v1275_v33 }
  0xc2   : > { %v3526_v36 = vpop.permute.xlu0 %1388 }
  0xc4   : > { %v3530_v30 = vpop.permute.xlu1 %1386 }
  0xc5   : > { %1198 = vrot.lane.b32.xlu0 %v3407_v46, %s3163_s11  ;;  %833 = vrot.lane.b32.xlu1 %v804_v50, %s3164_s23 }
  0xc9   : > { %1194 = vrot.lane.b32.xlu1 %v1167_v52, %s3163_s11  ;;  %591 = vrot.lane.b32.xlu0 %v566_v53, %s3167_s9 }
  0xcd   : > { %597 = vrot.lane.b32.xlu1 %v569_v54, %s3167_s9  ;;  %603 = vrot.lane.b32.xlu0 %v572_v55, %s3167_s9  ;;  %v1281_v54 = vmul.bf16 %v3317_v44, %v3557_v51 }
  0xd1   : > { %609 = vrot.lane.b32.xlu1 %v575_v59, %s3167_s9  ;;  %707 = vrot.lane.b32.xlu0 %v683_v58, %s3166_s8  ;;  %v1280_v59 = vmul.bf16 %v3339_v57, %v3516_v32 }
  0xd5   : > { %711 = vrot.lane.b32.xlu1 %v685_v62, %s3166_s8  ;;  %1078 = vrot.lane.b32.xlu0 %v1052_v60, %s3165_s29 }
  0xd9   : > { %1074 = vrot.lane.b32.xlu1 %v1050_v0, %s3165_s29  ;;  %713 = vrot.lane.b32.xlu0 %v683_v58, %s3166_s8 }
  0xdd   : > { %717 = vrot.lane.b32.xlu1 %v688_v1, %s3166_s8  ;;  %1084 = vrot.lane.b32.xlu0 %v1052_v60, %s3165_s29  ;;  %v922_v1 = vmul.bf16 %v3336_v56, %v3513_v29 }
  0xe1   : > { %1080 = vrot.lane.b32.xlu1 %v1053_v2, %s3165_s29  ;;  %719 = vrot.lane.b32.xlu0 %v683_v58, %s3166_s8 }
  0xe5   : > { %723 = vrot.lane.b32.xlu1 %v691_v3, %s3166_s8  ;;  %1090 = vrot.lane.b32.xlu0 %v1052_v60, %s3165_s29 }
  0xe9   : > { %1086 = vrot.lane.b32.xlu1 %v1056_v4, %s3165_s29  ;;  %725 = vrot.lane.b32.xlu0 %v683_v58, %s3166_s8  ;;  %v1284_v4 = vmul.bf16 %v3336_v56, %v3557_v51 }
  0xed   : > { %729 = vrot.lane.b32.xlu1 %v694_v5, %s3166_s8  ;;  %1096 = vrot.lane.b32.xlu0 %v1052_v60, %s3165_s29  ;;  %v921_v60 = vmul.bf16 %v3343_v61, %v3538_v40 }
  0xf1   : > { %1092 = vrot.lane.b32.xlu1 %v1059_v7, %s3165_s29  ;;  %825 = vrot.lane.b32.xlu0 %v800_v9, %s3164_s23  ;;  %v1283_v7 = vmul.bf16 %v3343_v61, %v3516_v32  ;;  %v924_v9 = vmul.bf16 %v3353_v8, %v3538_v40 }
  0xf5   : > { %1190 = vrot.lane.b32.xlu1 %v1165_v12, %s3163_s11  ;;  %831 = vrot.lane.b32.xlu0 %v803_v13, %s3164_s23  ;;  %v925_v13 = vmul.bf16 %v3347_v63, %v3513_v29 }
  0xf9   : > { %1196 = vrot.lane.b32.xlu1 %v1168_v15, %s3163_s11  ;;  %709 = vrot.lane.b32.xlu0 %v684_v16, %s3166_s8 }
  0xfd   : > { %1076 = vrot.lane.b32.xlu1 %v1051_v19, %s3165_s29  ;;  %715 = vrot.lane.b32.xlu0 %v687_v20, %s3166_s8  ;;  %v1287_v19 = vmul.bf16 %v3347_v63, %v3557_v51  ;;  %v2955_v20 = vld [vmem:[%s4166_s3 + $0x4] ss:$20 sps:$4 sm:$0xff]  }
  0xfe   : > { %1939 = vmatprep.mubr.bf16.mxu1 %v2955_v20 }
 0x101   : > { %1082 = vrot.lane.b32.xlu1 %v1054_v21, %s3165_s29  ;;  %721 = vrot.lane.b32.xlu0 %v690_v22, %s3166_s8 }
 0x105   : > { %1088 = vrot.lane.b32.xlu1 %v1057_v23, %s3165_s29  ;;  %727 = vrot.lane.b32.xlu0 %v693_v24, %s3166_s8 }
 0x109   : > { %1094 = vrot.lane.b32.xlu1 %v1060_v25, %s3165_s29  ;;  %837 = vrot.lane.b32.xlu0 %v806_v26, %s3164_s23  ;;  %v1286_v26 = vmul.bf16 %v3353_v8, %v3516_v32 }
 0x10d   : > { %839 = vrot.lane.b32.xlu1 %v807_v28, %s3164_s23  ;;  %835 = vrot.lane.b32.xlu0 %v3402_v43, %s3164_s23 }
 0x111   : > { %1202 = vrot.lane.b32.xlu1 %v1171_v31, %s3163_s11  ;;  %1204 = vrot.lane.b32.xlu0 %v3407_v46, %s3163_s11  ;;  %v2958_v31 = vld [vmem:[%s4166_s3 + $0xc] ss:$20 sps:$4 sm:$0xff]  }
 0x112   : > { %2052 = vmatprep.mubr.bf16.mxu0 %v2958_v31 }
 0x115   : > { %1200 = vrot.lane.b32.xlu1 %v1170_v34, %s3163_s11  ;;  %843 = vrot.lane.b32.xlu0 %v809_v35, %s3164_s23 }
 0x119   : > { %845 = vrot.lane.b32.xlu1 %v810_v37, %s3164_s23  ;;  %841 = vrot.lane.b32.xlu0 %v3402_v43, %s3164_s23  ;;  %v918_v43 = vmul.bf16 %v3339_v57, %v3538_v40  ;;  %v928_v37 = vmul.bf16 %v3360_v10, %v3513_v29  ;;  %s4095_s23 = scalar_lea.vmem [#allocation7], %s3307_s17  ;;  %s2439_s17 = scalar_lea.sflag [#allocation9], %s3304_s16 }
 0x11b   : > { %v590_v38 = vpop.permute.xlu0 %589 }
 0x11d   : > { %1208 = vrot.lane.b32.xlu1 %v1174_v39, %s3163_s11  ;;  %1210 = vrot.lane.b32.xlu0 %v3407_v46, %s3163_s11  ;;  %v919_v46 = vmul.bf16 %v3317_v44, %v3513_v29 }
 0x11f   : > { %v600_v41 = vpop.permute.xlu0 %599  ;;  %v594_v42 = vpop.permute.xlu1 %593 }
 0x121   : > { %1206 = vrot.lane.b32.xlu1 %v1173_v45, %s3163_s11  ;;  %943 = vrot.lane.b32.xlu0 %v918_v43, %s3162_s14  ;;  %v1289_v43 = vmul.bf16 %v3366_v17, %v3516_v32  ;;  %s4057_s11 = scalar_lea.vmem [#allocation6], %s2649_s21 }
 0x123   : > { %v3551_v49 = vpop.permute.xlu0 %601  ;;  %v596_v50 = vpop.permute.xlu1 %595 }
 0x125   : > { %945 = vrot.lane.b32.xlu1 %v919_v46, %s3162_s14  ;;  %941 = vrot.lane.b32.xlu0 %v3549_v47, %s3162_s14 }
 0x127   : > { %v612_v52 = vpop.permute.xlu0 %611  ;;  %v606_v53 = vpop.permute.xlu1 %605 }
 0x129   : > { %1306 = vrot.lane.b32.xlu1 %v1281_v54, %s3161_s20  ;;  %1308 = vrot.lane.b32.xlu0 %v3562_v48, %s3161_s20 }
 0x12b   : > { %v3569_v55 = vpop.permute.xlu0 %823  ;;  %v608_v58 = vpop.permute.xlu1 %607 }
 0x12d   : > { %1304 = vrot.lane.b32.xlu1 %v1280_v59, %s3161_s20  ;;  %949 = vrot.lane.b32.xlu0 %v921_v60, %s3162_s14 }
 0x12f   : > { %v3577_v62 = vpop.permute.xlu0 %1192  ;;  %v3579_v0 = vpop.permute.xlu1 %827 }
 0x131   : > { %951 = vrot.lane.b32.xlu1 %v922_v1, %s3162_s14  ;;  %947 = vrot.lane.b32.xlu0 %v3549_v47, %s3162_s14 }
 0x133   : > { %v3586_v2 = vpop.permute.xlu0 %829  ;;  %v3588_v3 = vpop.permute.xlu1 %1188 }
 0x135   : > { %1312 = vrot.lane.b32.xlu1 %v1284_v4, %s3161_s20  ;;  %1314 = vrot.lane.b32.xlu0 %v3562_v48, %s3161_s20  ;;  %v1403_v4 = vmul.bf16 %v3366_v17, %v3530_v30 }
 0x137   : > { %v3595_v5 = vpop.permute.xlu0 %1198  ;;  %v3597_v6 = vpop.permute.xlu1 %833 }
 0x139   : > { %1310 = vrot.lane.b32.xlu1 %v1283_v7, %s3161_s20  ;;  %955 = vrot.lane.b32.xlu0 %v924_v9, %s3162_s14  ;;  %v3168_v7 = vmov 0  }
 0x13a   : > { %2924 = vset.pattern.permute.xlu1 %v3168_v7  ;;  %2923 = vset.pattern.permute.xlu0 %v3168_v7 }
 0x13b   : > { %v3605_v11 = vpop.permute.xlu1 %1194  ;;  %v592_v12 = vpop.permute.xlu0 %591 }
 0x13c   : > { %v615_v14 = vsel %vm613_vm7, %v592_v12, %v594_v42  ;;  %v614_v15 = vsel %vm613_vm7, %v590_v38, %v592_v12  ;;  %v1390_v42 = vsel %vm613_vm7, %v3530_v30, %v3526_v36 }
 0x13d   : > { %957 = vrot.lane.b32.xlu1 %v925_v13, %s3162_s14  ;;  %953 = vrot.lane.b32.xlu0 %v3549_v47, %s3162_s14  ;;  %v1398_v32 = vmul.bf16 %v3336_v56, %v1390_v42  ;;  %v1401_v54 = vmul.bf16 %v3347_v63, %v1390_v42  ;;  %v1400_v56 = vmul.bf16 %v3353_v8, %v3530_v30 }
 0x13e   : > { %1907 = vmatprep.subr.bf16.mxu1 %v615_v14  ;;  %v1404_v1 = vmul.bf16 %v3360_v10, %v1390_v42 }
 0x13f   : > { %1908 = vmatpush1.bf16.msra.mxu1 %v614_v15  ;;  %v598_v16 = vpop.permute.xlu1 %597  ;;  %v604_v18 = vpop.permute.xlu0 %603 }
 0x140   : > { %v617_v21 = vsel %vm613_vm7, %v598_v16, %v600_v41  ;;  %v616_v22 = vsel %vm613_vm7, %v596_v50, %v598_v16  ;;  %v619_v24 = vsel %vm613_vm7, %v604_v18, %v606_v53  ;;  %v618_v28 = vsel %vm613_vm7, %v3551_v49, %v604_v18 }
 0x141   : > { %1318 = vrot.lane.b32.xlu1 %v1287_v19, %s3161_s20  ;;  %1320 = vrot.lane.b32.xlu0 %v3562_v48, %s3161_s20  ;;  %v1290_v41 = vmul.bf16 %v3360_v10, %v3557_v51  ;;  %v1396_v49 = vmul.bf16 0, %v3526_v36  ;;  %v1394_v51 = vmul.bf16 %v3339_v57, %v3530_v30  ;;  %v1397_v36 = vmul.bf16 %v3343_v61, %v3530_v30 }
 0x142   : > { %1909 = vmatprep.subr.bf16.mxu1 %v617_v21 }
 0x143   : > { %1910 = vmatpush1.bf16.msra.mxu1 %v616_v22  ;;  %v610_v23 = vpop.permute.xlu1 %609  ;;  %v3625_v25 = vpop.permute.xlu0 %707 }
 0x144   : > { %1911 = vmatprep.subr.bf16.mxu1 %v619_v24  ;;  %v621_v34 = vsel %vm613_vm7, %v610_v23, %v612_v52  ;;  %v620_v38 = vsel %vm613_vm7, %v608_v58, %v610_v23 }
 0x145   : > { %1316 = vrot.lane.b32.xlu1 %v1286_v26, %s3161_s20  ;;  %961 = vrot.lane.b32.xlu0 %v927_v27, %s3162_s14 }
 0x147   : > { %1912 = vmatpush1.bf16.msra.mxu1 %v618_v28  ;;  %v712_v33 = vpop.permute.xlu1 %711  ;;  %v3639_v35 = vpop.permute.xlu0 %1078 }
 0x148   : > { %1913 = vmatprep.subr.bf16.mxu1 %v621_v34 }
 0x149   : > { %963 = vrot.lane.b32.xlu1 %v928_v37, %s3162_s14  ;;  %959 = vrot.lane.b32.xlu0 %v3549_v47, %s3162_s14  ;;  %v1395_v47 = vmul.bf16 %v3317_v44, %v1390_v42 }
 0x14b   : > { %1914 = vmatpush1.bf16.msra.mxu1 %v620_v38  ;;  %v1075_v39 = vpop.permute.xlu1 %1074  ;;  %v714_v40 = vpop.permute.xlu0 %713 }
 0x14d   : > { %1324 = vrot.lane.b32.xlu1 %v1290_v41, %s3161_s20  ;;  %1326 = vrot.lane.b32.xlu0 %v3562_v48, %s3161_s20 }
 0x14f   : > { %v718_v29 = vpop.permute.xlu1 %717  ;;  %v1085_v45 = vpop.permute.xlu0 %1084 }
 0x151   : > { %1322 = vrot.lane.b32.xlu1 %v1289_v43, %s3161_s20  ;;  %1420 = vrot.lane.b32.xlu0 %v1395_v47, %s3160_s19 }
 0x153   : > { %v1081_v50 = vpop.permute.xlu1 %1080  ;;  %v720_v46 = vpop.permute.xlu0 %719 }
 0x155   : > { %1422 = vrot.lane.b32.xlu1 %v1396_v49, %s3160_s19  ;;  %1418 = vrot.lane.b32.xlu0 %v1394_v51, %s3160_s19 }
 0x157   : > { %v724_v48 = vpop.permute.xlu1 %723  ;;  %v1091_v52 = vpop.permute.xlu0 %1090 }
 0x159   : > { %1426 = vrot.lane.b32.xlu1 %v1398_v32, %s3160_s19  ;;  %1428 = vrot.lane.b32.xlu0 %v1396_v49, %s3160_s19 }
 0x15b   : > { %v1087_v44 = vpop.permute.xlu1 %1086  ;;  %v726_v53 = vpop.permute.xlu0 %725 }
 0x15d   : > { %1424 = vrot.lane.b32.xlu1 %v1397_v36, %s3160_s19  ;;  %1432 = vrot.lane.b32.xlu0 %v1401_v54, %s3160_s19 }
 0x15f   : > { %v730_v57 = vpop.permute.xlu1 %729  ;;  %v1097_v58 = vpop.permute.xlu0 %1096 }
 0x161   : > { %1434 = vrot.lane.b32.xlu1 %v1396_v49, %s3160_s19  ;;  %1430 = vrot.lane.b32.xlu0 %v1400_v56, %s3160_s19 }
 0x163   : > { %v1093_v59 = vpop.permute.xlu1 %1092  ;;  %v826_v60 = vpop.permute.xlu0 %825 }
 0x164   : > { %v849_v34 = vsel %vm847_vm2, %v826_v60, %v3579_v0 }
 0x165   : > { %1438 = vrot.lane.b32.xlu1 %v1404_v1, %s3160_s19  ;;  %1440 = vrot.lane.b32.xlu0 %v1396_v49, %s3160_s19  ;;  %v1587_v1 = vld [vmem:[%s4167_s4 + $0x8] sm:$0xff] }
 0x167   : > { %v1191_v61 = vpop.permute.xlu1 %1190  ;;  %v832_v63 = vpop.permute.xlu0 %831 }
 0x168   : > { %v851_v0 = vsel %vm847_vm2, %v832_v63, %v3597_v6  ;;  %v3737_v41 = vsel %vm794_vm1, %v1191_v61, %v3577_v62 }
 0x169   : > { %1436 = vrot.lane.b32.xlu1 %v1403_v4, %s3160_s19  ;;  %s2743_s19 = sshll.u32 (%p3255_p6), %s3233_s28, 3 }
 0x16a   : > { %s2448_s29 = scalar_lea.vmem (%p3255_p6), %s4169_s6, %s2743_s19 }
 0x16b   : > { %v3685_v8 = vpop.permute.xlu1 %1196  ;;  %v710_v9 = vpop.permute.xlu0 %709 }
 0x16c   : > { %v733_v10 = vsel %vm731_vm6, %v710_v9, %v712_v33  ;;  %v732_v12 = vsel %vm731_vm6, %v3625_v25, %v710_v9  ;;  %v3751_v62 = vsel %vm794_vm1, %v3685_v8, %v3595_v5 }
 0x16d   : > { %1915 = vmatprep.subr.bf16.mxu1 %v733_v10  ;;  %1609 = vperm.xlu1 %2924, %v1587_v1   ;;  %v2953_v1 = vld [vmem:[%s4166_s3] ss:$20 sps:$4 sm:$0xff]  }
 0x16e   : > { %1916 = vmatpush1.bf16.msra.mxu1 %v732_v12 }
 0x16f   : > { %v1077_v13 = vpop.permute.xlu1 %1076  ;;  %v716_v14 = vpop.permute.xlu0 %715 }
 0x170   : > { %v735_v30 = vsel %vm731_vm6, %v716_v14, %v718_v29  ;;  %v3693_v15 = vsel %vm912_vm5, %v1077_v13, %v3639_v35  ;;  %v734_v16 = vsel %vm731_vm6, %v714_v40, %v716_v14  ;;  %v3697_v18 = vsel %vm912_vm5, %v1075_v39, %v1077_v13  ;;  %v1588_v13 = vld [vmem:[%s4167_s4 + $0x10] sm:$0xff]  ;;  %v1589_v14 = vld [vmem:[%s4167_s4 + $0x18] sm:$0xff] }
 0x171   : > { %1917 = vmatprep.subr.bf16.mxu1 %v735_v30  ;;  %2028 = vmatprep.subr.bf16.mxu0 %v3693_v15  ;;  %v848_v40 = vsel %vm847_vm2, %v3569_v55, %v826_v60  ;;  %v3744_v55 = vsel %vm794_vm1, %v3588_v3, %v1191_v61  ;;  %v3758_v3 = vsel %vm794_vm1, %v3605_v11, %v3685_v8  ;;  %v1586_v61 = vld [vmem:[%s4167_s4] sm:$0xff] }
 0x172   : > { %1918 = vmatpush1.bf16.msra.mxu1 %v734_v16  ;;  %2029 = vmatpush1.bf16.msra.mxu0 %v3697_v18  ;;  %v1590_v30 = vld [vmem:[%s4167_s4 + $0x20] sm:$0xff] }
 0x173   : > { %v1083_v19 = vpop.permute.xlu1 %1082  ;;  %v722_v20 = vpop.permute.xlu0 %721  ;;  %1604 = vperm.xlu0 %2923, %v1586_v61   ;;  %1614 = vperm.xlu1 %2924, %v1588_v13   ;;  %v2959_v61 = vld [vmem:[%s4166_s3 + $0x2c] ss:$20 sps:$4 sm:$0xff]  }
 0x174   : > { %v737_v21 = vsel %vm731_vm6, %v722_v20, %v724_v48  ;;  %v3703_v22 = vsel %vm912_vm5, %v1083_v19, %v1085_v45  ;;  %v736_v23 = vsel %vm731_vm6, %v720_v46, %v722_v20  ;;  %v3707_v24 = vsel %vm912_vm5, %v1081_v50, %v1083_v19  ;;  %v1591_v20 = vld [vmem:[%s4167_s4 + $0x28] sm:$0xff] }
 0x175   : > { %1919 = vmatprep.subr.bf16.mxu1 %v737_v21  ;;  %2030 = vmatprep.subr.bf16.mxu0 %v3703_v22  ;;  %v850_v45 = vsel %vm847_vm2, %v3586_v2, %v832_v63  ;;  %v3090_v13 = vld [vmem:[%s3312_s18] ss:$8 sps:$4 sm:$0xff]  }
 0x176   : > { %1920 = vmatpush1.bf16.msra.mxu1 %v736_v23  ;;  %2031 = vmatpush1.bf16.msra.mxu0 %v3707_v24 }
 0x177   : > { %v1089_v25 = vpop.permute.xlu1 %1088  ;;  %v728_v26 = vpop.permute.xlu0 %727  ;;  %1619 = vperm.xlu0 %2923, %v1589_v14   ;;  %1624 = vperm.xlu1 %2924, %v1590_v30  }
 0x178   : > { %v739_v27 = vsel %vm731_vm6, %v728_v26, %v730_v57  ;;  %v3713_v28 = vsel %vm912_vm5, %v1089_v25, %v1091_v52  ;;  %v738_v31 = vsel %vm731_vm6, %v726_v53, %v728_v26  ;;  %v3717_v33 = vsel %vm912_vm5, %v1087_v44, %v1089_v25  ;;  %v1592_v25 = vld [vmem:[%s4167_s4 + $0x30] sm:$0xff] }
 0x179   : > { %1921 = vmatprep.subr.bf16.mxu1 %v739_v27  ;;  %2032 = vmatprep.subr.bf16.mxu0 %v3713_v28 }
 0x17a   : > { %1922 = vmatpush1.bf16.msra.mxu1 %v738_v31  ;;  %2033 = vmatpush1.bf16.msra.mxu0 %v3717_v33  ;;  %v1593_v31 = vld [vmem:[%s4167_s4 + $0x38] sm:$0xff] }
 0x17b   : > { %v1095_v35 = vpop.permute.xlu1 %1094  ;;  %1923 = vmatprep.subr.bf16.mxu1 %v849_v34  ;;  %v838_v37 = vpop.permute.xlu0 %837  ;;  %1629 = vperm.xlu0 %2923, %v1591_v20   ;;  %v2956_v20 = vld [vmem:[%s4166_s3 + $0x8] ss:$20 sps:$4 sm:$0xff]  }
 0x17c   : > { %v3724_v38 = vsel %vm912_vm5, %v1095_v35, %v1097_v58  ;;  %v3727_v39 = vsel %vm912_vm5, %v1093_v59, %v1095_v35  ;;  %1634 = vperm.xlu1 %2924, %v1592_v25   ;;  %v1594_v35 = vld [vmem:[%s4167_s4 + $0x40] sm:$0xff] }
 0x17d   : > { %2034 = vmatprep.subr.bf16.mxu0 %v3724_v38 }
 0x17e   : > { %1924 = vmatpush1.bf16.msra.mxu1 %v848_v40  ;;  %2035 = vmatpush1.bf16.msra.mxu0 %v3727_v39 }
 0x17f   : > { %v840_v42 = vpop.permute.xlu1 %839  ;;  %1925 = vmatprep.subr.bf16.mxu1 %v851_v0  ;;  %2036 = vmatprep.subr.bf16.mxu0 %v3737_v41  ;;  %v836_v29 = vpop.permute.xlu0 %835  ;;  %v1595_v0 = vld [vmem:[%s4167_s4 + $0x48] sm:$0xff] }
 0x180   : > { %v853_v6 = vsel %vm847_vm2, %v838_v37, %v840_v42  ;;  %v852_v2 = vsel %vm847_vm2, %v836_v29, %v838_v37  ;;  %1639 = vperm.xlu0 %2923, %v1593_v31   ;;  %1644 = vperm.xlu1 %2924, %v1594_v35   ;;  %v1596_v29 = vld [vmem:[%s4167_s4 + $0x50] sm:$0xff] }
 0x181   : > { %v2962_v31 = vld [vmem:[%s4166_s3 + $0x34] ss:$20 sps:$4 sm:$0xff]  }
 0x182   : > { %1926 = vmatpush1.bf16.msra.mxu1 %v850_v45  ;;  %2037 = vmatpush1.bf16.msra.mxu0 %v3744_v55 }
 0x183   : > { %v1203_v43 = vpop.permute.xlu1 %1202  ;;  %1927 = vmatprep.subr.bf16.mxu1 %v853_v6  ;;  %2038 = vmatprep.subr.bf16.mxu0 %v3751_v62  ;;  %v1205_v47 = vpop.permute.xlu0 %1204 }
 0x184   : > { %v3762_v49 = vsel %vm794_vm1, %v1203_v43, %v1205_v47  ;;  %1649 = vperm.xlu0 %2923, %v1595_v0   ;;  %1654 = vperm.xlu1 %2924, %v1596_v29   ;;  %v3094_v0 = vld [vmem:[%s3325_s22] ss:$8 sps:$4 sm:$0xff]  }
 0x186   : > { %1928 = vmatpush1.bf16.msra.mxu1 %v852_v2  ;;  %2039 = vmatpush1.bf16.msra.mxu0 %v3758_v3 }
 0x187   : > { %v1201_v5 = vpop.permute.xlu1 %1200  ;;  %2040 = vmatprep.subr.bf16.mxu0 %v3762_v49  ;;  %v844_v50 = vpop.permute.xlu0 %843 }
 0x188   : > { %v3766_v46 = vsel %vm794_vm1, %v1201_v5, %v1203_v43  ;;  %v1597_v43 = vld [vmem:[%s4167_s4 + $0x58] sm:$0xff]  ;;  %v1598_v5 = vld [vmem:[%s4167_s4 + $0x60] sm:$0xff] }
 0x189   : > { %1659 = vperm.xlu0 %2923, %v1597_v43   ;;  %1664 = vperm.xlu1 %2924, %v1598_v5   ;;  %v2968_v5 = vld [vmem:[%s4166_s3 + $0x5c] ss:$20 sps:$4 sm:$0xff]  }
 0x18a   : > { %2041 = vmatpush1.bf16.msra.mxu0 %v3766_v46 }
 0x18b   : > { %v846_v51 = vpop.permute.xlu1 %845  ;;  %v842_v48 = vpop.permute.xlu0 %841 }
 0x18c   : > { %v855_v11 = vsel %vm847_vm2, %v844_v50, %v846_v51  ;;  %v854_v52 = vsel %vm847_vm2, %v842_v48, %v844_v50  ;;  %v1599_v48 = vld [vmem:[%s4167_s4 + $0x68] sm:$0xff] }
 0x18d   : > { %1929 = vmatprep.subr.bf16.mxu1 %v855_v11  ;;  %1669 = vperm.xlu0 %2923, %v1599_v48   ;;  %v2970_v48 = vld [vmem:[%s4166_s3 + $0x7c] ss:$20 sps:$4 sm:$0xff]  }
 0x18e   : > { %1930 = vmatpush1.bf16.msra.mxu1 %v854_v52  ;;  %v1600_v52 = vld [vmem:[%s4167_s4 + $0x70] sm:$0xff] }
 0x18f   : > { %v1209_v32 = vpop.permute.xlu1 %1208  ;;  %v1211_v44 = vpop.permute.xlu0 %1210  ;;  %1674 = vperm.xlu1 %2924, %v1600_v52  }
 0x190   : > { %v3772_v53 = vsel %vm794_vm1, %v1209_v32, %v1211_v44 }
 0x191   : > { %2042 = vmatprep.subr.bf16.mxu0 %v3772_v53 }
 0x193   : > { %v1207_v36 = vpop.permute.xlu1 %1206  ;;  %v944_v54 = vpop.permute.xlu0 %943 }
 0x194   : > { %v3776_v57 = vsel %vm794_vm1, %v1207_v36, %v1209_v32  ;;  %v1601_v36 = vld [vmem:[%s4167_s4 + $0x78] sm:$0xff] }
 0x195   : > { %2043 = vmatpush1.bf16.msra.mxu0 %v3776_v57  ;;  %1679 = vperm.xlu0 %2923, %v1601_v36   ;;  %v2972_v36 = vld [vmem:[%s4166_s3 + $0x58] ss:$20 sps:$4 sm:$0xff]  }
 0x197   : > { %v946_v58 = vpop.permute.xlu1 %945  ;;  %v942_v56 = vpop.permute.xlu0 %941 }
 0x198   : > { %v967_v59 = vsel %vm965_vm4, %v944_v54, %v946_v58  ;;  %v966_v60 = vsel %vm965_vm4, %v942_v56, %v944_v54 }
 0x199   : > { %1931 = vmatprep.subr.bf16.mxu1 %v967_v59 }
 0x19a   : > { %1932 = vmatpush1.bf16.msra.mxu1 %v966_v60 }
 0x19b   : > { %v1307_v63 = vpop.permute.xlu1 %1306  ;;  %v1309_v4 = vpop.permute.xlu0 %1308 }
 0x19c   : > { %v3788_v8 = vsel %vm678_vm3, %v1307_v63, %v1309_v4 }
 0x19d   : > { %2044 = vmatprep.subr.bf16.mxu0 %v3788_v8 }
 0x19f   : > { %v1305_v9 = vpop.permute.xlu1 %1304  ;;  %v950_v10 = vpop.permute.xlu0 %949 }
 0x1a0   : > { %v3792_v12 = vsel %vm678_vm3, %v1305_v9, %v1307_v63  ;;  %v3089_v9 = vld [vmem:[%s3312_s18 + $0x4] ss:$8 sps:$4 sm:$0xff]  }
 0x1a1   : > { %2045 = vmatpush1.bf16.msra.mxu0 %v3792_v12 }
 0x1a3   : > { %v952_v16 = vpop.permute.xlu1 %951  ;;  %v948_v19 = vpop.permute.xlu0 %947 }
 0x1a4   : > { %v969_v21 = vsel %vm965_vm4, %v950_v10, %v952_v16  ;;  %v968_v23 = vsel %vm965_vm4, %v948_v19, %v950_v10  ;;  %v3091_v16 = vld [vmem:[%s3312_s18 + $0x14] ss:$8 sps:$4 sm:$0xff]  }
 0x1a5   : > { %1933 = vmatprep.subr.bf16.mxu1 %v969_v21  ;;  %v2961_v21 = vld [vmem:[%s4166_s3 + $0x28] ss:$20 sps:$4 sm:$0xff]  }
 0x1a6   : > { %1934 = vmatpush1.bf16.msra.mxu1 %v968_v23  ;;  %v3092_v23 = vld [vmem:[%s3312_s18 + $0x10] ss:$8 sps:$4 sm:$0xff]   ;;  %s4073_s18 = scalar_lea.vmem [#allocation8], %s2649_s21 }
 0x1a7   : > { %v1313_v26 = vpop.permute.xlu1 %1312  ;;  %v1315_v27 = vpop.permute.xlu0 %1314 }
 0x1a8   : > { %v3816_v34 = vsel %vm678_vm3, %v1313_v26, %v1315_v27  ;;  %v3093_v27 = vld [vmem:[%s3325_s22 + $0x4] ss:$8 sps:$4 sm:$0xff]  }
 0x1a9   : > { %2046 = vmatprep.subr.bf16.mxu0 %v3816_v34 }
 0x1ab   : > { %v1311_v37 = vpop.permute.xlu1 %1310  ;;  %v956_v40 = vpop.permute.xlu0 %955 }
 0x1ac   : > { %v3826_v42 = vsel %vm678_vm3, %v1311_v37, %v1313_v26 }
 0x1ad   : > { %2047 = vmatpush1.bf16.msra.mxu0 %v3826_v42 }
 0x1af   : > { %v958_v45 = vpop.permute.xlu1 %957  ;;  %v954_v6 = vpop.permute.xlu0 %953 }
 0x1b0   : > { %v971_v47 = vsel %vm965_vm4, %v956_v40, %v958_v45  ;;  %v970_v2 = vsel %vm965_vm4, %v954_v6, %v956_v40  ;;  %v2964_v40 = vld [vmem:[%s4166_s3 + $0x54] ss:$20 sps:$4 sm:$0xff]  }
 0x1b1   : > { %1935 = vmatprep.subr.bf16.mxu1 %v971_v47  ;;  %v3095_v6 = vld [vmem:[%s3325_s22 + $0x14] ss:$8 sps:$4 sm:$0xff]   ;;  %v2966_v47 = vld [vmem:[%s4166_s3 + $0x30] ss:$20 sps:$4 sm:$0xff]  }
 0x1b2   : > { %1936 = vmatpush1.bf16.msra.mxu1 %v970_v2  ;;  %v2967_v2 = vld [vmem:[%s4166_s3 + $0x50] ss:$20 sps:$4 sm:$0xff]  }
 0x1b3   : > { %v1319_v50 = vpop.permute.xlu1 %1318  ;;  %v1321_v51 = vpop.permute.xlu0 %1320 }
 0x1b4   : > { %v3844_v11 = vsel %vm678_vm3, %v1319_v50, %v1321_v51 }
 0x1b5   : > { %2048 = vmatprep.subr.bf16.mxu0 %v3844_v11 }
 0x1b7   : > { %v1317_v32 = vpop.permute.xlu1 %1316  ;;  %v962_v44 = vpop.permute.xlu0 %961 }
 0x1b8   : > { %v3854_v54 = vsel %vm678_vm3, %v1317_v32, %v1319_v50 }
 0x1b9   : > { %2049 = vmatpush1.bf16.msra.mxu0 %v3854_v54 }
 0x1bb   : > { %v964_v58 = vpop.permute.xlu1 %963  ;;  %v960_v56 = vpop.permute.xlu0 %959 }
 0x1bc   : > { %v973_v59 = vsel %vm965_vm4, %v962_v44, %v964_v58  ;;  %v972_v60 = vsel %vm965_vm4, %v960_v56, %v962_v44  ;;  %v2973_v58 = vld [vmem:[%s4166_s3 + $0x78] ss:$20 sps:$4 sm:$0xff]  }
 0x1bd   : > { %1937 = vmatprep.subr.bf16.mxu1 %v973_v59  ;;  %v2976_v59 = vld [vmem:[%s4166_s3 + $0xa4] ss:$20 sps:$4 sm:$0xff]  }
 0x1be   : > { %1938 = vmatpush1.bf16.msra.mxu1 %v972_v60 }
 0x1bf   : > { %v1325_v63 = vpop.permute.xlu1 %1324  ;;  %v1327_v4 = vpop.permute.xlu0 %1326  ;;  %2745 = vmatprep.subr.bf16.mxu1 %v3089_v9  ;;  %v3006_v9 = vld [vmem:[%s4166_s3 + $0x100] ss:$20 sps:$4 sm:$0xff]  }
 0x1c0   : > { %v3867_v10 = vsel %vm678_vm3, %v1325_v63, %v1327_v4  ;;  %v3004_v4 = vld [vmem:[%s4166_s3 + $0x124] ss:$20 sps:$4 sm:$0xff]  }
 0x1c1   : > { %1940 = vmatmul.mubr.bf16.vlgmr.msra.gmra.mrb[0].mxu1 %v2953_v1  ;;  %2050 = vmatprep.subr.bf16.mxu0 %v3867_v10 }
 0x1c2   : > { %2761 = vmatpush1.bf16.msra.mxu1 %v3090_v13  ;;  %1949 = vmatprep.mubr.bf16.mxu1 %v2959_v61  ;;  %v2979_v61 = vld [vmem:[%s4166_s3 + $0xa0] ss:$20 sps:$4 sm:$0xff]   ;;  %v3008_v13 = vld [vmem:[%s4166_s3 + $0x128] ss:$20 sps:$4 sm:$0xff]  }
 0x1c3   : > { %v1323_v14 = vpop.permute.xlu1 %1322  ;;  %v1421_v30 = vpop.permute.xlu0 %1420  ;;  %2746 = vmatprep.subr.bf16.mxu1 %v3091_v16 }
 0x1c4   : > { %v3873_v19 = vsel %vm678_vm3, %v1323_v14, %v1325_v63  ;;  %v3003_v63 = vld [vmem:[%s4166_s3 + $0xf8] ss:$20 sps:$4 sm:$0xff]  }
 0x1c5   : > { %2051 = vmatpush1.bf16.msra.mxu0 %v3873_v19 }
 0x1c6   : > { %2762 = vmatpush1.bf16.msra.mxu1 %v3092_v23 }
 0x1c7   : > { %v1423_v25 = vpop.permute.xlu1 %1422  ;;  %v1419_v26 = vpop.permute.xlu0 %1418  ;;  %2747 = vmatprep.subr.bf16.mxu1 %v3093_v27 }
 0x1c8   : > { %v1442_v35 = vsel %vm560_vm0, %v1419_v26, %v1421_v30  ;;  %2053 = vmatmul.mubr.bf16.vlgmr.msra.gmra.mrb[0].mxu0 %v2956_v20  ;;  %v1443_v37 = vsel %vm560_vm0, %v1421_v30, %v1423_v25 }
 0x1c9   : > { %1950 = vmatmul.mubr.bf16.gmra.mrb[4].mxu1 %v2961_v21  ;;  %2133 = vmatprep.subr.bf16.mxu0 %v1443_v37 }
 0x1ca   : > { %2763 = vmatpush1.bf16.msra.mxu1 %v3094_v0  ;;  %2134 = vmatpush1.bf16.msra.mxu0 %v1442_v35 }
 0x1cb   : > { %v1427_v29 = vpop.permute.xlu1 %1426  ;;  %v1429_v45 = vpop.permute.xlu0 %1428  ;;  %2748 = vmatprep.subr.bf16.mxu1 %v3095_v6  ;;  %2062 = vmatprep.mubr.bf16.mxu0 %v2962_v31 }
 0x1cc   : > { %v1445_v43 = vsel %vm560_vm0, %v1427_v29, %v1429_v45  ;;  %1959 = vmatprep.mubr.bf16.mxu1 %v2964_v40 }
 0x1cd   : > { %2135 = vmatprep.subr.bf16.mxu0 %v1445_v43 }
 0x1ce   : > { %2764 = vmatpush1.bf16.msra.mxu1 %v3366_v17 }
 0x1cf   : > { %v1425_v50 = vpop.permute.xlu1 %1424  ;;  %2749 = vmatprep.subr.bf16.mxu1 %v3693_v15  ;;  %v1433_v51 = vpop.permute.xlu0 %1432 }
 0x1d0   : > { %v1444_v52 = vsel %vm560_vm0, %v1425_v50, %v1427_v29  ;;  %2063 = vmatmul.mubr.bf16.gmra.mrb[4].mxu0 %v2966_v47 }
 0x1d1   : > { %1960 = vmatmul.mubr.bf16.gmra.mrb[8].mxu1 %v2967_v2  ;;  %2136 = vmatpush1.bf16.msra.mxu0 %v1444_v52 }
 0x1d2   : > { %2765 = vmatpush1.bf16.msra.mxu1 %v3697_v18  ;;  %2072 = vmatprep.mubr.bf16.mxu0 %v2968_v5  ;;  %v2974_v18 = vld [vmem:[%s4166_s3 + $0x84] ss:$20 sps:$4 sm:$0xff]  }
 0x1d3   : > { %v1435_v17 = vpop.permute.xlu1 %1434  ;;  %2750 = vmatprep.subr.bf16.mxu1 %v3703_v22  ;;  %v1431_v32 = vpop.permute.xlu0 %1430  ;;  %1969 = vmatprep.mubr.bf16.mxu1 %v2970_v48 }
 0x1d4   : > { %v1446_v15 = vsel %vm560_vm0, %v1431_v32, %v1433_v51  ;;  %v1447_v44 = vsel %vm560_vm0, %v1433_v51, %v1435_v17 }
 0x1d5   : > { %2137 = vmatprep.subr.bf16.mxu0 %v1447_v44 }
 0x1d6   : > { %2766 = vmatpush1.bf16.msra.mxu1 %v3707_v24  ;;  %2138 = vmatpush1.bf16.msra.mxu0 %v1446_v15 }
 0x1d7   : > { %v1439_v22 = vpop.permute.xlu1 %1438  ;;  %2751 = vmatprep.subr.bf16.mxu1 %v3713_v28  ;;  %v1441_v56 = vpop.permute.xlu0 %1440  ;;  %v2978_v28 = vld [vmem:[%s4166_s3 + $0x80] ss:$20 sps:$4 sm:$0xff]  }
 0x1d8   : > { %2073 = vmatmul.mubr.bf16.gmra.mrb[8].mxu0 %v2972_v36  ;;  %v1449_v60 = vsel %vm560_vm0, %v1439_v22, %v1441_v56 }
 0x1d9   : > { %1970 = vmatmul.mubr.bf16.gmra.mrb[12].mxu1 %v2973_v58  ;;  %2139 = vmatprep.subr.bf16.mxu0 %v1449_v60 }
 0x1da   : > { %2767 = vmatpush1.bf16.msra.mxu1 %v3717_v33  ;;  %2082 = vmatprep.mubr.bf16.mxu0 %v2974_v18  ;;  %v2980_v33 = vld [vmem:[%s4166_s3 + $0xcc] ss:$20 sps:$4 sm:$0xff]  }
 0x1db   : > { %v1437_v24 = vpop.permute.xlu1 %1436  ;;  %2752 = vmatprep.subr.bf16.mxu1 %v3724_v38  ;;  %1979 = vmatprep.mubr.bf16.mxu1 %v2976_v59  ;;  %v2982_v38 = vld [vmem:[%s4166_s3 + $0x10] ss:$20 sps:$4 sm:$0xff]  }
 0x1dc   : > { %v1448_v1 = vsel %vm560_vm0, %v1437_v24, %v1439_v22 }
 0x1dd   : > { %2140 = vmatpush1.bf16.msra.mxu0 %v1448_v1 }
 0x1de   : > { %2768 = vmatpush1.bf16.msra.mxu1 %v3727_v39  ;;  %v2983_v39 = vld [vmem:[%s4166_s3 + $0xc8] ss:$20 sps:$4 sm:$0xff]  }
 0x1df   : > { %2753 = vmatprep.subr.bf16.mxu1 %v3737_v41  ;;  %v2984_v41 = vld [vmem:[%s4166_s3 + $0xf4] ss:$20 sps:$4 sm:$0xff]  }
 0x1e0   : > { %2083 = vmatmul.mubr.bf16.gmra.mrb[12].mxu0 %v2978_v28 }
 0x1e1   : > { %1980 = vmatmul.mubr.bf16.gmra.mrb[16].mxu1 %v2979_v61  ;;  %2165 = vmatprep.mubr.bf16.mxu0 %v3168_v7 }
 0x1e2   : > { %2769 = vmatpush1.bf16.msra.mxu1 %v3744_v55  ;;  %1989 = vmatprep.mubr.bf16.mxu1 %v2980_v33  ;;  %v2986_v55 = vld [vmem:[%s4166_s3 + $0x38] ss:$20 sps:$4 sm:$0xff]  }
 0x1e3   : > { %2754 = vmatprep.subr.bf16.mxu1 %v3751_v62  ;;  %v2987_v62 = vld [vmem:[%s4166_s3 + $0xf0] ss:$20 sps:$4 sm:$0xff]  }
 0x1e6   : > { %2770 = vmatpush1.bf16.msra.mxu1 %v3758_v3  ;;  %v2988_v3 = vld [vmem:[%s4166_s3 + $0x11c] ss:$20 sps:$4 sm:$0xff]  }
 0x1e7   : > { %2755 = vmatprep.subr.bf16.mxu1 %v3762_v49  ;;  %v2990_v49 = vld [vmem:[%s4166_s3 + $0x60] ss:$20 sps:$4 sm:$0xff]  }
 0x1e8   : > { %2716 = vmatmul.mubr.msk.bf16.vlgmr.msra.gmra.mrb[0].mxu0 %vm1882_vm8, %v2982_v38 }
 0x1e9   : > { %1990 = vmatmul.mubr.bf16.gmra.mrb[20].mxu1 %v2983_v39  ;;  %2175 = vmatprep.mubr.bf16.mxu0 %v3168_v7 }
 0x1ea   : > { %2771 = vmatpush1.bf16.msra.mxu1 %v3766_v46  ;;  %1999 = vmatprep.mubr.bf16.mxu1 %v2984_v41  ;;  %v2991_v46 = vld [vmem:[%s4166_s3 + $0x118] ss:$20 sps:$4 sm:$0xff]  }
 0x1eb   : > { %2756 = vmatprep.subr.bf16.mxu1 %v3772_v53  ;;  %v2994_v53 = vld [vmem:[%s4166_s3 + $0xac] ss:$20 sps:$4 sm:$0xff]  }
 0x1ec   : > { %v1610_v45 = vpop.permute.xlu1 %1609 }
 0x1ee   : > { %2772 = vmatpush1.bf16.msra.mxu1 %v3776_v57  ;;  %v2995_v57 = vld [vmem:[%s4166_s3 + $0x88] ss:$20 sps:$4 sm:$0xff]  }
 0x1ef   : > { %2757 = vmatprep.subr.bf16.mxu1 %v3788_v8  ;;  %v2992_v8 = vld [vmem:[%s4166_s3 + $0xa8] ss:$20 sps:$4 sm:$0xff]  }
 0x1f0   : > { %2717 = vmatmul.mubr.msk.bf16.gmra.mrb[4].mxu0 %vm1882_vm8, %v2986_v55 }
 0x1f1   : > { %2000 = vmatmul.mubr.bf16.gmra.mrb[24].mxu1 %v2987_v62  ;;  %2185 = vmatprep.mubr.bf16.mxu0 %v3168_v7 }
 0x1f2   : > { %2773 = vmatpush1.bf16.msra.mxu1 %v3792_v12  ;;  %2009 = vmatprep.mubr.bf16.mxu1 %v2988_v3  ;;  %v2996_v12 = vld [vmem:[%s4166_s3 + $0xd4] ss:$20 sps:$4 sm:$0xff]   ;;  %v1605_v29 = vpop.permute.xlu0 %1604  ;;  %v1615_v15 = vpop.permute.xlu1 %1614 }
 0x1f3   : > { %2758 = vmatprep.subr.bf16.mxu1 %v3816_v34  ;;  %v2998_v34 = vld [vmem:[%s4166_s3 + $0xb0] ss:$20 sps:$4 sm:$0xff]  }
 0x1f6   : > { %2774 = vmatpush1.bf16.msra.mxu1 %v3826_v42  ;;  %v2999_v42 = vld [vmem:[%s4166_s3 + $0xd0] ss:$20 sps:$4 sm:$0xff]   ;;  %v1620_v36 = vpop.permute.xlu0 %1619  ;;  %v1625_v38 = vpop.permute.xlu1 %1624 }
 0x1f7   : > { %2759 = vmatprep.subr.bf16.mxu1 %v3844_v11  ;;  %v3000_v11 = vld [vmem:[%s4166_s3 + $0xfc] ss:$20 sps:$4 sm:$0xff]  }
 0x1f8   : > { %2718 = vmatmul.mubr.msk.bf16.gmra.mrb[8].mxu0 %vm1882_vm8, %v2990_v49 }
 0x1f9   : > { %2010 = vmatmul.mubr.bf16.gmra.mrb[28].mxu1 %v2991_v46  ;;  %2195 = vmatprep.mubr.bf16.mxu0 %v3168_v7 }
 0x1fa   : > { %2775 = vmatpush1.bf16.msra.mxu1 %v3854_v54  ;;  %2092 = vmatprep.mubr.bf16.mxu1 %v2994_v53  ;;  %v3002_v54 = vld [vmem:[%s4166_s3 + $0xd8] ss:$20 sps:$4 sm:$0xff]   ;;  %v1630_v41 = vpop.permute.xlu0 %1629 }
 0x1fb   : > { %2760 = vmatprep.subr.bf16.mxu1 %v3867_v10  ;;  %v3007_v10 = vld [vmem:[%s4166_s3 + $0x120] ss:$20 sps:$4 sm:$0xff]  }
 0x1fe   : > { %2776 = vmatpush1.bf16.msra.mxu1 %v3873_v19 }
 0x200   : > { %2719 = vmatmul.mubr.msk.bf16.gmra.mrb[12].mxu0 %vm1882_vm8, %v2995_v57 }
 0x201   : > { %2093 = vmatmul.mubr.bf16.vlgmr.msra.gmra.mrb[16].mxu1 %v2992_v8  ;;  %2205 = vmatprep.mubr.bf16.mxu0 %v3168_v7 }
 0x202   : > { %2102 = vmatprep.mubr.bf16.mxu1 %v2996_v12 }
 0x208   : > { %2720 = vmatmul.mubr.msk.bf16.gmra.mrb[16].mxu0 %vm1882_vm8, %v2998_v34 }
 0x209   : > { %2103 = vmatmul.mubr.bf16.gmra.mrb[20].mxu1 %v2999_v42  ;;  %2215 = vmatprep.mubr.bf16.mxu0 %v3168_v7 }
 0x20a   : > { %2112 = vmatprep.mubr.bf16.mxu1 %v3000_v11 }
 0x210   : > { %2721 = vmatmul.mubr.msk.bf16.gmra.mrb[20].mxu0 %vm1882_vm8, %v3002_v54 }
 0x211   : > { %2113 = vmatmul.mubr.bf16.gmra.mrb[24].mxu1 %v3003_v63  ;;  %2225 = vmatprep.mubr.bf16.mxu0 %v3168_v7 }
 0x212   : > { %2122 = vmatprep.mubr.bf16.mxu1 %v3004_v4 }
 0x218   : > { %2722 = vmatmul.mubr.msk.bf16.gmra.mrb[24].mxu0 %vm1882_vm8, %v3006_v9 }
 0x219   : > { %2123 = vmatmul.mubr.bf16.gmra.mrb[28].mxu1 %v3007_v10  ;;  %2235 = vmatprep.mubr.bf16.mxu0 %v3168_v7 }
 0x220   : > { %2723 = vmatmul.mubr.msk.bf16.gmra.mrb[28].mxu0 %vm1882_vm8, %v3008_v13  ;;  %v1635_v13 = vpop.permute.xlu1 %1634 }
 0x294   : > { %v1941_v14 = vpop.f32.mrb[0].mxu1 }
 0x295   : > { %v1943_v30 = vpop.f32.mrb[1].mxu1  ;;  %v1942_v6 = vadd.f32 %v1941_v14, %v1605_v29 }
 0x296   : > { %v1945_v16 = vpop.f32.mrb[2].mxu1  ;;  %v1944_v43 = vadd.f32 %v1943_v30, %v1605_v29 }
 0x297   : > { %v1947_v19 = vpop.f32.mrb[3].mxu1  ;;  %v1946_v2 = vadd.f32 %v1945_v16, %v1610_v45 }
 0x298   : > { %v1948_v51 = vadd.f32 %v1947_v19, %v1610_v45 }
 0x29c   : > { %v1951_v20 = vpop.f32.mrb[4].mxu1 }
 0x29d   : > { %v1953_v21 = vpop.f32.mrb[5].mxu1  ;;  %v1952_v58 = vadd.f32 %v1951_v20, %v1615_v15 }
 0x29e   : > { %v1955_v23 = vpop.f32.mrb[6].mxu1  ;;  %v1954_v18 = vadd.f32 %v1953_v21, %v1615_v15  ;;  %v1640_v21 = vpop.permute.xlu0 %1639 }
 0x29f   : > { %v1957_v25 = vpop.f32.mrb[7].mxu1  ;;  %v1956_v56 = vadd.f32 %v1955_v23, %v1620_v36 }
 0x2a0   : > { %v1958_v24 = vadd.f32 %v1957_v25, %v1620_v36 }
 0x2a4   : > { %v1961_v26 = vpop.f32.mrb[8].mxu1 }
 0x2a5   : > { %v1963_v27 = vpop.f32.mrb[9].mxu1  ;;  %v1962_v62 = vadd.f32 %v1961_v26, %v1625_v38 }
 0x2a6   : > { %v1965_v31 = vpop.f32.mrb[10].mxu1  ;;  %v1964_v49 = vadd.f32 %v1963_v27, %v1625_v38 }
 0x2a7   : > { %v1967_v35 = vpop.f32.mrb[11].mxu1  ;;  %v1966_v57 = vadd.f32 %v1965_v31, %v1630_v41 }
 0x2a8   : > { %v1968_v42 = vadd.f32 %v1967_v35, %v1630_v41 }
 0x2ac   : > { %v1971_v37 = vpop.f32.mrb[12].mxu1 }
 0x2ad   : > { %v4037_v7 = vpop.f32.mrb[13].mxu1  ;;  %v1972_v20 = vadd.f32 %v1971_v37, %v1635_v13 }
 0x2ae   : > { %v4039_v40 = vpop.f32.mrb[14].mxu1  ;;  %v1974_v25 = vadd.f32 %v4037_v7, %v1635_v13 }
 0x2af   : > { %v4041_v0 = vpop.f32.mrb[15].mxu1 }
 0x2b0   : > { %v1978_v37 = vadd.f32 %v4041_v0, %v1640_v21 }
 0x2bb   : > { %v2167_v47 = vpop.f32.mrb[0].mxu0 }
 0x2bc   : > { %v2778_v5 = vadd.f32 %v2167_v47, %v1942_v6  ;;  %v2169_v50 = vpop.f32.mrb[1].mxu0  ;;  %v1976_v6 = vadd.f32 %v4039_v40, %v1640_v21  ;;  %v1645_v40 = vpop.permute.xlu1 %1644 }
 0x2bd   : > { %v2780_v48 = vadd.f32 %v2169_v50, %v1944_v43  ;;  %v2171_v52 = vpop.f32.mrb[2].mxu0 }
 0x2be   : > { %v2782_v17 = vadd.f32 %v2171_v52, %v1946_v2  ;;  %v2173_v32 = vpop.f32.mrb[3].mxu0  ;;  %v2246_v55 = vmul.f32 0.5, %v2778_v5 }
 0x2bf   : > { %v2784_v44 = vadd.f32 %v2173_v32, %v1948_v51  ;;  %v2247_v3 = vmul.f32 0.5, %v2780_v48 }
 0x2c0   : > { %v2248_v46 = vmul.f32 0.5, %v2782_v17  ;;  %3009 = vtanh.f32 %v2246_v55 }
 0x2c1   : > { %v2249_v8 = vmul.f32 0.5, %v2784_v44  ;;  %3011 = vtanh.f32 %v2247_v3 }
 0x2c2   : > { %3013 = vtanh.f32 %v2248_v46 }
 0x2c3   : > { %v2177_v22 = vpop.f32.mrb[4].mxu0  ;;  %3015 = vtanh.f32 %v2249_v8 }
 0x2c4   : > { %v2786_v59 = vadd.f32 %v2177_v22, %v1952_v58  ;;  %v2179_v60 = vpop.f32.mrb[5].mxu0 }
 0x2c5   : > { %v2788_v1 = vadd.f32 %v2179_v60, %v1954_v18  ;;  %v2181_v28 = vpop.f32.mrb[6].mxu0 }
 0x2c6   : > { %v2790_v61 = vadd.f32 %v2181_v28, %v1956_v56  ;;  %v2183_v33 = vpop.f32.mrb[7].mxu0  ;;  %v2250_v11 = vmul.f32 0.5, %v2786_v59  ;;  %v1650_v56 = vpop.permute.xlu0 %1649 }
 0x2c7   : > { %v2792_v39 = vadd.f32 %v2183_v33, %v1958_v24  ;;  %v2251_v23 = vmul.f32 0.5, %v2788_v1 }
 0x2c8   : > { %3017 = vtanh.f32 %v2250_v11  ;;  %v2252_v26 = vmul.f32 0.5, %v2790_v61 }
 0x2c9   : > { %v2253_v31 = vmul.f32 0.5, %v2792_v39 }
 0x2ca   : > { %v3010_v51 = vpop.eup %3009 }
 0x2cb   : > { %v2187_v53 = vpop.f32.mrb[8].mxu0  ;;  %v3012_v32 = vpop.eup %3011  ;;  %v2262_v38 = vmul.f32 0.5, %v3010_v51 }
 0x2cc   : > { %v2794_v12 = vadd.f32 %v2187_v53, %v1962_v62  ;;  %v2189_v34 = vpop.f32.mrb[9].mxu0  ;;  %v3014_v44 = vpop.eup %3013 }
 0x2cd   : > { %v2796_v54 = vadd.f32 %v2189_v34, %v1964_v49  ;;  %v2191_v63 = vpop.f32.mrb[10].mxu0  ;;  %v3016_v58 = vpop.eup %3015  ;;  %v2263_v49 = vmul.f32 0.5, %v3012_v32 }
 0x2ce   : > { %v2278_v4 = vmul.f32 0.5, %v2794_v12  ;;  %v2798_v9 = vadd.f32 %v2191_v63, %v1966_v57  ;;  %v2193_v10 = vpop.f32.mrb[11].mxu0  ;;  %v2264_v12 = vmul.f32 0.5, %v3014_v44  ;;  %v2265_v34 = vmul.f32 0.5, %v3016_v58 }
 0x2cf   : > { %v2279_v14 = vmul.f32 0.5, %v2796_v54  ;;  %v2800_v30 = vadd.f32 %v2193_v10, %v1968_v42 }
 0x2d0   : > { %v2280_v16 = vmul.f32 0.5, %v2798_v9  ;;  %3019 = vtanh.f32 %v2278_v4 }
 0x2d1   : > { %v2281_v19 = vmul.f32 0.5, %v2800_v30  ;;  %3021 = vtanh.f32 %v2279_v14  ;;  %v2270_v14 = vadd.f32 0.5, %v2262_v38 }
 0x2d2   : > { %3023 = vtanh.f32 %v2280_v16  ;;  %v3018_v22 = vpop.eup %3017  ;;  %v1655_v16 = vpop.permute.xlu1 %1654 }
 0x2d3   : > { %v2197_v27 = vpop.f32.mrb[12].mxu0  ;;  %3025 = vtanh.f32 %v2281_v19  ;;  %v2266_v63 = vmul.f32 0.5, %v3018_v22 }
 0x2d4   : > { %v2802_v35 = vadd.f32 %v2197_v27, %v1972_v20  ;;  %v2094_v29 = vpop.f32.mrb[16].mxu1  ;;  %v2199_v45 = vpop.f32.mrb[13].mxu0  ;;  %3027 = vtanh.f32 %v2251_v23  ;;  %v2271_v20 = vadd.f32 0.5, %v2263_v49  ;;  %v4047_v27 = vadd.f32 0.5, %v2265_v34 }
 0x2d5   : > { %v2804_v43 = vadd.f32 %v2199_v45, %v1974_v25  ;;  %v2096_v47 = vpop.f32.mrb[17].mxu1  ;;  %v2201_v2 = vpop.f32.mrb[14].mxu0  ;;  %3029 = vtanh.f32 %v2252_v26  ;;  %v2809_v18 = vadd.f32 %v2094_v29, %v1645_v40  ;;  %v2272_v26 = vadd.f32 0.5, %v2264_v12 }
 0x2d6   : > { %v2282_v5 = vmul.f32 0.5, %v2802_v35  ;;  %v2098_v50 = vpop.f32.mrb[18].mxu1  ;;  %v2203_v7 = vpop.f32.mrb[15].mxu0  ;;  %v2806_v52 = vadd.f32 %v2201_v2, %v1976_v6  ;;  %3031 = vtanh.f32 %v2253_v31  ;;  %v2811_v59 = vadd.f32 %v2096_v47, %v1645_v40 }
 0x2d7   : > { %v2283_v48 = vmul.f32 0.5, %v2804_v43  ;;  %v2100_v17 = vpop.f32.mrb[19].mxu1  ;;  %v2808_v15 = vadd.f32 %v2203_v7, %v1978_v37  ;;  %v2813_v39 = vadd.f32 %v2098_v50, %v1650_v56  ;;  %v1660_v35 = vpop.permute.xlu0 %1659  ;;  %v4051_v43 = vadd.f32 0.5, %v2266_v63 }
 0x2d8   : > { %3033 = vtanh.f32 %v2282_v5  ;;  %v2284_v36 = vmul.f32 0.5, %v2806_v52  ;;  %v2815_v46 = vadd.f32 %v2100_v17, %v1650_v56  ;;  %v2351_v52 = vld [vmem:[%s4057_s11 + $0x8] sm:$0xff]  ;;  %v1665_v49 = vpop.permute.xlu1 %1664 }
 0x2d9   : > { %3035 = vtanh.f32 %v2283_v48  ;;  %v2285_v0 = vmul.f32 0.5, %v2808_v15  ;;  %v2350_v48 = vld [vmem:[%s4057_s11] sm:$0xff] }
 0x2da   : > { %3037 = vtanh.f32 %v2284_v36  ;;  %v3020_v24 = vpop.eup %3019 }
 0x2db   : > { %v2207_v60 = vpop.f32.mrb[16].mxu0  ;;  %3039 = vtanh.f32 %v2285_v0  ;;  %v3022_v33 = vpop.eup %3021  ;;  %v2294_v4 = vmul.f32 0.5, %v3020_v24 }
 0x2dc   : > { %v2810_v1 = vadd.f32 %v2809_v18, %v2207_v60  ;;  %v2104_v28 = vpop.f32.mrb[20].mxu1  ;;  %v2209_v61 = vpop.f32.mrb[17].mxu0  ;;  %v2295_v9 = vmul.f32 0.5, %v3022_v33  ;;  %v2352_v18 = vld [vmem:[%s4057_s11 + $0x10] sm:$0xff]  ;;  %v2353_v60 = vld [vmem:[%s4057_s11 + $0x18] sm:$0xff] }
 0x2dd   : > { %v2812_v41 = vadd.f32 %v2811_v59, %v2209_v61  ;;  %v2106_v55 = vpop.f32.mrb[21].mxu1  ;;  %v2211_v62 = vpop.f32.mrb[18].mxu0  ;;  %v2817_v23 = vadd.f32 %v2104_v28, %v1655_v16  ;;  %v2302_v47 = vadd.f32 0.5, %v2294_v4 }
 0x2de   : > { %v3024_v3 = vpop.eup %3023  ;;  %3041 = vtanh.f32 %v2810_v1  ;;  %v2108_v53 = vpop.f32.mrb[22].mxu1  ;;  %v2814_v42 = vadd.f32 %v2813_v39, %v2211_v62  ;;  %v2819_v29 = vadd.f32 %v2106_v55, %v1655_v16  ;;  %v2303_v2 = vadd.f32 0.5, %v2295_v9 }
 0x2df   : > { %v2213_v57 = vpop.f32.mrb[19].mxu0  ;;  %v3026_v8 = vpop.eup %3025  ;;  %3043 = vtanh.f32 %v2812_v41  ;;  %v2296_v30 = vmul.f32 0.5, %v3024_v3  ;;  %v2821_v32 = vadd.f32 %v2108_v53, %v1660_v35  ;;  %v2358_v38 = vmul.f32 %v2350_v48, %v2302_v47 }
 0x2e0   : > { %v2110_v11 = vpop.f32.mrb[23].mxu1  ;;  %v3028_v54 = vpop.eup %3027  ;;  %v2816_v10 = vadd.f32 %v2815_v46, %v2213_v57  ;;  %3045 = vtanh.f32 %v2814_v42  ;;  %v2297_v21 = vmul.f32 0.5, %v3026_v8  ;;  %v2359_v39 = vmul.f32 %v2351_v52, %v2303_v2  ;;  %v2356_v2 = vld [vmem:[%s4057_s11 + $0x30] sm:$0xff] }
 0x2e1   : > { %v3030_v13 = vpop.eup %3029  ;;  %v4049_v31 = vmul.f32 0.5, %v3028_v54  ;;  %v2304_v17 = vadd.f32 0.5, %v2296_v30  ;;  %v2823_v22 = vadd.f32 %v2110_v11, %v1660_v35  ;;  %v1670_v54 = vpop.permute.xlu0 %1669 }
 0x2e2   : > { %v3032_v19 = vpop.eup %3031  ;;  %3047 = vtanh.f32 %v2816_v10  ;;  %v4053_v51 = vmul.f32 0.5, %v3030_v13  ;;  %v2305_v0 = vadd.f32 0.5, %v2297_v21  ;;  %v2354_v21 = vld [vmem:[%s4057_s11 + $0x20] sm:$0xff] }
 0x2e3   : > { %v3034_v25 = vpop.eup %3033  ;;  %v2217_v45 = vpop.f32.mrb[20].mxu0  ;;  %v4061_v58 = vmul.f32 0.5, %v3032_v19  ;;  %v2360_v3 = vmul.f32 %v2352_v18, %v2304_v17  ;;  %v2275_v47 = vadd.f32 0.5, %v4049_v31 }
 0x2e4   : > { %v3036_v6 = vpop.eup %3035  ;;  %v2818_v37 = vadd.f32 %v2817_v23, %v2217_v45  ;;  %v2114_v5 = vpop.f32.mrb[24].mxu1  ;;  %v2298_v24 = vmul.f32 0.5, %v3034_v25  ;;  %v2361_v57 = vmul.f32 %v2353_v60, %v2305_v0  ;;  %v2355_v23 = vld [vmem:[%s4057_s11 + $0x28] sm:$0xff]  ;;  %v2276_v17 = vadd.f32 0.5, %v4053_v51 }
 0x2e5   : > { %v2219_v50 = vpop.f32.mrb[21].mxu0  ;;  %v3038_v7 = vpop.eup %3037  ;;  %v2299_v1 = vmul.f32 0.5, %v3036_v6  ;;  %v2825_v12 = vadd.f32 %v2114_v5, %v1665_v49  ;;  %v2277_v31 = vadd.f32 0.5, %v4061_v58 }
 0x2e6   : > { %v2820_v15 = vadd.f32 %v2819_v29, %v2219_v50  ;;  %v2116_v44 = vpop.f32.mrb[25].mxu1  ;;  %v2221_v40 = vpop.f32.mrb[22].mxu0  ;;  %3049 = vtanh.f32 %v2818_v37  ;;  %v2300_v41 = vmul.f32 0.5, %v3038_v7  ;;  %v2306_v42 = vadd.f32 0.5, %v2298_v24  ;;  %v2357_v37 = vld [vmem:[%s4057_s11 + $0x38] sm:$0xff] }
 0x2e7   : > { %v3040_v36 = vpop.eup %3039  ;;  %v2118_v56 = vpop.f32.mrb[26].mxu1  ;;  %v2822_v28 = vadd.f32 %v2821_v32, %v2221_v40  ;;  %v2307_v11 = vadd.f32 0.5, %v2299_v1  ;;  %v2827_v4 = vadd.f32 %v2116_v44, %v1665_v49 }
 0x2e8   : > { %v2223_v59 = vpop.f32.mrb[23].mxu0  ;;  %3051 = vtanh.f32 %v2820_v15  ;;  %v2120_v61 = vpop.f32.mrb[27].mxu1  ;;  %v2301_v46 = vmul.f32 0.5, %v3040_v36  ;;  %v2308_v13 = vadd.f32 0.5, %v2300_v41  ;;  %v2829_v29 = vadd.f32 %v2118_v56, %v1670_v54 }
 0x2e9   : > { %v3042_v33 = vpop.eup %3041  ;;  %v2824_v55 = vadd.f32 %v2823_v22, %v2223_v59  ;;  %3053 = vtanh.f32 %v2822_v28  ;;  %v2831_v50 = vadd.f32 %v2120_v61, %v1670_v54  ;;  %v2362_v36 = vmul.f32 %v2354_v21, %v2306_v42  ;;  %v1675_v60 = vpop.permute.xlu1 %1674 }
 0x2ea   : > { %v3044_v62 = vpop.eup %3043  ;;  %v2366_v53 = vmul.f32 %v3042_v33, %v2270_v14  ;;  %v2309_v25 = vadd.f32 0.5, %v2301_v46  ;;  %v2363_v18 = vmul.f32 %v2355_v23, %v2307_v11  ;;  %v2364_v56 = vmul.f32 %v2356_v2, %v2308_v13  ;;  %v1680_v51 = vpop.permute.xlu0 %1679 }
 0x2eb   : > { %v2367_v8 = vmul.f32 %v3044_v62, %v2271_v20  ;;  %3055 = vtanh.f32 %v2824_v55  ;;  %v3046_v34 = vpop.eup %3045  ;;  %v2227_v9 = vpop.f32.mrb[24].mxu0 }
 0x2ec   : > { %v4065_v63 = vadd.f32 %v2366_v53, %v2358_v38  ;;  %v3048_v10 = vpop.eup %3047  ;;  %v2368_v14 = vmul.f32 %v3046_v34, %v2272_v26  ;;  %v2826_v16 = vadd.f32 %v2825_v12, %v2227_v9  ;;  %v2124_v19 = vpop.f32.mrb[28].mxu1  ;;  %v2365_v59 = vmul.f32 %v2357_v37, %v2309_v25 }
 0x2ed   : > { %v4067_v30 = vadd.f32 %v2367_v8, %v2359_v39  ;;  %v2229_v20 = vpop.f32.mrb[25].mxu0  ;;  %v2369_v35 = vmul.f32 %v3048_v10, %v4047_v27  ;;  %v2126_v6 = vpop.f32.mrb[29].mxu1  ;;  %v2833_v61 = vadd.f32 %v2124_v19, %v1675_v60 }
 0x2ee   : > { %2426 = vst [vmem:[%s4073_s18] sm:$0xff] %v4065_v63  ;;  %v2828_v45 = vadd.f32 %v2827_v4, %v2229_v20  ;;  %v2231_v26 = vpop.f32.mrb[26].mxu0  ;;  %v2376_v5 = vadd.f32 %v2368_v14, %v2360_v3  ;;  %v2318_v7 = vmul.f32 0.5, %v2826_v16  ;;  %v2128_v48 = vpop.f32.mrb[30].mxu1  ;;  %v2835_v33 = vadd.f32 %v2126_v6, %v1675_v60 }
 0x2ef   : > { %2427 = vst [vmem:[%s4073_s18 + $0x8] sm:$0xff] %v4067_v30  ;;  %v2233_v52 = vpop.f32.mrb[27].mxu0  ;;  %v2377_v27 = vadd.f32 %v2369_v35, %v2361_v57  ;;  %v2830_v15 = vadd.f32 %v2829_v29, %v2231_v26  ;;  %v2130_v44 = vpop.f32.mrb[31].mxu1  ;;  %v2837_v39 = vadd.f32 %v2128_v48, %v1680_v51 }
 0x2f0   : > { %v2319_v32 = vmul.f32 0.5, %v2828_v45  ;;  %v3050_v40 = vpop.eup %3049  ;;  %2428 = vst [vmem:[%s4073_s18 + $0x10] sm:$0xff] %v2376_v5  ;;  %v2832_v0 = vadd.f32 %v2831_v50, %v2233_v52  ;;  %3057 = vtanh.f32 %v2318_v7  ;;  %v2839_v57 = vadd.f32 %v2130_v44, %v1680_v51 }
 0x2f1   : > { %2429 = vst [vmem:[%s4073_s18 + $0x18] sm:$0xff] %v2377_v27  ;;  %v2370_v24 = vmul.f32 %v3050_v40, %v4051_v43  ;;  %v2320_v1 = vmul.f32 0.5, %v2830_v15 }
 0x2f2   : > { %v3052_v22 = vpop.eup %3051  ;;  %3059 = vtanh.f32 %v2319_v32  ;;  %v2321_v41 = vmul.f32 0.5, %v2832_v0 }
 0x2f3   : > { %v2371_v28 = vmul.f32 %v3052_v22, %v2275_v47  ;;  %v3054_v38 = vpop.eup %3053  ;;  %v2378_v58 = vadd.f32 %v2370_v24, %v2362_v36  ;;  %v2237_v55 = vpop.f32.mrb[28].mxu0  ;;  %3061 = vtanh.f32 %v2320_v1 }
 0x2f4   : > { %v2372_v49 = vmul.f32 %v3054_v38, %v2276_v17  ;;  %v2834_v46 = vadd.f32 %v2833_v61, %v2237_v55  ;;  %v2239_v43 = vpop.f32.mrb[29].mxu0  ;;  %3063 = vtanh.f32 %v4065_v63 }
 0x2f5   : > { %v3056_v62 = vpop.eup %3055  ;;  %v2379_v3 = vadd.f32 %v2371_v28, %v2363_v18  ;;  %2430 = vst [vmem:[%s4073_s18 + $0x20] sm:$0xff] %v2378_v58  ;;  %v2836_v8 = vadd.f32 %v2835_v33, %v2239_v43  ;;  %v2241_v12 = vpop.f32.mrb[30].mxu0  ;;  %3065 = vtanh.f32 %v4067_v30 }
 0x2f6   : > { %v2373_v53 = vmul.f32 %v3056_v62, %v2277_v31  ;;  %v2380_v34 = vadd.f32 %v2372_v49, %v2364_v56  ;;  %v2322_v42 = vmul.f32 0.5, %v2834_v46  ;;  %v2838_v11 = vadd.f32 %v2837_v39, %v2241_v12  ;;  %v2243_v54 = vpop.f32.mrb[31].mxu0 }
 0x2f7   : > { %2431 = vst [vmem:[%s4073_s18 + $0x28] sm:$0xff] %v2379_v3  ;;  %3067 = vtanh.f32 %v2321_v41  ;;  %v2323_v9 = vmul.f32 0.5, %v2836_v8  ;;  %v2840_v10 = vadd.f32 %v2839_v57, %v2243_v54 }
 0x2f8   : > { %v2381_v4 = vadd.f32 %v2373_v53, %v2365_v59  ;;  %3069 = vtanh.f32 %v2376_v5  ;;  %2432 = vst [vmem:[%s4073_s18 + $0x30] sm:$0xff] %v2380_v34  ;;  %v2324_v63 = vmul.f32 0.5, %v2838_v11 }
 0x2f9   : > { %3071 = vtanh.f32 %v2377_v27  ;;  %v2325_v13 = vmul.f32 0.5, %v2840_v10 }
 0x2fa   : > { %2433 = vst [vmem:[%s4073_s18 + $0x38] sm:$0xff] %v2381_v4  ;;  %3073 = vtanh.f32 %v2322_v42  ;;  %v3058_v14 = vpop.eup %3057 }
 0x2fb   : > { %3075 = vtanh.f32 %v2323_v9  ;;  %v2334_v16 = vmul.f32 0.5, %v3058_v14 }
 0x2fc   : > { %3077 = vtanh.f32 %v2324_v63  ;;  %v3060_v30 = vpop.eup %3059 }
 0x2fd   : > { %3079 = vtanh.f32 %v2325_v13  ;;  %v3062_v19 = vpop.eup %3061  ;;  %v2335_v20 = vmul.f32 0.5, %v3060_v30  ;;  %v2342_v23 = vadd.f32 0.5, %v2334_v16 }
 0x2fe   : > { %3081 = vtanh.f32 %v2378_v58  ;;  %v3064_v21 = vpop.eup %3063  ;;  %v2336_v25 = vmul.f32 0.5, %v3062_v19 }
 0x2ff   : > { %3083 = vtanh.f32 %v2379_v3  ;;  %v3066_v35 = vpop.eup %3065  ;;  %v2343_v29 = vadd.f32 0.5, %v2335_v20  ;;  %v2390_v6 = vmul.f32 %v3064_v21, %v2342_v23 }
 0x300   : > { %3085 = vtanh.f32 %v2380_v34  ;;  %v2344_v26 = vadd.f32 0.5, %v2336_v25 }
 0x301   : > { %v3068_v45 = vpop.eup %3067  ;;  %3087 = vtanh.f32 %v2381_v4  ;;  %v2391_v2 = vmul.f32 %v3066_v35, %v2343_v29 }
 0x302   : > { %v3070_v47 = vpop.eup %3069  ;;  %v2337_v37 = vmul.f32 0.5, %v3068_v45 }
 0x303   : > { %v3072_v5 = vpop.eup %3071  ;;  %v2392_v50 = vmul.f32 %v3070_v47, %v2344_v26  ;;  %v2739_v48 = vpack.c.bf16 %v2391_v2, %v2390_v6 }
 0x304   : > { %v3074_v7 = vpop.eup %3073  ;;  %v2345_v52 = vadd.f32 0.5, %v2337_v37 }
 0x305   : > { %v3076_v17 = vpop.eup %3075  ;;  %v2338_v27 = vmul.f32 0.5, %v3074_v7  ;;  %2422 = vst [vmem:[%s4095_s23] sm:$0xff] %v2739_v48 }
 0x306   : > { %v3078_v32 = vpop.eup %3077  ;;  %v2393_v15 = vmul.f32 %v3072_v5, %v2345_v52  ;;  %v2339_v44 = vmul.f32 0.5, %v3076_v17 }
 0x307   : > { %v3080_v40 = vpop.eup %3079  ;;  %v2346_v31 = vadd.f32 0.5, %v2338_v27  ;;  %v2340_v36 = vmul.f32 0.5, %v3078_v32 }
 0x308   : > { %v3082_v18 = vpop.eup %3081  ;;  %v2740_v0 = vpack.c.bf16 %v2393_v15, %v2392_v50  ;;  %v2347_v22 = vadd.f32 0.5, %v2339_v44  ;;  %v2341_v56 = vmul.f32 0.5, %v3080_v40 }
 0x309   : > { %v3084_v59 = vpop.eup %3083  ;;  %v2394_v60 = vmul.f32 %v3082_v18, %v2346_v31  ;;  %v2348_v24 = vadd.f32 0.5, %v2340_v36 }
 0x30a   : > { %v3086_v1 = vpop.eup %3085  ;;  %2423 = vst [vmem:[%s4095_s23 + $0x8] sm:$0xff] %v2740_v0  ;;  %v2395_v51 = vmul.f32 %v3084_v59, %v2347_v22  ;;  %v2349_v28 = vadd.f32 0.5, %v2341_v56  ;;  %2445 = sbr.rel (!%p3255_p6) target bundleno = 793 (0x319), region = 147 }
 0x30b   : > { %v3088_v61 = vpop.eup %3087  ;;  %v2396_v33 = vmul.f32 %v3086_v1, %v2348_v24 }
 0x30c   : > { %v2741_v38 = vpack.c.bf16 %v2395_v51, %v2394_v60  ;;  %v2397_v58 = vmul.f32 %v3088_v61, %v2349_v28  ;;  %v2482_v41 = vld [vmem:[%s4095_s23] sm:$0xff] (%p3255_p6) }
 0x30d   : > { %2483 = vst [vmem:[%s2448_s29] sm:$0xff] (%p3255_p6), %v2482_v41 }
 0x30e   : > { %2424 = vst [vmem:[%s4095_s23 + $0x10] sm:$0xff] %v2741_v38  ;;  %v2742_v39 = vpack.c.bf16 %v2397_v58, %v2396_v33 }
 0x310   : > { %2425 = vst [vmem:[%s4095_s23 + $0x18] sm:$0xff] %v2742_v39 }
 0x311   : > { %v2484_v55 = vld [vmem:[%s4095_s23 + $0x8] sm:$0xff] }
 0x312   : > { %2485 = vst [vmem:[%s2448_s29 + $0x10] sm:$0xff] %v2484_v55 }
 0x315   : > { %v2486_v62 = vld [vmem:[%s4095_s23 + $0x10] sm:$0xff] }
 0x316   : > { %2487 = vst [vmem:[%s2448_s29 + $0x20] sm:$0xff] %v2486_v62 }
 0x317   : > { %v2488_v3 = vld [vmem:[%s4095_s23 + $0x18] sm:$0xff] }
 0x318   : > { %2489 = vst [vmem:[%s2448_s29 + $0x30] sm:$0xff] %v2488_v3 }
 0x319 PF: > { %s2744_s22 = sshll.u32 %s3233_s28, 8  ;;  %s2502_s9 = sshll.u32 %s4073_s18, 4  ;;  %s4119_s9 = int_to_ptr.vmem [resolvable:$true] %s2502_s9 }
 0x31a   : > { %s4117_s11 = scalar_lea.hbm %s4170_s7, %s2744_s22  ;;  %s3096_s23 = scalar_lea.vmem %s4119_s9, 1024 }
 0x31b   : > { %p3097_p13 = scmp.ne.s32.totalorder %s4119_s9, %s3096_s23  ;;  %s3169_s19 = smov [#allocation8]  }
 0x31c   : > { %s3100_s20 = sshll.u32 %s3169_s19, 4  ;;  %s3101_s20 = int_to_ptr.vmem [resolvable:$false] %s3100_s20 }
 0x31d   : > { %p3098_p0 = pnand %p3097_p13, %p3255_p6  ;;  %s3102_s28 = scalar_lea.vmem %s3101_s20, 2048 }
 0x31e   : > { %p3103_p2 = scmp.lt.s32.totalorder %s4119_s9, %s3101_s20  ;;  %p3104_p3 = scmp.lt.s32.totalorder %s3102_s28, %s3096_s23 }
 0x31f   : > { %p3099_p1 = pneg %p3098_p0 }
 0x320   : > { %p3105_p4 = por %p3104_p3, %p3103_p2 }
 0x322   : > { %p3106_p5 = pnand %p3105_p4, %p3099_p1 }
 0x324   : > { %3109 = shalt.err (!%p3106_p5)
}
 0x325   : > { %s3110_s18 = scalar_lea.hbm %s4117_s11, 1024  ;;  %s3114_s22 = scalar_lea.hbm %s4170_s7, 2048 }
 0x326   : > { %p3111_p7 = scmp.ne.s32.totalorder %s4117_s11, %s3110_s18  ;;  %p3115_p12 = scmp.lt.u32.totalorder %s4117_s11, %s4170_s7 }
 0x327   : > { %p3116_p13 = scmp.lt.u32.totalorder %s3114_s22, %s3110_s18  ;;  %p3118_p1 = scmp.lt.u32.totalorder %s3110_s18, %s4117_s11 }
 0x328   : > { %p3112_p10 = pnand %p3111_p7, %p3255_p6 }
 0x329   : > { %p3117_p0 = por %p3116_p13, %p3115_p12 }
 0x32a   : > { %p3113_p11 = pneg %p3112_p10 }
 0x32b   : > { %p3119_p2 = por %p3118_p1, %p3117_p0 }
 0x32d   : > { %p3120_p3 = pnand %p3119_p2, %p3113_p11 }
 0x32f   : > { %3123 = shalt.err (!%p3120_p3)
}
 0x330   : > { %s3170_s23 = smov 256   ;;  %s3171_s19 = smov 512  }
 0x331   : > { %2873 = dma.vmem_to_hbm [thread:$0]  (%p3255_p6), %s4119_s9, 1024, %s4117_s11, %s2439_s17, %s3170_s23, %s3171_s19, %s3166_s8  }
 0x332 PF: > { %s2524_s20 = sand.u32 1, %s3146_s24   ;;  %p2876_p4 = pnand %p2636_p9, %p3259_p8 }
 0x333   : > { %s2525_s28 = scalar_lea.sflag [#allocation9], %s2524_s20 }
 0x334   : > { %3141 = dma.done.wait (!%p2876_p4), %s2525_s28, 1024  }
 0x335   : > { %3143 = vsyncadd (!%p2876_p4), %s2525_s28, 4294966272  ;;  %p18_p5 = scmp.ge.s32.totalorder %s3237_s30, 4   ;;  %s4174_s24 = smov %s3150_s25 }
 0x336   : > { %s4175_s25 = smov %s3154_s26  ;;  %s4176_s26 = smov %s3249_s10 }
 0x337   : > { %s4177_s27 = smov %s3237_s30  ;;  %20 = sbr.rel (!%p18_p5) target bundleno = 3 (0x3), region = 249 }
 0x33e   :  { %2530 = vsyncpa [#allocation9], 1 }
 0x33f   :  { %2532 = vsyncpa [#allocation9 + $0x1], 1 }

// kernel: ms_cms_lstm_forward.10
= control target key start
LH: loop header
LB: loop body
LE: loop exit
PB: predicated region body
PF: predicated region fallthrough
CT: control target
= control target key end

     0   :  { %v83_v0 = vlaneseq  ;;  %s1799_s15 = smov 121   ;;  %s1800_s16 = smov 7   ;;  %s2286_s0 = inlined_call_operand.vmem [shape: bf16[32,128], index: 0, kind: input, shape index: {}]   ;;  %s2287_s1 = inlined_call_operand.vmem [shape: bf16[32,128], index: 1, kind: input, shape index: {}]   ;;  %s2288_s2 = inlined_call_operand.vmem [shape: f32[32,128], index: 2, kind: input, shape index: {}]   ;;  %s2289_s3 = inlined_call_operand.vmem [shape: bf16[128,576], index: 3, kind: input, shape index: {}]   ;;  %s2290_s4 = inlined_call_operand.vmem [shape: f32[128,1], index: 4, kind: input, shape index: {}]   ;;  %s2291_s5 = inlined_call_operand.vmem [shape: bf16[9,128], index: 5, kind: input, shape index: {}]   ;;  %s2292_s6 = inlined_call_operand.vmem [shape: bf16[32,128], index: 6, kind: output, shape index: {0}]   ;;  %s2293_s7 = inlined_call_operand.hbm [shape: f32[32,128], index: 7, kind: output, shape index: {1}]  }
   0x1   :  { %v210_v1 = vld [vmem:[%s2291_s5] sm:$0x2]  ;;  %v79_v2 = vld [vmem:[%s2291_s5] sm:$0x1]  ;;  %v415_v3 = vld [vmem:[%s2291_s5] sm:$0x8] }
   0x2   :  { %v275_v4 = vld [vmem:[%s2291_s5] sm:$0x2]  ;;  %v84_v5 = vshrl.u32 %v83_v0, 7  ;;  %v212_v6 = vpack.i.b16 %v210_v1, %v210_v1  ;;  %v417_v7 = vpack.i.b16 %v415_v3, %v415_v3  ;;  %v144_v9 = vld [vmem:[%s2291_s5] sm:$0x1]  ;;  %v81_v10 = vpack.i.b16 %v79_v2, %v79_v2  ;;  %s1801_s19 = smov 119  }
   0x3   :  { %v277_v8 = vshrl.u32 %v275_v4, 16  ;;  %v146_v11 = vshrl.u32 %v144_v9, 16  ;;  %v480_v12 = vld [vmem:[%s2291_s5] sm:$0x8]  ;;  %v349_v18 = vld [vmem:[%s2291_s5] sm:$0x4] }
   0x4   :  { %v216_v13 = vsub.s32 1, %v84_v5  ;;  %v85_v14 = vsub.s32 0, %v84_v5  ;;  %v421_v15 = vsub.s32 3, %v84_v5  ;;  %v482_v17 = vshrl.u32 %v480_v12, 16  ;;  %v546_v26 = vld [vmem:[%s2291_s5 + $0x4] sm:$0x1] }
   0x5   :  { %v278_v16 = vpack.i.b16 %v277_v8, %v277_v8  ;;  %v147_v21 = vpack.i.b16 %v146_v11, %v146_v11  ;;  %v351_v25 = vshrl.u32 %v349_v18, 16  ;;  %s1802_s20 = smov 127   ;;  %v356_v30 = vsub.s32 2, %v84_v5  ;;  %s1803_s21 = smov 120  }
   0x6   :  { %v217_v19 = vrot.slane %v212_v6, %v216_v13  ;;  %v422_v20 = vrot.slane %v417_v7, %v421_v15  ;;  %v86_v22 = vrot.slane %v81_v10, %v85_v14  ;;  %v483_v24 = vpack.i.b16 %v482_v17, %v482_v17  ;;  %s1804_s22 = smov 8   ;;  %s1805_s5 = smov 1  }
   0x7   :  { %v283_v23 = vrot.slane %v278_v16, %v216_v13  ;;  %v152_v27 = vrot.slane %v147_v21, %v85_v14  ;;  %v352_v29 = vpack.i.b16 %v351_v25, %v351_v25  ;;  %v548_v31 = vpack.i.b16 %v546_v26, %v546_v26  ;;  %s1806_s23 = smov 9  }
   0x8   :  { %219 = vrot.lane.b32.xlu0 %v217_v19, %s1799_s15  ;;  %424 = vrot.lane.b32.xlu1 %v422_v20, %s1800_s16  ;;  %v488_v28 = vrot.slane %v483_v24, %v421_v15 }
   0x9   :  { %v357_v32 = vrot.slane %v352_v29, %v356_v30  ;;  %v553_v33 = vrot.slane %v548_v31, %v85_v14 }
   0xc   :  { %88 = vrot.lane.b32.xlu0 %v86_v22, %s1801_s19  ;;  %285 = vrot.lane.b32.xlu1 %v283_v23, %s1802_s20 }
  0x10   :  { %154 = vrot.lane.b32.xlu0 %v152_v27, %s1803_s21  ;;  %490 = vrot.lane.b32.xlu1 %v488_v28, %s1804_s22 }
  0x14   :  { %359 = vrot.lane.b32.xlu0 %v357_v32, %s1805_s5  ;;  %555 = vrot.lane.b32.xlu1 %v553_v33, %s1806_s23 }
  0x15   :  { %13 = vsyncpa [#allocation5], 0  ;;  %v1885_v34 = vld [vmem:[%s2286_s0] sm:$0xff]   ;;  %v1894_v41 = vld [vmem:[%s2286_s0 + $0x8] sm:$0xff]   ;;  %vm254_vm0 = vcmask 56320   ;;  %vm123_vm1 = vcmask 72704  }
  0x16   :  { %v1905_v44 = vld [vmem:[%s2287_s1] sm:$0xff]   ;;  %v1916_v47 = vld [vmem:[%s2287_s1 + $0x8] sm:$0xff]   ;;  %vm459_vm2 = vcmask 990208   ;;  %vm320_vm3 = vcmask 7168   ;;  %vm189_vm4 = vcmask 64512   ;;  %vm525_vm5 = vcmask 982016  }
  0x17   :  { %v1681_v1 = vld [vmem:[%s2289_s3 + $0x4] ss:$20 sps:$4 sm:$0xff]   ;;  %v1693_v14 = vld [vmem:[%s2289_s3 + $0xc] ss:$20 sps:$4 sm:$0xff]   ;;  %vm394_vm6 = vcmask 1039360   ;;  %vm590_vm7 = vcmask 973824  }
  0x18   :  { %1040 = vmatprep.mubr.bf16.mxu0 %v1681_v1  ;;  %1137 = vmatprep.mubr.bf16.mxu1 %v1693_v14  ;;  %vm983_vm8 = vcmask 523264  }
  0x7a   :  { %v220_v35 = vpop.permute.xlu0 %219  ;;  %v425_v49 = vpop.permute.xlu1 %424 }
  0x7b   :  { %v222_v36 = vmul.bf16 0, %v220_v35  ;;  %v223_v37 = vmul.bf16 %v1885_v34, %v220_v35  ;;  %v225_v42 = vmul.bf16 %v1894_v41, %v220_v35  ;;  %v227_v45 = vmul.bf16 %v1905_v44, %v220_v35 }
  0x7c   :  { %v229_v48 = vmul.bf16 %v1916_v47, %v220_v35  ;;  %v427_v51 = vmul.bf16 %v1885_v34, %v425_v49  ;;  %v428_v52 = vmul.bf16 0, %v425_v49  ;;  %v429_v59 = vmul.bf16 %v1894_v41, %v425_v49 }
  0x7d   :  { %238 = vrot.lane.b32.xlu1 %v222_v36, %s1800_s16  ;;  %240 = vrot.lane.b32.xlu0 %v223_v37, %s1800_s16  ;;  %v431_v62 = vmul.bf16 %v1905_v44, %v425_v49  ;;  %v433_v2 = vmul.bf16 %v1916_v47, %v425_v49 }
  0x7e   :  { %v89_v38 = vpop.permute.xlu0 %88  ;;  %v286_v53 = vpop.permute.xlu1 %285 }
  0x7f   :  { %v91_v39 = vmul.bf16 0, %v89_v38  ;;  %v92_v40 = vmul.bf16 %v1885_v34, %v89_v38  ;;  %v94_v43 = vmul.bf16 %v1894_v41, %v89_v38  ;;  %v96_v46 = vmul.bf16 %v1905_v44, %v89_v38 }
  0x80   :  { %v98_v50 = vmul.bf16 %v1916_v47, %v89_v38  ;;  %v288_v54 = vmul.bf16 0, %v286_v53  ;;  %v289_v55 = vmul.bf16 %v1885_v34, %v286_v53  ;;  %v291_v60 = vmul.bf16 %v1894_v41, %v286_v53 }
  0x81   :  { %107 = vrot.lane.b32.xlu1 %v91_v39, %s1806_s23  ;;  %109 = vrot.lane.b32.xlu0 %v92_v40, %s1806_s23  ;;  %v293_v63 = vmul.bf16 %v1905_v44, %v286_v53  ;;  %v295_v3 = vmul.bf16 %v1916_v47, %v286_v53 }
  0x82   :  { %v155_v56 = vpop.permute.xlu0 %154  ;;  %v491_v4 = vpop.permute.xlu1 %490 }
  0x83   :  { %v157_v57 = vmul.bf16 0, %v155_v56  ;;  %v158_v58 = vmul.bf16 %v1885_v34, %v155_v56  ;;  %v160_v61 = vmul.bf16 %v1894_v41, %v155_v56  ;;  %v162_v0 = vmul.bf16 %v1905_v44, %v155_v56 }
  0x84   :  { %v164_v5 = vmul.bf16 %v1916_v47, %v155_v56  ;;  %v494_v6 = vmul.bf16 0, %v491_v4  ;;  %v493_v7 = vmul.bf16 %v1885_v34, %v491_v4  ;;  %v495_v11 = vmul.bf16 %v1894_v41, %v491_v4 }
  0x85   :  { %242 = vrot.lane.b32.xlu1 %v222_v36, %s1800_s16  ;;  %244 = vrot.lane.b32.xlu0 %v225_v42, %s1800_s16  ;;  %v497_v13 = vmul.bf16 %v1905_v44, %v491_v4  ;;  %v499_v16 = vmul.bf16 %v1916_v47, %v491_v4 }
  0x86   :  { %v360_v8 = vpop.permute.xlu0 %359  ;;  %v556_v17 = vpop.permute.xlu1 %555 }
  0x87   :  { %v363_v9 = vmul.bf16 0, %v360_v8  ;;  %v362_v10 = vmul.bf16 %v1885_v34, %v360_v8  ;;  %v364_v12 = vmul.bf16 %v1894_v41, %v360_v8  ;;  %v366_v15 = vmul.bf16 %v1905_v44, %v360_v8 }
  0x88   :  { %v368_v18 = vmul.bf16 %v1916_v47, %v360_v8  ;;  %v559_v19 = vmul.bf16 0, %v556_v17  ;;  %v558_v20 = vmul.bf16 %v1885_v34, %v556_v17  ;;  %v560_v24 = vmul.bf16 %v1894_v41, %v556_v17 }
  0x89   :  { %111 = vrot.lane.b32.xlu1 %v91_v39, %s1806_s23  ;;  %113 = vrot.lane.b32.xlu0 %v94_v43, %s1806_s23  ;;  %v562_v27 = vmul.bf16 %v1905_v44, %v556_v17  ;;  %v564_v31 = vmul.bf16 %v1916_v47, %v556_v17  ;;  %v1807_v8 = vmov 0   ;;  %v692_v17 = vld [vmem:[%s2290_s4 + $0x28] sm:$0xff] }
  0x8a   :  { %1674 = vset.pattern.permute.xlu1 %v1807_v8  ;;  %1673 = vset.pattern.permute.xlu0 %v1807_v8  ;;  %v1691_v8 = vld [vmem:[%s2289_s3 + $0x8] ss:$20 sps:$4 sm:$0xff]  }
  0x8d   :  { %246 = vrot.lane.b32.xlu1 %v222_v36, %s1800_s16  ;;  %248 = vrot.lane.b32.xlu0 %v227_v45, %s1800_s16 }
  0x91   :  { %115 = vrot.lane.b32.xlu1 %v91_v39, %s1806_s23  ;;  %117 = vrot.lane.b32.xlu0 %v96_v46, %s1806_s23 }
  0x95   :  { %250 = vrot.lane.b32.xlu1 %v222_v36, %s1800_s16  ;;  %252 = vrot.lane.b32.xlu0 %v229_v48, %s1800_s16 }
  0x99   :  { %119 = vrot.lane.b32.xlu1 %v91_v39, %s1806_s23  ;;  %121 = vrot.lane.b32.xlu0 %v98_v50, %s1806_s23  ;;  %s1808_s23 = smov [#allocation4]  }
  0x9a   :  { %s1406_s24 = sshll.u32 %s1808_s23, 4  ;;  %s1407_s24 = int_to_ptr.vmem [resolvable:$true] %s1406_s24 }
  0x9b   :  { %p1780_p1 = scmp.lt.s32.totalorder %s1407_s24, %s1407_s24 }
  0x9d   :  { %443 = vrot.lane.b32.xlu1 %v427_v51, %s1799_s15  ;;  %445 = vrot.lane.b32.xlu0 %v428_v52, %s1799_s15 }
  0xa1   :  { %304 = vrot.lane.b32.xlu1 %v288_v54, %s1805_s5  ;;  %306 = vrot.lane.b32.xlu0 %v289_v55, %s1805_s5 }
  0xa5   :  { %173 = vrot.lane.b32.xlu1 %v157_v57, %s1804_s22  ;;  %175 = vrot.lane.b32.xlu0 %v158_v58, %s1804_s22 }
  0xa9   :  { %447 = vrot.lane.b32.xlu1 %v429_v59, %s1799_s15  ;;  %449 = vrot.lane.b32.xlu0 %v428_v52, %s1799_s15 }
  0xad   :  { %308 = vrot.lane.b32.xlu1 %v288_v54, %s1805_s5  ;;  %310 = vrot.lane.b32.xlu0 %v291_v60, %s1805_s5 }
  0xb1   :  { %179 = vrot.lane.b32.xlu1 %v160_v61, %s1804_s22  ;;  %177 = vrot.lane.b32.xlu0 %v157_v57, %s1804_s22 }
  0xb5   :  { %453 = vrot.lane.b32.xlu1 %v428_v52, %s1799_s15  ;;  %451 = vrot.lane.b32.xlu0 %v431_v62, %s1799_s15 }
  0xb9   :  { %314 = vrot.lane.b32.xlu1 %v293_v63, %s1805_s5  ;;  %312 = vrot.lane.b32.xlu0 %v288_v54, %s1805_s5 }
  0xbd   :  { %183 = vrot.lane.b32.xlu1 %v162_v0, %s1804_s22  ;;  %181 = vrot.lane.b32.xlu0 %v157_v57, %s1804_s22 }
  0xc1   :  { %457 = vrot.lane.b32.xlu1 %v428_v52, %s1799_s15  ;;  %455 = vrot.lane.b32.xlu0 %v433_v2, %s1799_s15 }
  0xc5   :  { %318 = vrot.lane.b32.xlu1 %v295_v3, %s1805_s5  ;;  %316 = vrot.lane.b32.xlu0 %v288_v54, %s1805_s5 }
  0xc9   :  { %187 = vrot.lane.b32.xlu1 %v164_v5, %s1804_s22  ;;  %185 = vrot.lane.b32.xlu0 %v157_v57, %s1804_s22 }
  0xcd   :  { %511 = vrot.lane.b32.xlu1 %v494_v6, %s1803_s21  ;;  %509 = vrot.lane.b32.xlu0 %v493_v7, %s1803_s21 }
  0xd1   :  { %380 = vrot.lane.b32.xlu1 %v363_v9, %s1802_s20  ;;  %378 = vrot.lane.b32.xlu0 %v362_v10, %s1802_s20  ;;  %v689_v10 = vld [vmem:[%s2290_s4 + $0x10] sm:$0xff] }
  0xd5   :  { %515 = vrot.lane.b32.xlu1 %v494_v6, %s1803_s21  ;;  %513 = vrot.lane.b32.xlu0 %v495_v11, %s1803_s21 }
  0xd9   :  { %384 = vrot.lane.b32.xlu1 %v363_v9, %s1802_s20  ;;  %382 = vrot.lane.b32.xlu0 %v364_v12, %s1802_s20 }
  0xdd   :  { %519 = vrot.lane.b32.xlu1 %v494_v6, %s1803_s21  ;;  %517 = vrot.lane.b32.xlu0 %v497_v13, %s1803_s21  ;;  %v690_v13 = vld [vmem:[%s2290_s4 + $0x18] sm:$0xff] }
  0xe1   :  { %388 = vrot.lane.b32.xlu1 %v363_v9, %s1802_s20  ;;  %386 = vrot.lane.b32.xlu0 %v366_v15, %s1802_s20 }
  0xe5   :  { %523 = vrot.lane.b32.xlu1 %v494_v6, %s1803_s21  ;;  %521 = vrot.lane.b32.xlu0 %v499_v16, %s1803_s21 }
  0xe9   :  { %392 = vrot.lane.b32.xlu1 %v363_v9, %s1802_s20  ;;  %390 = vrot.lane.b32.xlu0 %v368_v18, %s1802_s20  ;;  %v687_v9 = vld [vmem:[%s2290_s4] sm:$0xff] }
  0xed   :  { %576 = vrot.lane.b32.xlu1 %v559_v19, %s1801_s19  ;;  %574 = vrot.lane.b32.xlu0 %v558_v20, %s1801_s19 }
  0xef   :  { %v239_v21 = vpop.permute.xlu1 %238  ;;  %v241_v22 = vpop.permute.xlu0 %240 }
  0xf0   :  { %v255_v23 = vsel %vm254_vm0, %v239_v21, %v241_v22  ;;  %v694_v22 = vld [vmem:[%s2290_s4 + $0x38] sm:$0xff] }
  0xf1   :  { %580 = vrot.lane.b32.xlu1 %v559_v19, %s1801_s19  ;;  %1490 = vmatprep.subr.bf16.mxu0 %v255_v23 }
  0xf2   :  { %578 = vrot.lane.b32.xlu0 %v560_v24, %s1801_s19  ;;  %v695_v24 = vld [vmem:[%s2290_s4 + $0x40] sm:$0xff] }
  0xf3   :  { %v108_v25 = vpop.permute.xlu1 %107  ;;  %v110_v26 = vpop.permute.xlu0 %109 }
  0xf4   :  { %v124_v28 = vsel %vm123_vm1, %v108_v25, %v110_v26 }
  0xf5   :  { %584 = vrot.lane.b32.xlu1 %v559_v19, %s1801_s19  ;;  %1491 = vmatpush3.bf16.msra.mxu0 %v124_v28 }
  0xf6   :  { %582 = vrot.lane.b32.xlu0 %v562_v27, %s1801_s19  ;;  %v696_v27 = vld [vmem:[%s2290_s4 + $0x48] sm:$0xff] }
  0xf7   :  { %v243_v29 = vpop.permute.xlu1 %242  ;;  %v245_v30 = vpop.permute.xlu0 %244 }
  0xf8   :  { %v256_v32 = vsel %vm254_vm0, %v243_v29, %v245_v30 }
  0xf9   :  { %588 = vrot.lane.b32.xlu1 %v559_v19, %s1801_s19  ;;  %1492 = vmatprep.subr.bf16.mxu0 %v256_v32  ;;  %v693_v19 = vld [vmem:[%s2290_s4 + $0x30] sm:$0xff] }
  0xfa   :  { %586 = vrot.lane.b32.xlu0 %v564_v31, %s1801_s19  ;;  %v698_v31 = vld [vmem:[%s2290_s4 + $0x58] sm:$0xff] }
  0xfb   :  { %v112_v33 = vpop.permute.xlu1 %111  ;;  %v114_v35 = vpop.permute.xlu0 %113 }
  0xfc   :  { %v125_v36 = vsel %vm123_vm1, %v112_v33, %v114_v35  ;;  %v1679_v33 = vld [vmem:[%s2289_s3] ss:$20 sps:$4 sm:$0xff]  }
  0xfd   :  { %1493 = vmatpush3.bf16.msra.mxu0 %v125_v36  ;;  %v1682_v35 = vld [vmem:[%s2289_s3 + $0x2c] ss:$20 sps:$4 sm:$0xff]  }
  0xfe   :  { %705 = vperm.xlu0 %1673, %v687_v9  }
  0xff   :  { %v247_v37 = vpop.permute.xlu1 %246  ;;  %v249_v38 = vpop.permute.xlu0 %248 }
 0x100   :  { %v257_v39 = vsel %vm254_vm0, %v247_v37, %v249_v38  ;;  %v699_v38 = vld [vmem:[%s2290_s4 + $0x60] sm:$0xff] }
 0x101   :  { %1494 = vmatprep.subr.bf16.mxu0 %v257_v39  ;;  %v700_v39 = vld [vmem:[%s2290_s4 + $0x68] sm:$0xff] }
 0x102   :  { %720 = vperm.xlu0 %1673, %v690_v13  }
 0x103   :  { %v116_v40 = vpop.permute.xlu1 %115  ;;  %v118_v42 = vpop.permute.xlu0 %117 }
 0x104   :  { %v126_v43 = vsel %vm123_vm1, %v116_v40, %v118_v42 }
 0x105   :  { %1495 = vmatpush3.bf16.msra.mxu0 %v126_v43 }
 0x106   :  { %730 = vperm.xlu0 %1673, %v692_v17  }
 0x107   :  { %v251_v45 = vpop.permute.xlu1 %250  ;;  %v253_v46 = vpop.permute.xlu0 %252 }
 0x108   :  { %v258_v48 = vsel %vm254_vm0, %v251_v45, %v253_v46  ;;  %v701_v45 = vld [vmem:[%s2290_s4 + $0x70] sm:$0xff]  ;;  %v702_v46 = vld [vmem:[%s2290_s4 + $0x78] sm:$0xff] }
 0x109   :  { %1496 = vmatprep.subr.bf16.mxu0 %v258_v48 }
 0x10a   :  { %740 = vperm.xlu0 %1673, %v694_v22  }
 0x10b   :  { %v120_v49 = vpop.permute.xlu1 %119  ;;  %v122_v50 = vpop.permute.xlu0 %121 }
 0x10c   :  { %v127_v51 = vsel %vm123_vm1, %v120_v49, %v122_v50  ;;  %v1684_v49 = vld [vmem:[%s2289_s3 + $0x28] ss:$20 sps:$4 sm:$0xff]  }
 0x10d   :  { %1497 = vmatpush3.bf16.msra.mxu0 %v127_v51  ;;  %v1685_v50 = vld [vmem:[%s2289_s3 + $0x54] ss:$20 sps:$4 sm:$0xff]  }
 0x10e   :  { %750 = vperm.xlu0 %1673, %v696_v27  }
 0x10f   :  { %v444_v52 = vpop.permute.xlu1 %443  ;;  %v446_v53 = vpop.permute.xlu0 %445 }
 0x110   :  { %v460_v54 = vsel %vm459_vm2, %v444_v52, %v446_v53 }
 0x111   :  { %1554 = vmatprep.subr.bf16.mxu1 %v460_v54 }
 0x112   :  { %1555 = vmatpush3.bf16.msra.mxu1 %v1885_v34  ;;  %760 = vperm.xlu0 %1673, %v698_v31   ;;  %v1715_v31 = vld [vmem:[%s2289_s3 + $0xac] ss:$20 sps:$4 sm:$0xff]  }
 0x113   :  { %v305_v55 = vpop.permute.xlu1 %304  ;;  %v307_v56 = vpop.permute.xlu0 %306 }
 0x114   :  { %v321_v57 = vsel %vm320_vm3, %v305_v55, %v307_v56 }
 0x115   :  { %1498 = vmatprep.subr.bf16.mxu0 %v321_v57  ;;  %v1687_v57 = vld [vmem:[%s2289_s3 + $0x50] ss:$20 sps:$4 sm:$0xff]  }
 0x116   :  { %770 = vperm.xlu0 %1673, %v700_v39   ;;  %v1724_v39 = vld [vmem:[%s2289_s3 + $0x88] ss:$20 sps:$4 sm:$0xff]  }
 0x117   :  { %v174_v58 = vpop.permute.xlu1 %173  ;;  %v176_v59 = vpop.permute.xlu0 %175 }
 0x118   :  { %v190_v60 = vsel %vm189_vm4, %v174_v58, %v176_v59  ;;  %v1688_v58 = vld [vmem:[%s2289_s3 + $0x7c] ss:$20 sps:$4 sm:$0xff]  }
 0x119   :  { %1499 = vmatpush3.bf16.msra.mxu0 %v190_v60 }
 0x11a   :  { %780 = vperm.xlu0 %1673, %v702_v46   ;;  %v1731_v46 = vld [vmem:[%s2289_s3 + $0xb0] ss:$20 sps:$4 sm:$0xff]  }
 0x11b   :  { %v448_v61 = vpop.permute.xlu1 %447  ;;  %v450_v62 = vpop.permute.xlu0 %449 }
 0x11c   :  { %v461_v63 = vsel %vm459_vm2, %v448_v61, %v450_v62 }
 0x11d   :  { %1556 = vmatprep.subr.bf16.mxu1 %v461_v63 }
 0x11e   :  { %1557 = vmatpush3.bf16.msra.mxu1 %v1894_v41  ;;  %v688_v41 = vld [vmem:[%s2290_s4 + $0x8] sm:$0xff] }
 0x11f   :  { %v309_v0 = vpop.permute.xlu1 %308  ;;  %v311_v34 = vpop.permute.xlu0 %310  ;;  %710 = vperm.xlu1 %1674, %v688_v41   ;;  %v1696_v41 = vld [vmem:[%s2289_s3 + $0xa0] ss:$20 sps:$4 sm:$0xff]  }
 0x120   :  { %v322_v1 = vsel %vm320_vm3, %v309_v0, %v311_v34  ;;  %v1690_v34 = vld [vmem:[%s2289_s3 + $0x78] ss:$20 sps:$4 sm:$0xff]  }
 0x121   :  { %1500 = vmatprep.subr.bf16.mxu0 %v322_v1  ;;  %v1694_v1 = vld [vmem:[%s2289_s3 + $0xa4] ss:$20 sps:$4 sm:$0xff]  }
 0x123   :  { %v180_v2 = vpop.permute.xlu1 %179  ;;  %v178_v3 = vpop.permute.xlu0 %177  ;;  %715 = vperm.xlu1 %1674, %v689_v10  }
 0x124   :  { %v191_v4 = vsel %vm189_vm4, %v178_v3, %v180_v2 }
 0x125   :  { %1501 = vmatpush3.bf16.msra.mxu0 %v191_v4 }
 0x127   :  { %v454_v5 = vpop.permute.xlu1 %453  ;;  %v452_v6 = vpop.permute.xlu0 %451 }
 0x128   :  { %v462_v7 = vsel %vm459_vm2, %v452_v6, %v454_v5 }
 0x129   :  { %1558 = vmatprep.subr.bf16.mxu1 %v462_v7 }
 0x12a   :  { %1559 = vmatpush3.bf16.msra.mxu1 %v1905_v44  ;;  %v691_v44 = vld [vmem:[%s2290_s4 + $0x20] sm:$0xff] }
 0x12b   :  { %v315_v11 = vpop.permute.xlu1 %314  ;;  %v313_v12 = vpop.permute.xlu0 %312  ;;  %725 = vperm.xlu1 %1674, %v691_v44  }
 0x12c   :  { %v323_v14 = vsel %vm320_vm3, %v313_v12, %v315_v11  ;;  %v1697_v11 = vld [vmem:[%s2289_s3 + $0xcc] ss:$20 sps:$4 sm:$0xff]   ;;  %v1699_v12 = vld [vmem:[%s2289_s3 + $0x34] ss:$20 sps:$4 sm:$0xff]  }
 0x12d   :  { %1502 = vmatprep.subr.bf16.mxu0 %v323_v14 }
 0x12f   :  { %v184_v15 = vpop.permute.xlu1 %183  ;;  %v182_v16 = vpop.permute.xlu0 %181  ;;  %735 = vperm.xlu1 %1674, %v693_v19   ;;  %v1705_v19 = vld [vmem:[%s2289_s3 + $0x5c] ss:$20 sps:$4 sm:$0xff]  }
 0x130   :  { %v192_v18 = vsel %vm189_vm4, %v182_v16, %v184_v15  ;;  %v1701_v15 = vld [vmem:[%s2289_s3 + $0xc8] ss:$20 sps:$4 sm:$0xff]   ;;  %v1702_v16 = vld [vmem:[%s2289_s3 + $0x30] ss:$20 sps:$4 sm:$0xff]  }
 0x131   :  { %1503 = vmatpush3.bf16.msra.mxu0 %v192_v18  ;;  %v1703_v18 = vld [vmem:[%s2289_s3 + $0xf4] ss:$20 sps:$4 sm:$0xff]  }
 0x133   :  { %v458_v20 = vpop.permute.xlu1 %457  ;;  %v456_v21 = vpop.permute.xlu0 %455  ;;  %745 = vperm.xlu1 %1674, %v695_v24  }
 0x134   :  { %v463_v23 = vsel %vm459_vm2, %v456_v21, %v458_v20 }
 0x135   :  { %1560 = vmatprep.subr.bf16.mxu1 %v463_v23 }
 0x136   :  { %1561 = vmatpush3.bf16.msra.mxu1 %v1916_v47  ;;  %v697_v47 = vld [vmem:[%s2290_s4 + $0x50] sm:$0xff] }
 0x137   :  { %v319_v25 = vpop.permute.xlu1 %318  ;;  %v317_v26 = vpop.permute.xlu0 %316  ;;  %755 = vperm.xlu1 %1674, %v697_v47   ;;  %v1711_v47 = vld [vmem:[%s2289_s3 + $0x84] ss:$20 sps:$4 sm:$0xff]  }
 0x138   :  { %v324_v28 = vsel %vm320_vm3, %v317_v26, %v319_v25  ;;  %v1707_v25 = vld [vmem:[%s2289_s3 + $0xf0] ss:$20 sps:$4 sm:$0xff]   ;;  %v1708_v26 = vld [vmem:[%s2289_s3 + $0x58] ss:$20 sps:$4 sm:$0xff]  }
 0x139   :  { %1504 = vmatprep.subr.bf16.mxu0 %v324_v28  ;;  %v1709_v28 = vld [vmem:[%s2289_s3 + $0x11c] ss:$20 sps:$4 sm:$0xff]  }
 0x13b   :  { %v188_v29 = vpop.permute.xlu1 %187  ;;  %v186_v30 = vpop.permute.xlu0 %185  ;;  %765 = vperm.xlu1 %1674, %v699_v38   ;;  %v1723_v38 = vld [vmem:[%s2289_s3 + $0xd0] ss:$20 sps:$4 sm:$0xff]  }
 0x13c   :  { %v193_v32 = vsel %vm189_vm4, %v186_v30, %v188_v29  ;;  %v1713_v29 = vld [vmem:[%s2289_s3 + $0x118] ss:$20 sps:$4 sm:$0xff]   ;;  %v1714_v30 = vld [vmem:[%s2289_s3 + $0x80] ss:$20 sps:$4 sm:$0xff]  }
 0x13d   :  { %1505 = vmatpush3.bf16.msra.mxu0 %v193_v32  ;;  %v1717_v32 = vld [vmem:[%s2289_s3 + $0x10] ss:$20 sps:$4 sm:$0xff]  }
 0x13f   :  { %v512_v36 = vpop.permute.xlu1 %511  ;;  %v510_v37 = vpop.permute.xlu0 %509  ;;  %775 = vperm.xlu1 %1674, %v701_v45   ;;  %v1730_v45 = vld [vmem:[%s2289_s3 + $0x120] ss:$20 sps:$4 sm:$0xff]  }
 0x140   :  { %1041 = vmatmul.mubr.bf16.vlgmr.msra.gmra.mrb[0].mxu0 %v1679_v33  ;;  %v526_v40 = vsel %vm525_vm5, %v510_v37, %v512_v36  ;;  %v1718_v33 = vld [vmem:[%s2289_s3 + $0xa8] ss:$20 sps:$4 sm:$0xff]   ;;  %v1722_v37 = vld [vmem:[%s2289_s3 + $0x60] ss:$20 sps:$4 sm:$0xff]  }
 0x141   :  { %1562 = vmatprep.subr.bf16.mxu1 %v526_v40  ;;  %1048 = vmatprep.mubr.bf16.mxu0 %v1682_v35  ;;  %v1719_v35 = vld [vmem:[%s2289_s3 + $0x38] ss:$20 sps:$4 sm:$0xff]   ;;  %v1720_v36 = vld [vmem:[%s2289_s3 + $0xd4] ss:$20 sps:$4 sm:$0xff]   ;;  %v1725_v40 = vld [vmem:[%s2289_s3 + $0xfc] ss:$20 sps:$4 sm:$0xff]  }
 0x143   :  { %v381_v42 = vpop.permute.xlu1 %380  ;;  %v379_v43 = vpop.permute.xlu0 %378 }
 0x144   :  { %v395_v48 = vsel %vm394_vm6, %v379_v43, %v381_v42  ;;  %v1727_v42 = vld [vmem:[%s2289_s3 + $0xf8] ss:$20 sps:$4 sm:$0xff]  }
 0x145   :  { %1563 = vmatpush3.bf16.msra.mxu1 %v395_v48  ;;  %v1728_v43 = vld [vmem:[%s2289_s3 + $0x124] ss:$20 sps:$4 sm:$0xff]  }
 0x146   :  { %v1732_v48 = vld [vmem:[%s2289_s3 + $0xd8] ss:$20 sps:$4 sm:$0xff]  }
 0x147   :  { %v516_v51 = vpop.permute.xlu1 %515  ;;  %v514_v52 = vpop.permute.xlu0 %513 }
 0x148   :  { %1049 = vmatmul.mubr.bf16.gmra.mrb[4].mxu0 %v1684_v49  ;;  %v527_v53 = vsel %vm525_vm5, %v514_v52, %v516_v51  ;;  %v1733_v49 = vld [vmem:[%s2289_s3 + $0x100] ss:$20 sps:$4 sm:$0xff]  }
 0x149   :  { %1564 = vmatprep.subr.bf16.mxu1 %v527_v53  ;;  %1056 = vmatprep.mubr.bf16.mxu0 %v1685_v50  ;;  %v1734_v50 = vld [vmem:[%s2289_s3 + $0x128] ss:$20 sps:$4 sm:$0xff]  }
 0x14b   :  { %v385_v54 = vpop.permute.xlu1 %384  ;;  %v383_v55 = vpop.permute.xlu0 %382 }
 0x14c   :  { %v396_v56 = vsel %vm394_vm6, %v383_v55, %v385_v54 }
 0x14d   :  { %1565 = vmatpush3.bf16.msra.mxu1 %v396_v56 }
 0x14f   :  { %v520_v59 = vpop.permute.xlu1 %519  ;;  %v518_v60 = vpop.permute.xlu0 %517 }
 0x150   :  { %1057 = vmatmul.mubr.bf16.gmra.mrb[8].mxu0 %v1687_v57  ;;  %v528_v61 = vsel %vm525_vm5, %v518_v60, %v520_v59 }
 0x151   :  { %1566 = vmatprep.subr.bf16.mxu1 %v528_v61  ;;  %1064 = vmatprep.mubr.bf16.mxu0 %v1688_v58 }
 0x153   :  { %v389_v62 = vpop.permute.xlu1 %388  ;;  %v387_v63 = vpop.permute.xlu0 %386 }
 0x154   :  { %v397_v0 = vsel %vm394_vm6, %v387_v63, %v389_v62 }
 0x155   :  { %1567 = vmatpush3.bf16.msra.mxu1 %v397_v0 }
 0x157   :  { %v524_v2 = vpop.permute.xlu1 %523  ;;  %v522_v3 = vpop.permute.xlu0 %521 }
 0x158   :  { %1065 = vmatmul.mubr.bf16.gmra.mrb[12].mxu0 %v1690_v34  ;;  %v529_v4 = vsel %vm525_vm5, %v522_v3, %v524_v2 }
 0x159   :  { %1568 = vmatprep.subr.bf16.mxu1 %v529_v4  ;;  %1072 = vmatprep.mubr.bf16.mxu0 %v1694_v1 }
 0x15b   :  { %v393_v5 = vpop.permute.xlu1 %392  ;;  %v391_v6 = vpop.permute.xlu0 %390 }
 0x15c   :  { %v398_v7 = vsel %vm394_vm6, %v391_v6, %v393_v5 }
 0x15d   :  { %1569 = vmatpush3.bf16.msra.mxu1 %v398_v7 }
 0x15f   :  { %v577_v9 = vpop.permute.xlu1 %576  ;;  %v575_v10 = vpop.permute.xlu0 %574 }
 0x160   :  { %v591_v13 = vsel %vm590_vm7, %v575_v10, %v577_v9  ;;  %1073 = vmatmul.mubr.bf16.gmra.mrb[16].mxu0 %v1696_v41  ;;  %1138 = vmatmul.mubr.bf16.vlgmr.msra.gmra.mrb[0].mxu1 %v1691_v8 }
 0x161   :  { %1630 = vmatprep.subr.bf16.mxu0 %v591_v13  ;;  %1654 = vmatprep.subr.bf16.mxu1 %v591_v13 }
 0x162   :  { %1631 = vmatpush3.bf16.msra.mxu0 %v591_v13  ;;  %1658 = vmatpush3.bf16.msra.mxu1 %v591_v13 }
 0x163   :  { %v581_v14 = vpop.permute.xlu1 %580  ;;  %1080 = vmatprep.mubr.bf16.mxu0 %v1697_v11  ;;  %1145 = vmatprep.mubr.bf16.mxu1 %v1699_v12 }
 0x164   :  { %v579_v44 = vpop.permute.xlu0 %578 }
 0x165   :  { %v592_v17 = vsel %vm590_vm7, %v579_v44, %v581_v14 }
 0x166   :  { %1632 = vmatprep.subr.bf16.mxu0 %v592_v17  ;;  %1655 = vmatprep.subr.bf16.mxu1 %v592_v17 }
 0x167   :  { %1633 = vmatpush3.bf16.msra.mxu0 %v592_v17  ;;  %1659 = vmatpush3.bf16.msra.mxu1 %v592_v17  ;;  %v585_v20 = vpop.permute.xlu1 %584 }
 0x168   :  { %v583_v21 = vpop.permute.xlu0 %582  ;;  %1081 = vmatmul.mubr.bf16.gmra.mrb[20].mxu0 %v1701_v15  ;;  %1146 = vmatmul.mubr.bf16.gmra.mrb[4].mxu1 %v1702_v16 }
 0x169   :  { %v593_v22 = vsel %vm590_vm7, %v583_v21, %v585_v20  ;;  %1088 = vmatprep.mubr.bf16.mxu0 %v1703_v18  ;;  %1153 = vmatprep.mubr.bf16.mxu1 %v1705_v19 }
 0x16a   :  { %1634 = vmatprep.subr.bf16.mxu0 %v593_v22  ;;  %1656 = vmatprep.subr.bf16.mxu1 %v593_v22 }
 0x16b   :  { %1635 = vmatpush3.bf16.msra.mxu0 %v593_v22  ;;  %1660 = vmatpush3.bf16.msra.mxu1 %v593_v22  ;;  %v589_v23 = vpop.permute.xlu1 %588 }
 0x16c   :  { %v587_v24 = vpop.permute.xlu0 %586 }
 0x16d   :  { %v594_v27 = vsel %vm590_vm7, %v587_v24, %v589_v23 }
 0x16e   :  { %1636 = vmatprep.subr.bf16.mxu0 %v594_v27  ;;  %1657 = vmatprep.subr.bf16.mxu1 %v594_v27 }
 0x16f   :  { %1637 = vmatpush3.bf16.msra.mxu0 %v594_v27  ;;  %1661 = vmatpush3.bf16.msra.mxu1 %v594_v27 }
 0x170   :  { %1089 = vmatmul.mubr.bf16.gmra.mrb[24].mxu0 %v1707_v25  ;;  %1154 = vmatmul.mubr.bf16.gmra.mrb[8].mxu1 %v1708_v26 }
 0x171   :  { %1096 = vmatprep.mubr.bf16.mxu0 %v1709_v28  ;;  %1161 = vmatprep.mubr.bf16.mxu1 %v1711_v47 }
 0x178   :  { %1097 = vmatmul.mubr.bf16.gmra.mrb[28].mxu0 %v1713_v29  ;;  %1162 = vmatmul.mubr.bf16.gmra.mrb[12].mxu1 %v1714_v30 }
 0x179   :  { %1169 = vmatprep.mubr.bf16.mxu1 %v1715_v31  ;;  %1638 = vmatprep.mubr.msk.bf16.mxu0 %vm983_vm8, %v1717_v32 }
 0x17d   :  { %v706_v10 = vpop.permute.xlu0 %705 }
 0x180   :  { %1170 = vmatmul.mubr.bf16.gmra.mrb[16].mxu1 %v1718_v33  ;;  %1639 = vmatmul.mubr.msk.bf16.vlgmr.msra.gmra.mrb[32].mxu0 %vm983_vm8, %v1719_v35 }
 0x181   :  { %1177 = vmatprep.mubr.bf16.mxu1 %v1720_v36  ;;  %1642 = vmatprep.mubr.msk.bf16.mxu0 %vm983_vm8, %v1722_v37  ;;  %v721_v27 = vpop.permute.xlu0 %720 }
 0x188   :  { %1178 = vmatmul.mubr.bf16.gmra.mrb[20].mxu1 %v1723_v38  ;;  %1643 = vmatmul.mubr.msk.bf16.gmra.mrb[36].mxu0 %vm983_vm8, %v1724_v39 }
 0x189   :  { %1185 = vmatprep.mubr.bf16.mxu1 %v1725_v40 }
 0x190   :  { %1186 = vmatmul.mubr.bf16.gmra.mrb[24].mxu1 %v1727_v42 }
 0x191   :  { %1193 = vmatprep.mubr.bf16.mxu1 %v1728_v43 }
 0x198   :  { %1194 = vmatmul.mubr.bf16.gmra.mrb[28].mxu1 %v1730_v45 }
 0x199   :  { %1646 = vmatprep.mubr.msk.bf16.mxu1 %vm983_vm8, %v1731_v46 }
 0x19e   :  { %v711_v9 = vpop.permute.xlu1 %710 }
 0x1a0   :  { %1647 = vmatmul.mubr.msk.bf16.vlgmr.msra.gmra.mrb[32].mxu1 %vm983_vm8, %v1732_v48  ;;  %v731_v48 = vpop.permute.xlu0 %730 }
 0x1a1   :  { %1650 = vmatprep.mubr.msk.bf16.mxu1 %vm983_vm8, %v1733_v49 }
 0x1a2   :  { %v716_v26 = vpop.permute.xlu1 %715 }
 0x1a8   :  { %1651 = vmatmul.mubr.msk.bf16.gmra.mrb[36].mxu1 %vm983_vm8, %v1734_v50 }
 0x1aa   :  { %v726_v46 = vpop.permute.xlu1 %725 }
 0x213   :  { %v1506_v51 = vpop.f32.mrb[0].mxu0 }
 0x214   :  { %v1507_v52 = vpop.f32.mrb[1].mxu0 }
 0x215   :  { %v1508_v53 = vadd.f32 %v1507_v52, %v1506_v51  ;;  %v1509_v54 = vpop.f32.mrb[2].mxu0 }
 0x216   :  { %v1510_v55 = vpop.f32.mrb[3].mxu0 }
 0x217   :  { %v1511_v56 = vadd.f32 %v1510_v55, %v1509_v54  ;;  %v1043_v16 = vadd.f32 %v1508_v53, %v706_v10 }
 0x219   :  { %v1046_v21 = vadd.f32 %v1511_v56, %v711_v9 }
 0x21b   :  { %v1512_v57 = vpop.f32.mrb[4].mxu0 }
 0x21c   :  { %v1513_v58 = vpop.f32.mrb[5].mxu0 }
 0x21d   :  { %v1514_v59 = vadd.f32 %v1513_v58, %v1512_v57  ;;  %v1515_v60 = vpop.f32.mrb[6].mxu0 }
 0x21e   :  { %v1516_v61 = vpop.f32.mrb[7].mxu0 }
 0x21f   :  { %v1517_v62 = vadd.f32 %v1516_v61, %v1515_v60  ;;  %v1051_v33 = vadd.f32 %v1514_v59, %v716_v26 }
 0x221   :  { %v1054_v40 = vadd.f32 %v1517_v62, %v721_v27 }
 0x223   :  { %v1518_v63 = vpop.f32.mrb[8].mxu0 }
 0x224   :  { %v1519_v0 = vpop.f32.mrb[9].mxu0 }
 0x225   :  { %v1520_v34 = vadd.f32 %v1519_v0, %v1518_v63  ;;  %v1521_v1 = vpop.f32.mrb[10].mxu0 }
 0x226   :  { %v1522_v2 = vpop.f32.mrb[11].mxu0 }
 0x227   :  { %v1523_v3 = vadd.f32 %v1522_v2, %v1521_v1  ;;  %v1059_v55 = vadd.f32 %v1520_v34, %v726_v46  ;;  %v736_v1 = vpop.permute.xlu1 %735  ;;  %v741_v2 = vpop.permute.xlu0 %740 }
 0x229   :  { %v1062_v61 = vadd.f32 %v1523_v3, %v731_v48 }
 0x22b   :  { %v1524_v4 = vpop.f32.mrb[12].mxu0 }
 0x22c   :  { %v1525_v5 = vpop.f32.mrb[13].mxu0 }
 0x22d   :  { %v2210_v6 = vadd.f32 %v1525_v5, %v1524_v4  ;;  %v1527_v7 = vpop.f32.mrb[14].mxu0 }
 0x22e   :  { %v1528_v8 = vpop.f32.mrb[15].mxu0 }
 0x22f   :  { %v2212_v41 = vadd.f32 %v1528_v8, %v1527_v7  ;;  %v1067_v34 = vadd.f32 %v2210_v6, %v736_v1 }
 0x233   :  { %v1570_v11 = vpop.f32.mrb[0].mxu1  ;;  %v1530_v12 = vpop.f32.mrb[16].mxu0 }
 0x234   :  { %v1571_v13 = vpop.f32.mrb[1].mxu1  ;;  %v1531_v14 = vpop.f32.mrb[17].mxu0 }
 0x235   :  { %v1572_v44 = vadd.f32 %v1571_v13, %v1570_v11  ;;  %v1573_v15 = vpop.f32.mrb[2].mxu1  ;;  %v2214_v17 = vadd.f32 %v1531_v14, %v1530_v12  ;;  %v1533_v18 = vpop.f32.mrb[18].mxu0 }
 0x236   :  { %v1574_v19 = vpop.f32.mrb[3].mxu1  ;;  %v1534_v20 = vpop.f32.mrb[19].mxu0 }
 0x237   :  { %v1575_v22 = vadd.f32 %v1574_v19, %v1573_v15  ;;  %v2216_v23 = vadd.f32 %v1534_v20, %v1533_v18  ;;  %v2218_v24 = vadd.f32 %v1572_v44, %v1043_v16  ;;  %v1070_v44 = vadd.f32 %v2212_v41, %v741_v2  ;;  %v746_v19 = vpop.permute.xlu1 %745  ;;  %v751_v20 = vpop.permute.xlu0 %750 }
 0x239   :  { %v2220_v25 = vadd.f32 %v1575_v22, %v1046_v21 }
 0x23b   :  { %v1576_v28 = vpop.f32.mrb[4].mxu1  ;;  %v1536_v47 = vpop.f32.mrb[20].mxu0 }
 0x23c   :  { %v1577_v29 = vpop.f32.mrb[5].mxu1  ;;  %v1537_v30 = vpop.f32.mrb[21].mxu0 }
 0x23d   :  { %v1578_v31 = vadd.f32 %v1577_v29, %v1576_v28  ;;  %v1579_v32 = vpop.f32.mrb[6].mxu1  ;;  %v2222_v35 = vadd.f32 %v1537_v30, %v1536_v47  ;;  %v1539_v36 = vpop.f32.mrb[22].mxu0 }
 0x23e   :  { %v1580_v37 = vpop.f32.mrb[7].mxu1  ;;  %v1540_v38 = vpop.f32.mrb[23].mxu0 }
 0x23f   :  { %v1581_v39 = vadd.f32 %v1580_v37, %v1579_v32  ;;  %v2224_v42 = vadd.f32 %v1540_v38, %v1539_v36  ;;  %v1148_v43 = vadd.f32 %v1578_v31, %v1051_v33  ;;  %v1075_v31 = vadd.f32 %v2214_v17, %v746_v19  ;;  %v761_v46 = vpop.permute.xlu0 %760 }
 0x240   :  { %v1078_v38 = vadd.f32 %v2216_v23, %v751_v20 }
 0x241   :  { %v1151_v45 = vadd.f32 %v1581_v39, %v1054_v40 }
 0x243   :  { %v1582_v49 = vpop.f32.mrb[8].mxu1  ;;  %v1542_v50 = vpop.f32.mrb[24].mxu0 }
 0x244   :  { %v1583_v51 = vpop.f32.mrb[9].mxu1  ;;  %v1543_v52 = vpop.f32.mrb[25].mxu0 }
 0x245   :  { %v1584_v53 = vadd.f32 %v1583_v51, %v1582_v49  ;;  %v1585_v54 = vpop.f32.mrb[10].mxu1  ;;  %v2226_v56 = vadd.f32 %v1543_v52, %v1542_v50  ;;  %v1545_v57 = vpop.f32.mrb[26].mxu0 }
 0x246   :  { %v1586_v58 = vpop.f32.mrb[11].mxu1  ;;  %v1546_v59 = vpop.f32.mrb[27].mxu0 }
 0x247   :  { %v1587_v60 = vadd.f32 %v1586_v58, %v1585_v54  ;;  %v2228_v62 = vadd.f32 %v1546_v59, %v1545_v57  ;;  %v1156_v63 = vadd.f32 %v1584_v53, %v1059_v55  ;;  %v1086_v59 = vadd.f32 %v2224_v42, %v761_v46 }
 0x249   :  { %v1159_v0 = vadd.f32 %v1587_v60, %v1062_v61 }
 0x24b   :  { %v1588_v4 = vpop.f32.mrb[12].mxu1  ;;  %v1548_v5 = vpop.f32.mrb[28].mxu0 }
 0x24c   :  { %v1589_v7 = vpop.f32.mrb[13].mxu1  ;;  %v1549_v8 = vpop.f32.mrb[29].mxu0 }
 0x24d   :  { %v1590_v9 = vadd.f32 %v1589_v7, %v1588_v4  ;;  %v1591_v10 = vpop.f32.mrb[14].mxu1  ;;  %v2231_v11 = vadd.f32 %v1549_v8, %v1548_v5  ;;  %v1551_v12 = vpop.f32.mrb[30].mxu0 }
 0x24e   :  { %v1592_v13 = vpop.f32.mrb[15].mxu1  ;;  %v1552_v14 = vpop.f32.mrb[31].mxu0 }
 0x24f   :  { %v1593_v3 = vadd.f32 %v1592_v13, %v1591_v10  ;;  %v2234_v15 = vadd.f32 %v1552_v14, %v1551_v12  ;;  %v1164_v16 = vadd.f32 %v1590_v9, %v1067_v34  ;;  %v771_v5 = vpop.permute.xlu0 %770 }
 0x251   :  { %v1167_v18 = vadd.f32 %v1593_v3, %v1070_v44 }
 0x253   :  { %v1640_v21 = vpop.f32.mrb[32].mxu0  ;;  %v1594_v22 = vpop.f32.mrb[16].mxu1 }
 0x254   :  { %v1245_v26 = vadd.f32 %v1640_v21, %v1148_v43  ;;  %v1236_v27 = vpop.f32.mrb[33].mxu0  ;;  %v1595_v28 = vpop.f32.mrb[17].mxu1 }
 0x255   :  { %v1237_v6 = vadd.f32 %v1236_v27, %v2218_v24  ;;  %v1596_v47 = vadd.f32 %v1595_v28, %v1594_v22  ;;  %v1641_v29 = vpop.f32.mrb[34].mxu0  ;;  %v1597_v30 = vpop.f32.mrb[18].mxu1 }
 0x256   :  { %v1248_v32 = vadd.f32 %v1641_v29, %v1151_v45  ;;  %v1239_v41 = vpop.f32.mrb[35].mxu0  ;;  %v1598_v33 = vpop.f32.mrb[19].mxu1  ;;  %v1301_v7 = vmul.f32 0.5, %v1245_v26 }
 0x257   :  { %v1240_v36 = vadd.f32 %v1239_v41, %v2220_v25  ;;  %v1599_v37 = vadd.f32 %v1598_v33, %v1597_v30  ;;  %v2240_v39 = vadd.f32 %v1596_v47, %v1075_v31  ;;  %v756_v43 = vpop.permute.xlu1 %755  ;;  %v1299_v10 = vmul.f32 0.5, %v1237_v6  ;;  %v781_v20 = vpop.permute.xlu0 %780 }
 0x258   :  { %v1083_v25 = vadd.f32 %v2222_v35, %v756_v43  ;;  %v1302_v34 = vmul.f32 0.5, %v1248_v32  ;;  %1735 = vtanh.f32 %v1301_v7  ;;  %v1102_v6 = vadd.f32 %v2234_v15, %v781_v20 }
 0x259   :  { %v2242_v40 = vadd.f32 %v1599_v37, %v1078_v38  ;;  %1737 = vtanh.f32 %v1299_v10  ;;  %v1300_v21 = vmul.f32 0.5, %v1240_v36 }
 0x25a   :  { %1739 = vtanh.f32 %v1302_v34 }
 0x25b   :  { %v1644_v24 = vpop.f32.mrb[36].mxu0  ;;  %v1600_v48 = vpop.f32.mrb[20].mxu1 }
 0x25c   :  { %v1261_v49 = vadd.f32 %v1644_v24, %v1164_v16  ;;  %v1252_v50 = vpop.f32.mrb[37].mxu0  ;;  %v1601_v51 = vpop.f32.mrb[21].mxu1 }
 0x25d   :  { %v1253_v17 = vadd.f32 %v1252_v50, %v1156_v63  ;;  %v1602_v45 = vadd.f32 %v1601_v51, %v1600_v48  ;;  %v1645_v52 = vpop.f32.mrb[38].mxu0  ;;  %v1603_v53 = vpop.f32.mrb[22].mxu1 }
 0x25e   :  { %v1264_v54 = vadd.f32 %v1645_v52, %v1167_v18  ;;  %v1255_v55 = vpop.f32.mrb[39].mxu0  ;;  %v1604_v23 = vpop.f32.mrb[23].mxu1  ;;  %v1317_v14 = vmul.f32 0.5, %v1261_v49 }
 0x25f   :  { %v1256_v57 = vadd.f32 %v1255_v55, %v1159_v0  ;;  %v1605_v58 = vadd.f32 %v1604_v23, %v1603_v53  ;;  %v1180_v60 = vadd.f32 %v1602_v45, %v1083_v25  ;;  %v766_v1 = vpop.permute.xlu1 %765  ;;  %v1094_v0 = vadd.f32 %v2228_v62, %v771_v5 }
 0x260   :  { %v1091_v9 = vadd.f32 %v2226_v56, %v766_v1  ;;  %v1315_v42 = vmul.f32 0.5, %v1253_v17  ;;  %v1318_v44 = vmul.f32 0.5, %v1264_v54  ;;  %1741 = vtanh.f32 %v1317_v14 }
 0x261   :  { %v1183_v61 = vadd.f32 %v1605_v58, %v1086_v59  ;;  %v1316_v18 = vmul.f32 0.5, %v1256_v57 }
 0x262   :  { %1743 = vtanh.f32 %v1315_v42  ;;  %v1736_v30 = vpop.eup %1735 }
 0x263   :  { %v1606_v2 = vpop.f32.mrb[24].mxu1  ;;  %v776_v16 = vpop.permute.xlu1 %775  ;;  %1745 = vtanh.f32 %v1318_v44  ;;  %v1309_v50 = vmul.f32 0.5, %v1736_v30  ;;  %v1352_v44 = vld [vmem:[%s2288_s2 + $0x8] sm:$0xff] }
 0x264   :  { %v1607_v4 = vpop.f32.mrb[25].mxu1  ;;  %v1099_v62 = vadd.f32 %v2231_v11, %v776_v16  ;;  %1747 = vtanh.f32 %v1316_v18  ;;  %v1738_v32 = vpop.eup %1737 }
 0x265   :  { %v1608_v63 = vadd.f32 %v1607_v4, %v1606_v2  ;;  %v1609_v8 = vpop.f32.mrb[26].mxu1  ;;  %1749 = vtanh.f32 %v1300_v21  ;;  %v1740_v36 = vpop.eup %1739  ;;  %v1307_v52 = vmul.f32 0.5, %v1738_v32  ;;  %v1313_v57 = vadd.f32 0.5, %v1309_v50 }
 0x266   :  { %v1610_v35 = vpop.f32.mrb[27].mxu1  ;;  %v1310_v25 = vmul.f32 0.5, %v1740_v36 }
 0x267   :  { %v1611_v12 = vadd.f32 %v1610_v35, %v1609_v8  ;;  %v1188_v13 = vadd.f32 %v1608_v63, %v1091_v9  ;;  %v1311_v7 = vadd.f32 0.5, %v1307_v52  ;;  %v1351_v63 = vld [vmem:[%s2288_s2] sm:$0xff] }
 0x268   :  { %v1314_v34 = vadd.f32 0.5, %v1310_v25 }
 0x269   :  { %v2248_v3 = vadd.f32 %v1611_v12, %v1094_v0  ;;  %v1354_v12 = vld [vmem:[%s2288_s2 + $0x18] sm:$0xff] }
 0x26a   :  { %v1742_v43 = vpop.eup %1741 }
 0x26b   :  { %v1612_v19 = vpop.f32.mrb[28].mxu1  ;;  %v1325_v51 = vmul.f32 0.5, %v1742_v43 }
 0x26c   :  { %v1613_v56 = vpop.f32.mrb[29].mxu1  ;;  %v1744_v24 = vpop.eup %1743 }
 0x26d   :  { %v1614_v22 = vadd.f32 %v1613_v56, %v1612_v19  ;;  %v1615_v26 = vpop.f32.mrb[30].mxu1  ;;  %v1746_v48 = vpop.eup %1745  ;;  %v1323_v17 = vmul.f32 0.5, %v1744_v24  ;;  %v1329_v58 = vadd.f32 0.5, %v1325_v51 }
 0x26e   :  { %v1616_v27 = vpop.f32.mrb[31].mxu1  ;;  %v1748_v49 = vpop.eup %1747  ;;  %v1326_v53 = vmul.f32 0.5, %v1746_v48 }
 0x26f   :  { %v1617_v28 = vadd.f32 %v1616_v27, %v1615_v26  ;;  %v1196_v47 = vadd.f32 %v1614_v22, %v1099_v62  ;;  %v1750_v45 = vpop.eup %1749  ;;  %v1324_v54 = vmul.f32 0.5, %v1748_v49  ;;  %v1327_v1 = vadd.f32 0.5, %v1323_v17 }
 0x270   :  { %v1330_v8 = vadd.f32 0.5, %v1326_v53 }
 0x271   :  { %v1199_v29 = vadd.f32 %v1617_v28, %v1102_v6  ;;  %v1328_v0 = vadd.f32 0.5, %v1324_v54  ;;  %v1355_v56 = vmul.f32 %v1351_v63, %v1327_v1 }
 0x272   :  { %v1358_v22 = vmul.f32 %v1354_v12, %v1330_v8 }
 0x273   :  { %v1648_v31 = vpop.f32.mrb[32].mxu1  ;;  %v1356_v27 = vmul.f32 %v1352_v44, %v1328_v0 }
 0x274   :  { %v1277_v41 = vadd.f32 %v1648_v31, %v1180_v60  ;;  %v1268_v33 = vpop.f32.mrb[33].mxu1 }
 0x275   :  { %v1269_v37 = vadd.f32 %v1268_v33, %v2240_v39  ;;  %v1649_v38 = vpop.f32.mrb[34].mxu1 }
 0x276   :  { %1751 = vtanh.f32 %v1277_v41  ;;  %v1280_v11 = vadd.f32 %v1649_v38, %v1183_v61  ;;  %v1271_v46 = vpop.f32.mrb[35].mxu1  ;;  %v1353_v61 = vld [vmem:[%s2288_s2 + $0x10] sm:$0xff]  ;;  %s1775_s2 = scalar_lea.vmem %s1407_s24, 512 }
 0x277   :  { %1753 = vtanh.f32 %v1269_v37  ;;  %v1272_v15 = vadd.f32 %v1271_v46, %v2242_v40  ;;  %v1308_v40 = vmul.f32 0.5, %v1750_v45  ;;  %v1357_v42 = vmul.f32 %v1353_v61, %v1329_v58  ;;  %p1776_p0 = scmp.ne.s32.totalorder %s1407_s24, %s1775_s2  ;;  %p1781_p2 = scmp.lt.s32.totalorder %s1775_s2, %s1775_s2 }
 0x278   :  { %1755 = vtanh.f32 %v1280_v11 }
 0x279   :  { %1757 = vtanh.f32 %v1272_v15  ;;  %p1782_p3 = por %p1781_p2, %p1780_p1 }
 0x27b   :  { %v1652_v39 = vpop.f32.mrb[36].mxu1  ;;  %p1783_p4 = pnand %p1782_p3, %p1776_p0 }
 0x27c   :  { %v1293_v55 = vadd.f32 %v1652_v39, %v1196_v47  ;;  %v1284_v23 = vpop.f32.mrb[37].mxu1 }
 0x27d   :  { %v1285_v59 = vadd.f32 %v1284_v23, %v1188_v13  ;;  %v1653_v60 = vpop.f32.mrb[38].mxu1 }
 0x27e   :  { %v1337_v2 = vmul.f32 0.5, %v1293_v55  ;;  %v1296_v4 = vadd.f32 %v1653_v60, %v1199_v29  ;;  %v1287_v5 = vpop.f32.mrb[39].mxu1 }
 0x27f   :  { %v1335_v9 = vmul.f32 0.5, %v1285_v59  ;;  %v1288_v10 = vadd.f32 %v1287_v5, %v2248_v3  ;;  %v1312_v3 = vadd.f32 0.5, %v1308_v40 }
 0x280   :  { %v1752_v35 = vpop.eup %1751  ;;  %1759 = vtanh.f32 %v1337_v2  ;;  %v1338_v13 = vmul.f32 0.5, %v1296_v4 }
 0x281   :  { %v1754_v14 = vpop.eup %1753  ;;  %v1361_v16 = vmul.f32 %v1752_v35, %v1313_v57  ;;  %1761 = vtanh.f32 %v1335_v9  ;;  %v1336_v18 = vmul.f32 0.5, %v1288_v10 }
 0x282   :  { %v1756_v19 = vpop.eup %1755  ;;  %v1359_v20 = vmul.f32 %v1754_v14, %v1311_v7  ;;  %1763 = vtanh.f32 %v1338_v13 }
 0x283   :  { %v1758_v21 = vpop.eup %1757  ;;  %v1365_v26 = vadd.f32 %v1361_v16, %v1357_v42  ;;  %v1362_v62 = vmul.f32 %v1756_v19, %v1314_v34  ;;  %1765 = vtanh.f32 %v1336_v18 }
 0x284   :  { %v1363_v28 = vadd.f32 %v1359_v20, %v1355_v56  ;;  %v1360_v6 = vmul.f32 %v1758_v21, %v1312_v3 }
 0x285   :  { %1767 = vtanh.f32 %v1365_v26  ;;  %1397 = vst [vmem:[#allocation4 + $0x10] sm:$0xff] %v1365_v26  ;;  %v1366_v47 = vadd.f32 %v1362_v62, %v1358_v22 }
 0x286   :  { %1769 = vtanh.f32 %v1363_v28  ;;  %1395 = vst [vmem:[#allocation4] sm:$0xff] %v1363_v28  ;;  %v1364_v29 = vadd.f32 %v1360_v6, %v1356_v27 }
 0x287   :  { %1771 = vtanh.f32 %v1366_v47  ;;  %1398 = vst [vmem:[#allocation4 + $0x18] sm:$0xff] %v1366_v47 }
 0x288   :  { %1773 = vtanh.f32 %v1364_v29  ;;  %1396 = vst [vmem:[#allocation4 + $0x8] sm:$0xff] %v1364_v29 }
 0x289   :  { %1786 = shalt.err (!%p1783_p4)
}
 0x28a   :  { %s1787_s26 = scalar_lea.hbm %s2293_s7, 512 }
 0x28b   :  { %p1788_p5 = scmp.ne.s32.totalorder %s2293_s7, %s1787_s26  ;;  %p1791_p6 = scmp.lt.u32.totalorder %s1787_s26, %s2293_s7 }
 0x28d   :  { %p1793_p7 = pnand %p1791_p6, %p1788_p5 }
 0x28f   :  { %1796 = shalt.err (!%p1793_p7)
}
 0x290   :  { %s1809_s30 = smov 128   ;;  %v1760_v30 = vpop.eup %1759 }
 0x291   :  { %1412 = dma.vmem_to_hbm [thread:$0]  %s1407_s24, 512, %s2293_s7, [#allocation5], %s1809_s30, %s1809_s30, %s1804_s22   ;;  %v1762_v31 = vpop.eup %1761  ;;  %v1345_v32 = vmul.f32 0.5, %v1760_v30 }
 0x292   :  { %v1764_v41 = vpop.eup %1763  ;;  %v1343_v33 = vmul.f32 0.5, %v1762_v31 }
 0x293   :  { %v1766_v36 = vpop.eup %1765  ;;  %v1349_v37 = vadd.f32 0.5, %v1345_v32  ;;  %v1346_v38 = vmul.f32 0.5, %v1764_v41 }
 0x294   :  { %v1347_v43 = vadd.f32 0.5, %v1343_v33  ;;  %v1344_v11 = vmul.f32 0.5, %v1766_v36  ;;  %v1768_v46 = vpop.eup %1767 }
 0x295   :  { %v1350_v24 = vadd.f32 0.5, %v1346_v38  ;;  %v1770_v15 = vpop.eup %1769  ;;  %v1373_v48 = vmul.f32 %v1768_v46, %v1349_v37 }
 0x296   :  { %v1348_v49 = vadd.f32 0.5, %v1344_v11  ;;  %v1772_v50 = vpop.eup %1771  ;;  %v1371_v51 = vmul.f32 %v1770_v15, %v1347_v43 }
 0x297   :  { %v1774_v17 = vpop.eup %1773  ;;  %v1374_v45 = vmul.f32 %v1772_v50, %v1350_v24 }
 0x298   :  { %v1372_v52 = vmul.f32 %v1774_v17, %v1348_v49 }
 0x299   :  { %v1487_v53 = vpack.c.bf16 %v1374_v45, %v1373_v48 }
 0x29a   :  { %v1482_v39 = vpack.c.bf16 %v1372_v52, %v1371_v51 }
 0x29b   :  { %1489 = vst [vmem:[%s2292_s6 + $0x8] sm:$0xff] %v1487_v53  }
 0x29c   :  { %1483 = vst [vmem:[%s2292_s6] sm:$0xff] %v1482_v39  }
 0x29d   :  { %1797 = dma.done.wait [#allocation5], 512  }
 0x29e   :  { %1798 = vsyncadd [#allocation5], 4294966784 }
 0x29f   :  { %1418 = vsyncpa [#allocation5], 1 }

// kernel: ms_cms_lstm_forward.11
= control target key start
LH: loop header
LB: loop body
LE: loop exit
PB: predicated region body
PF: predicated region fallthrough
CT: control target
= control target key end

     0   :  { %v89_v0 = vlaneseq  ;;  %s1695_s21 = smov 125   ;;  %s1696_s22 = smov 3   ;;  %vm31_vm0 = vcmask 1047808   ;;  %vm33_vm1 = vcmask 261120   ;;  %v1697_v30 = vmov 0   ;;  %s2197_s0 = inlined_call_operand.vmem [shape: bf16[32,32], index: 0, kind: input, shape index: {}]   ;;  %s2198_s1 = inlined_call_operand.vmem [shape: bf16[32,32], index: 1, kind: input, shape index: {}]   ;;  %s2199_s2 = inlined_call_operand.vmem [shape: f32[32,32], index: 2, kind: input, shape index: {}]   ;;  %s2200_s3 = inlined_call_operand.vmem [shape: bf16[128,576], index: 3, kind: input, shape index: {}]   ;;  %s2201_s4 = inlined_call_operand.vmem [shape: f32[128,1], index: 4, kind: input, shape index: {}]   ;;  %s2202_s5 = inlined_call_operand.vmem [shape: bf16[9,32], index: 5, kind: input, shape index: {}]   ;;  %s2203_s6 = inlined_call_operand.vmem [shape: bf16[32,32], index: 6, kind: output, shape index: {0}]   ;;  %s2204_s7 = inlined_call_operand.hbm [shape: f32[32,32], index: 7, kind: output, shape index: {1}]  }
   0x1   :  { %v216_v1 = vld [vmem:[%s2202_s5] sm:$0x2]  ;;  %v85_v2 = vld [vmem:[%s2202_s5] sm:$0x1]  ;;  %v392_v3 = vld [vmem:[%s2202_s5] sm:$0x8]  ;;  %1571 = vset.pattern.permute.xlu1 %v1697_v30  ;;  %1570 = vset.pattern.permute.xlu0 %v1697_v30 }
   0x2   :  { %v281_v4 = vld [vmem:[%s2202_s5] sm:$0x2]  ;;  %v90_v5 = vshrl.u32 %v89_v0, 7  ;;  %v218_v6 = vpack.i.b16 %v216_v1, %v216_v1  ;;  %v394_v7 = vpack.i.b16 %v392_v3, %v392_v3  ;;  %v150_v9 = vld [vmem:[%s2202_s5] sm:$0x1]  ;;  %v87_v10 = vpack.i.b16 %v85_v2, %v85_v2  ;;  %v1573_v27 = vld [vmem:[%s2197_s0 + $0x8] sm:$0xff]  }
   0x3   :  { %v283_v8 = vshrl.u32 %v281_v4, 16  ;;  %v152_v11 = vshrl.u32 %v150_v9, 16  ;;  %v432_v12 = vld [vmem:[%s2202_s5] sm:$0x8]  ;;  %v351_v17 = vld [vmem:[%s2202_s5] sm:$0x4] }
   0x4   :  { %v222_v13 = vsub.s32 1, %v90_v5  ;;  %v91_v14 = vsub.s32 0, %v90_v5  ;;  %v398_v15 = vsub.s32 3, %v90_v5  ;;  %v434_v18 = vshrl.u32 %v432_v12, 16  ;;  %v1572_v19 = vld [vmem:[%s2197_s0] sm:$0xff]   ;;  %32 = vst.msk [vmem:[#allocation2 + $0x8] sm:$0xff] %vm31_vm0, %v1697_v30 }
   0x5   :  { %v284_v16 = vpack.i.b16 %v283_v8, %v283_v8  ;;  %v153_v24 = vpack.i.b16 %v152_v11, %v152_v11  ;;  %v353_v25 = vshrl.u32 %v351_v17, 16  ;;  %v473_v26 = vld [vmem:[%s2202_s5 + $0x4] sm:$0x1]  ;;  %35 = vst.msk [vmem:[#allocation2 + $0x20] sm:$0xff] %vm31_vm0, %v1697_v30  ;;  %37 = vst.msk [vmem:[#allocation2 + $0x38] sm:$0xff] %vm31_vm0, %v1697_v30  ;;  %v1575_v31 = vld [vmem:[%s2198_s1 + $0x8] sm:$0xff]  }
   0x6   :  { %v223_v20 = vrot.slane %v218_v6, %v222_v13  ;;  %v399_v21 = vrot.slane %v394_v7, %v398_v15  ;;  %v92_v22 = vrot.slane %v87_v10, %v91_v14  ;;  %v435_v28 = vpack.i.b16 %v434_v18, %v434_v18  ;;  %v1574_v29 = vld [vmem:[%s2198_s1] sm:$0xff]   ;;  %39 = vst.msk [vmem:[#allocation2 + $0x50] sm:$0xff] %vm31_vm0, %v1697_v30  ;;  %s1698_s25 = smov 123   ;;  %s1699_s26 = smov 127  }
   0x7   :  { %v289_v23 = vrot.slane %v284_v16, %v222_v13  ;;  %57 = vst.msk [vmem:[#allocation2 + $0x8] sm:$0xff] %vm33_vm1, %v1572_v19  ;;  %58 = vst.msk [vmem:[#allocation2 + $0x20] sm:$0xff] %vm33_vm1, %v1573_v27  ;;  %v158_v32 = vrot.slane %v153_v24, %v91_v14  ;;  %v354_v34 = vpack.i.b16 %v353_v25, %v353_v25  ;;  %v358_v35 = vsub.s32 2, %v90_v5  ;;  %s1700_s1 = smov 124   ;;  %s1701_s27 = smov 4  }
   0x8   :  { %225 = vrot.lane.b32.xlu0 %v223_v20, %s1695_s21  ;;  %401 = vrot.lane.b32.xlu1 %v399_v21, %s1696_s22  ;;  %75 = vst.msk [vmem:[#allocation2 + $0x38] sm:$0xff] %vm33_vm1, %v1574_v29  ;;  %76 = vst.msk [vmem:[#allocation2 + $0x50] sm:$0xff] %vm33_vm1, %v1575_v31  ;;  %v440_v33 = vrot.slane %v435_v28, %v398_v15  ;;  %v475_v36 = vpack.i.b16 %v473_v26, %v473_v26  ;;  %s1702_s28 = smov 1   ;;  %s1703_s29 = smov 5  }
   0x9   :  { %v359_v37 = vrot.slane %v354_v34, %v358_v35 }
   0xa   :  { %v480_v38 = vrot.slane %v475_v36, %v91_v14 }
   0xc   :  { %94 = vrot.lane.b32.xlu0 %v92_v22, %s1698_s25  ;;  %291 = vrot.lane.b32.xlu1 %v289_v23, %s1699_s26 }
   0xe   :  { %v1793_v39 = vld [vmem:[#allocation2 + $0x8] sm:$0xff]  ;;  %v1795_v40 = vld [vmem:[#allocation2 + $0x20] sm:$0xff] }
   0xf   :  { %v1797_v41 = vld [vmem:[#allocation2 + $0x38] sm:$0xff]  ;;  %v1799_v42 = vld [vmem:[#allocation2 + $0x50] sm:$0xff]  ;;  %343 = vst.msk [vmem:[#allocation3 + $0x80] sm:$0xff] %vm33_vm1, %v1793_v39  ;;  %344 = vst.msk [vmem:[#allocation3 + $0x88] sm:$0xff] %vm33_vm1, %v1795_v40 }
  0x10   :  { %160 = vrot.lane.b32.xlu0 %v158_v32, %s1700_s1  ;;  %442 = vrot.lane.b32.xlu1 %v440_v33, %s1701_s27  ;;  %345 = vst.msk [vmem:[#allocation3 + $0x90] sm:$0xff] %vm33_vm1, %v1797_v41  ;;  %346 = vst.msk [vmem:[#allocation3 + $0x98] sm:$0xff] %vm33_vm1, %v1799_v42 }
  0x14   :  { %361 = vrot.lane.b32.xlu0 %v359_v37, %s1702_s28  ;;  %482 = vrot.lane.b32.xlu1 %v480_v38, %s1703_s29 }
  0x15   :  { %13 = vsyncpa [#allocation5], 0  ;;  %v1578_v7 = vld [vmem:[%s2200_s3 + $0x4] ss:$20 sps:$4 sm:$0xff]   ;;  %v1585_v18 = vld [vmem:[%s2200_s3 + $0xc] ss:$20 sps:$4 sm:$0xff]  }
  0x16   :  { %946 = vmatprep.mubr.bf16.mxu0 %v1578_v7  ;;  %1043 = vmatprep.mubr.bf16.mxu1 %v1585_v18  ;;  %vm260_vm2 = vcmask 23552   ;;  %vm129_vm3 = vcmask 39936   ;;  %vm326_vm4 = vcmask 7168   ;;  %vm195_vm5 = vcmask 31744   ;;  %s1704_s20 = smov [#allocation4]  }
  0x17   :  { %vm889_vm6 = vcmask 523264  }
  0x7a   :  { %v226_v43 = vpop.permute.xlu0 %225  ;;  %v402_v53 = vpop.permute.xlu1 %401 }
  0x7b   :  { %v229_v44 = vmul.bf16 %v226_v43, %v1793_v39  ;;  %v228_v45 = vmul.bf16 0, %v226_v43  ;;  %v231_v49 = vmul.bf16 %v226_v43, %v1795_v40  ;;  %v233_v51 = vmul.bf16 %v226_v43, %v1797_v41 }
  0x7c   :  { %v235_v54 = vmul.bf16 %v226_v43, %v1799_v42  ;;  %v404_v59 = vmul.bf16 %v402_v53, %v1793_v39  ;;  %v405_v62 = vmul.bf16 %v402_v53, %v1795_v40  ;;  %v406_v2 = vmul.bf16 %v402_v53, %v1797_v41 }
  0x7d   :  { %246 = vrot.lane.b32.xlu0 %v229_v44, %s1696_s22  ;;  %244 = vrot.lane.b32.xlu1 %v228_v45, %s1696_s22  ;;  %v407_v5 = vmul.bf16 %v402_v53, %v1799_v42 }
  0x7e   :  { %v95_v46 = vpop.permute.xlu0 %94  ;;  %v292_v55 = vpop.permute.xlu1 %291 }
  0x7f   :  { %v98_v47 = vmul.bf16 %v1793_v39, %v95_v46  ;;  %v97_v48 = vmul.bf16 0, %v95_v46  ;;  %v100_v50 = vmul.bf16 %v1795_v40, %v95_v46  ;;  %v102_v52 = vmul.bf16 %v1797_v41, %v95_v46 }
  0x80   :  { %v104_v56 = vmul.bf16 %v1799_v42, %v95_v46  ;;  %v294_v57 = vmul.bf16 0, %v292_v55  ;;  %v295_v61 = vmul.bf16 %v292_v55, %v1793_v39  ;;  %v297_v0 = vmul.bf16 %v292_v55, %v1795_v40 }
  0x81   :  { %115 = vrot.lane.b32.xlu0 %v98_v47, %s1703_s29  ;;  %113 = vrot.lane.b32.xlu1 %v97_v48, %s1703_s29  ;;  %v299_v3 = vmul.bf16 %v292_v55, %v1797_v41  ;;  %v301_v6 = vmul.bf16 %v292_v55, %v1799_v42 }
  0x82   :  { %v161_v58 = vpop.permute.xlu0 %160  ;;  %v443_v8 = vpop.permute.xlu1 %442 }
  0x83   :  { %v163_v60 = vmul.bf16 0, %v161_v58  ;;  %v164_v63 = vmul.bf16 %v1793_v39, %v161_v58  ;;  %v166_v1 = vmul.bf16 %v1795_v40, %v161_v58  ;;  %v168_v4 = vmul.bf16 %v1797_v41, %v161_v58 }
  0x84   :  { %v170_v10 = vmul.bf16 %v1799_v42, %v161_v58  ;;  %v445_v11 = vmul.bf16 %v443_v8, %v1793_v39  ;;  %v446_v13 = vmul.bf16 %v443_v8, %v1795_v40  ;;  %v447_v15 = vmul.bf16 %v443_v8, %v1797_v41 }
  0x85   :  { %250 = vrot.lane.b32.xlu0 %v231_v49, %s1696_s22  ;;  %248 = vrot.lane.b32.xlu1 %v228_v45, %s1696_s22  ;;  %v448_v19 = vmul.bf16 %v443_v8, %v1799_v42  ;;  %v595_v8 = vld [vmem:[%s2201_s4 + $0x10] sm:$0xff] }
  0x86   :  { %v362_v9 = vpop.permute.xlu0 %361  ;;  %v483_v17 = vpop.permute.xlu1 %482 }
  0x87   :  { %v364_v12 = vmul.bf16 %v362_v9, %v1793_v39  ;;  %v365_v14 = vmul.bf16 %v362_v9, %v1795_v40  ;;  %v366_v16 = vmul.bf16 %v362_v9, %v1797_v41  ;;  %v367_v20 = vmul.bf16 %v362_v9, %v1799_v42 }
  0x88   :  { %v485_v21 = vmul.bf16 %v483_v17, %v1793_v39  ;;  %v486_v22 = vmul.bf16 %v483_v17, %v1795_v40  ;;  %v487_v23 = vmul.bf16 %v483_v17, %v1797_v41  ;;  %v488_v24 = vmul.bf16 %v483_v17, %v1799_v42 }
  0x89   :  { %119 = vrot.lane.b32.xlu0 %v100_v50, %s1703_s29  ;;  %117 = vrot.lane.b32.xlu1 %v97_v48, %s1703_s29 }
  0x8d   :  { %254 = vrot.lane.b32.xlu0 %v233_v51, %s1696_s22  ;;  %252 = vrot.lane.b32.xlu1 %v228_v45, %s1696_s22 }
  0x91   :  { %123 = vrot.lane.b32.xlu0 %v102_v52, %s1703_s29  ;;  %121 = vrot.lane.b32.xlu1 %v97_v48, %s1703_s29 }
  0x95   :  { %258 = vrot.lane.b32.xlu0 %v235_v54, %s1696_s22  ;;  %256 = vrot.lane.b32.xlu1 %v228_v45, %s1696_s22 }
  0x99   :  { %127 = vrot.lane.b32.xlu0 %v104_v56, %s1703_s29  ;;  %125 = vrot.lane.b32.xlu1 %v97_v48, %s1703_s29 }
  0x9d   :  { %310 = vrot.lane.b32.xlu0 %v294_v57, %s1702_s28  ;;  %412 = vrot.lane.b32.xlu1 %v404_v59, %s1695_s21 }
  0xa1   :  { %179 = vrot.lane.b32.xlu0 %v163_v60, %s1701_s27  ;;  %312 = vrot.lane.b32.xlu1 %v295_v61, %s1702_s28 }
  0xa5   :  { %414 = vrot.lane.b32.xlu0 %v405_v62, %s1695_s21  ;;  %181 = vrot.lane.b32.xlu1 %v164_v63, %s1701_s27  ;;  %v573_v62 = vld [vmem:[#allocation3 + $0x80] sm:$0xff] }
  0xa9   :  { %316 = vrot.lane.b32.xlu0 %v297_v0, %s1702_s28  ;;  %314 = vrot.lane.b32.xlu1 %v294_v57, %s1702_s28 }
  0xad   :  { %185 = vrot.lane.b32.xlu0 %v166_v1, %s1701_s27  ;;  %183 = vrot.lane.b32.xlu1 %v163_v60, %s1701_s27 }
  0xb1   :  { %416 = vrot.lane.b32.xlu0 %v406_v2, %s1695_s21  ;;  %318 = vrot.lane.b32.xlu1 %v294_v57, %s1702_s28 }
  0xb5   :  { %320 = vrot.lane.b32.xlu0 %v299_v3, %s1702_s28  ;;  %187 = vrot.lane.b32.xlu1 %v163_v60, %s1701_s27  ;;  %v593_v3 = vld [vmem:[%s2201_s4] sm:$0xff] }
  0xb9   :  { %189 = vrot.lane.b32.xlu0 %v168_v4, %s1701_s27  ;;  %418 = vrot.lane.b32.xlu1 %v407_v5, %s1695_s21  ;;  %v594_v4 = vld [vmem:[%s2201_s4 + $0x8] sm:$0xff]  ;;  %v596_v5 = vld [vmem:[%s2201_s4 + $0x18] sm:$0xff]  ;;  %s1313_s21 = sshll.u32 %s1704_s20, 4  ;;  %s1314_s21 = int_to_ptr.vmem [resolvable:$true] %s1313_s21 }
  0xba   :  { %p1676_p1 = scmp.lt.s32.totalorder %s1314_s21, %s1314_s21 }
  0xbd   :  { %322 = vrot.lane.b32.xlu0 %v294_v57, %s1702_s28  ;;  %324 = vrot.lane.b32.xlu1 %v301_v6, %s1702_s28 }
  0xc1   :  { %191 = vrot.lane.b32.xlu0 %v163_v60, %s1701_s27  ;;  %193 = vrot.lane.b32.xlu1 %v170_v10, %s1701_s27 }
  0xc5   :  { %453 = vrot.lane.b32.xlu0 %v445_v11, %s1700_s1  ;;  %372 = vrot.lane.b32.xlu1 %v364_v12, %s1699_s26  ;;  %v574_v11 = vld [vmem:[#allocation3 + $0x88] sm:$0xff] }
  0xc9   :  { %455 = vrot.lane.b32.xlu0 %v446_v13, %s1700_s1  ;;  %374 = vrot.lane.b32.xlu1 %v365_v14, %s1699_s26 }
  0xcd   :  { %457 = vrot.lane.b32.xlu0 %v447_v15, %s1700_s1  ;;  %376 = vrot.lane.b32.xlu1 %v366_v16, %s1699_s26  ;;  %v598_v15 = vld [vmem:[%s2201_s4 + $0x28] sm:$0xff]  ;;  %v597_v16 = vld [vmem:[%s2201_s4 + $0x20] sm:$0xff] }
  0xd1   :  { %459 = vrot.lane.b32.xlu0 %v448_v19, %s1700_s1  ;;  %378 = vrot.lane.b32.xlu1 %v367_v20, %s1699_s26 }
  0xd5   :  { %493 = vrot.lane.b32.xlu0 %v485_v21, %s1698_s25  ;;  %495 = vrot.lane.b32.xlu1 %v486_v22, %s1698_s25  ;;  %v600_v21 = vld [vmem:[%s2201_s4 + $0x38] sm:$0xff]  ;;  %v599_v22 = vld [vmem:[%s2201_s4 + $0x30] sm:$0xff] }
  0xd9   :  { %497 = vrot.lane.b32.xlu0 %v487_v23, %s1698_s25  ;;  %499 = vrot.lane.b32.xlu1 %v488_v24, %s1698_s25 }
  0xdd   :  { %611 = vperm.xlu0 %1570, %v593_v3   ;;  %616 = vperm.xlu1 %1571, %v594_v4  }
  0xe1   :  { %626 = vperm.xlu0 %1570, %v596_v5   ;;  %621 = vperm.xlu1 %1571, %v595_v8  }
  0xe5   :  { %636 = vperm.xlu0 %1570, %v598_v15   ;;  %631 = vperm.xlu1 %1571, %v597_v16   ;;  %v1583_v15 = vld [vmem:[%s2200_s3 + $0x8] ss:$20 sps:$4 sm:$0xff]   ;;  %v1586_v16 = vld [vmem:[%s2200_s3 + $0x50] ss:$20 sps:$4 sm:$0xff]  }
  0xe9   :  { %646 = vperm.xlu0 %1570, %v600_v21   ;;  %641 = vperm.xlu1 %1571, %v599_v22   ;;  %v1591_v22 = vld [vmem:[%s2200_s3 + $0x78] ss:$20 sps:$4 sm:$0xff]  }
  0xef   :  { %v247_v25 = vpop.permute.xlu0 %246  ;;  %v245_v26 = vpop.permute.xlu1 %244 }
  0xf0   :  { %v261_v27 = vsel %vm260_vm2, %v245_v26, %v247_v25  ;;  %v602_v26 = vld [vmem:[%s2201_s4 + $0x48] sm:$0xff] }
  0xf1   :  { %269 = vst.msk [vmem:[#allocation3 + $0x40] sm:$0xff] %vm33_vm1, %v261_v27  ;;  %v601_v27 = vld [vmem:[%s2201_s4 + $0x40] sm:$0xff]  ;;  %656 = vperm.xlu0 %1570, %v602_v26  }
  0xf2   :  { %651 = vperm.xlu1 %1571, %v601_v27   ;;  %v1597_v27 = vld [vmem:[%s2200_s3 + $0xa0] ss:$20 sps:$4 sm:$0xff]  }
  0xf3   :  { %v116_v28 = vpop.permute.xlu0 %115  ;;  %v114_v29 = vpop.permute.xlu1 %113 }
  0xf4   :  { %v130_v30 = vsel %vm129_vm3, %v114_v29, %v116_v28 }
  0xf5   :  { %138 = vst.msk [vmem:[#allocation3] sm:$0xff] %vm33_vm1, %v130_v30  ;;  %v575_v30 = vld [vmem:[#allocation3 + $0x90] sm:$0xff] }
  0xf7   :  { %v251_v31 = vpop.permute.xlu0 %250  ;;  %v249_v32 = vpop.permute.xlu1 %248 }
  0xf8   :  { %v262_v33 = vsel %vm260_vm2, %v249_v32, %v251_v31  ;;  %v565_v34 = vld [vmem:[#allocation3 + $0x40] sm:$0xff] }
  0xf9   :  { %270 = vst.msk [vmem:[#allocation3 + $0x48] sm:$0xff] %vm33_vm1, %v262_v33  ;;  %1386 = vmatprep.subr.bf16.mxu0 %v565_v34  ;;  %v604_v34 = vld [vmem:[%s2201_s4 + $0x58] sm:$0xff] }
  0xfa   :  { %666 = vperm.xlu0 %1570, %v604_v34   ;;  %v1607_v34 = vld [vmem:[%s2200_s3 + $0xac] ss:$20 sps:$4 sm:$0xff]  }
  0xfb   :  { %v120_v35 = vpop.permute.xlu0 %119  ;;  %v118_v36 = vpop.permute.xlu1 %117 }
  0xfc   :  { %v131_v37 = vsel %vm129_vm3, %v118_v36, %v120_v35  ;;  %v557_v38 = vld [vmem:[#allocation3] sm:$0xff]  ;;  %v603_v35 = vld [vmem:[%s2201_s4 + $0x50] sm:$0xff] }
  0xfd   :  { %139 = vst.msk [vmem:[#allocation3 + $0x8] sm:$0xff] %vm33_vm1, %v131_v37  ;;  %1387 = vmatpush3.bf16.msra.mxu0 %v557_v38  ;;  %661 = vperm.xlu1 %1571, %v603_v35   ;;  %v1609_v35 = vld [vmem:[%s2200_s3 + $0xf0] ss:$20 sps:$4 sm:$0xff]  }
  0xff   :  { %v255_v39 = vpop.permute.xlu0 %254  ;;  %v253_v40 = vpop.permute.xlu1 %252 }
 0x100   :  { %v263_v41 = vsel %vm260_vm2, %v253_v40, %v255_v39  ;;  %v566_v42 = vld [vmem:[#allocation3 + $0x48] sm:$0xff]  ;;  %v605_v40 = vld [vmem:[%s2201_s4 + $0x60] sm:$0xff] }
 0x101   :  { %271 = vst.msk [vmem:[#allocation3 + $0x50] sm:$0xff] %vm33_vm1, %v263_v41  ;;  %1388 = vmatprep.subr.bf16.mxu0 %v566_v42  ;;  %v606_v39 = vld [vmem:[%s2201_s4 + $0x68] sm:$0xff]  ;;  %671 = vperm.xlu1 %1571, %v605_v40   ;;  %v1616_v40 = vld [vmem:[%s2200_s3 + $0xd0] ss:$20 sps:$4 sm:$0xff]  }
 0x102   :  { %676 = vperm.xlu0 %1570, %v606_v39   ;;  %v1615_v39 = vld [vmem:[%s2200_s3 + $0x118] ss:$20 sps:$4 sm:$0xff]  }
 0x103   :  { %v124_v43 = vpop.permute.xlu0 %123  ;;  %v122_v44 = vpop.permute.xlu1 %121 }
 0x104   :  { %v132_v45 = vsel %vm129_vm3, %v122_v44, %v124_v43  ;;  %v558_v46 = vld [vmem:[#allocation3 + $0x8] sm:$0xff]  ;;  %v576_v43 = vld [vmem:[#allocation3 + $0x98] sm:$0xff] }
 0x105   :  { %140 = vst.msk [vmem:[#allocation3 + $0x10] sm:$0xff] %vm33_vm1, %v132_v45  ;;  %1389 = vmatpush3.bf16.msra.mxu0 %v558_v46 }
 0x107   :  { %v259_v47 = vpop.permute.xlu0 %258  ;;  %v257_v48 = vpop.permute.xlu1 %256 }
 0x108   :  { %v264_v49 = vsel %vm260_vm2, %v257_v48, %v259_v47  ;;  %v567_v50 = vld [vmem:[#allocation3 + $0x50] sm:$0xff]  ;;  %v608_v47 = vld [vmem:[%s2201_s4 + $0x78] sm:$0xff] }
 0x109   :  { %272 = vst.msk [vmem:[#allocation3 + $0x58] sm:$0xff] %vm33_vm1, %v264_v49  ;;  %1390 = vmatprep.subr.bf16.mxu0 %v567_v50  ;;  %v607_v48 = vld [vmem:[%s2201_s4 + $0x70] sm:$0xff]  ;;  %686 = vperm.xlu0 %1570, %v608_v47  }
 0x10a   :  { %681 = vperm.xlu1 %1571, %v607_v48   ;;  %v1625_v47 = vld [vmem:[%s2200_s3 + $0x120] ss:$20 sps:$4 sm:$0xff]   ;;  %v1626_v48 = vld [vmem:[%s2200_s3 + $0x88] ss:$20 sps:$4 sm:$0xff]  }
 0x10b   :  { %v128_v51 = vpop.permute.xlu0 %127  ;;  %v126_v52 = vpop.permute.xlu1 %125 }
 0x10c   :  { %v133_v53 = vsel %vm129_vm3, %v126_v52, %v128_v51  ;;  %v559_v54 = vld [vmem:[#allocation3 + $0x10] sm:$0xff] }
 0x10d   :  { %141 = vst.msk [vmem:[#allocation3 + $0x18] sm:$0xff] %vm33_vm1, %v133_v53  ;;  %1391 = vmatpush3.bf16.msra.mxu0 %v559_v54 }
 0x10f   :  { %v311_v55 = vpop.permute.xlu0 %310  ;;  %v413_v56 = vpop.permute.xlu1 %412 }
 0x110   :  { %424 = vst.msk [vmem:[#allocation3 + $0xc0] sm:$0xff] %vm33_vm1, %v413_v56  ;;  %v568_v57 = vld [vmem:[#allocation3 + $0x58] sm:$0xff] }
 0x111   :  { %1392 = vmatprep.subr.bf16.mxu0 %v568_v57  ;;  %v1576_v57 = vld [vmem:[%s2200_s3] ss:$20 sps:$4 sm:$0xff]  }
 0x113   :  { %v180_v58 = vpop.permute.xlu0 %179  ;;  %v313_v59 = vpop.permute.xlu1 %312 }
 0x114   :  { %v327_v60 = vsel %vm326_vm4, %v311_v55, %v313_v59  ;;  %v560_v61 = vld [vmem:[#allocation3 + $0x18] sm:$0xff] }
 0x115   :  { %335 = vst.msk [vmem:[#allocation3 + $0x60] sm:$0xff] %vm33_vm1, %v327_v60  ;;  %1393 = vmatpush3.bf16.msra.mxu0 %v560_v61 }
 0x117   :  { %v415_v63 = vpop.permute.xlu0 %414  ;;  %v182_v0 = vpop.permute.xlu1 %181  ;;  %v581_v1 = vld [vmem:[#allocation3 + $0xc0] sm:$0xff] }
 0x118   :  { %425 = vst.msk [vmem:[#allocation3 + $0xc8] sm:$0xff] %vm33_vm1, %v415_v63  ;;  %v196_v2 = vsel %vm195_vm5, %v180_v58, %v182_v0  ;;  %1450 = vmatprep.subr.bf16.mxu1 %v581_v1  ;;  %v1579_v58 = vld [vmem:[%s2200_s3 + $0x2c] ss:$20 sps:$4 sm:$0xff]  }
 0x119   :  { %204 = vst.msk [vmem:[#allocation3 + $0x20] sm:$0xff] %vm33_vm1, %v196_v2  ;;  %1451 = vmatpush3.bf16.msra.mxu1 %v573_v62  ;;  %v515_v63 = vld [vmem:[%s2200_s3 + $0x28] sm:$0xff]  ;;  %v518_v0 = vld [vmem:[%s2200_s3 + $0x3c] sm:$0xff] }
 0x11a   :  { %v1335_v5 = vcombine.low %v515_v63, %v518_v0 }
 0x11b   :  { %v317_v6 = vpop.permute.xlu0 %316  ;;  %v315_v7 = vpop.permute.xlu1 %314 }
 0x11c   :  { %v328_v9 = vsel %vm326_vm4, %v315_v7, %v317_v6  ;;  %v569_v10 = vld [vmem:[#allocation3 + $0x60] sm:$0xff]  ;;  %v1581_v6 = vld [vmem:[%s2200_s3 + $0x54] ss:$20 sps:$4 sm:$0xff]  }
 0x11d   :  { %336 = vst.msk [vmem:[#allocation3 + $0x68] sm:$0xff] %vm33_vm1, %v328_v9  ;;  %1394 = vmatprep.subr.bf16.mxu0 %v569_v10 }
 0x11f   :  { %v186_v12 = vpop.permute.xlu0 %185  ;;  %v184_v13 = vpop.permute.xlu1 %183  ;;  %v582_v14 = vld [vmem:[#allocation3 + $0xc8] sm:$0xff] }
 0x120   :  { %v197_v17 = vsel %vm195_vm5, %v184_v13, %v186_v12  ;;  %1452 = vmatprep.subr.bf16.mxu1 %v582_v14  ;;  %v561_v18 = vld [vmem:[#allocation3 + $0x20] sm:$0xff] }
 0x121   :  { %205 = vst.msk [vmem:[#allocation3 + $0x28] sm:$0xff] %vm33_vm1, %v197_v17  ;;  %1395 = vmatpush3.bf16.msra.mxu0 %v561_v18  ;;  %1453 = vmatpush3.bf16.msra.mxu1 %v574_v11 }
 0x123   :  { %v417_v19 = vpop.permute.xlu0 %416  ;;  %v319_v20 = vpop.permute.xlu1 %318 }
 0x124   :  { %426 = vst.msk [vmem:[#allocation3 + $0xd0] sm:$0xff] %vm33_vm1, %v417_v19  ;;  %v570_v23 = vld [vmem:[#allocation3 + $0x68] sm:$0xff]  ;;  %v1587_v19 = vld [vmem:[%s2200_s3 + $0x7c] ss:$20 sps:$4 sm:$0xff]  }
 0x125   :  { %1396 = vmatprep.subr.bf16.mxu0 %v570_v23  ;;  %v1592_v23 = vld [vmem:[%s2200_s3 + $0x30] ss:$20 sps:$4 sm:$0xff]  }
 0x127   :  { %v321_v24 = vpop.permute.xlu0 %320  ;;  %v188_v25 = vpop.permute.xlu1 %187 }
 0x128   :  { %v329_v28 = vsel %vm326_vm4, %v319_v20, %v321_v24  ;;  %v562_v29 = vld [vmem:[#allocation3 + $0x28] sm:$0xff]  ;;  %v1593_v24 = vld [vmem:[%s2200_s3 + $0xa4] ss:$20 sps:$4 sm:$0xff]  }
 0x129   :  { %337 = vst.msk [vmem:[#allocation3 + $0x70] sm:$0xff] %vm33_vm1, %v329_v28  ;;  %1397 = vmatpush3.bf16.msra.mxu0 %v562_v29  ;;  %v1589_v20 = vld [vmem:[%s2200_s3 + $0x34] ss:$20 sps:$4 sm:$0xff]   ;;  %v1598_v28 = vld [vmem:[%s2200_s3 + $0x58] ss:$20 sps:$4 sm:$0xff]  }
 0x12a   :  { %v1599_v29 = vld [vmem:[%s2200_s3 + $0xcc] ss:$20 sps:$4 sm:$0xff]  }
 0x12b   :  { %v190_v31 = vpop.permute.xlu0 %189  ;;  %v419_v32 = vpop.permute.xlu1 %418  ;;  %v583_v33 = vld [vmem:[#allocation3 + $0xd0] sm:$0xff] }
 0x12c   :  { %v198_v36 = vsel %vm195_vm5, %v188_v25, %v190_v31  ;;  %427 = vst.msk [vmem:[#allocation3 + $0xd8] sm:$0xff] %vm33_vm1, %v419_v32  ;;  %1454 = vmatprep.subr.bf16.mxu1 %v583_v33  ;;  %v1595_v25 = vld [vmem:[%s2200_s3 + $0x5c] ss:$20 sps:$4 sm:$0xff]   ;;  %v1604_v32 = vld [vmem:[%s2200_s3 + $0x80] ss:$20 sps:$4 sm:$0xff]  }
 0x12d   :  { %206 = vst.msk [vmem:[#allocation3 + $0x30] sm:$0xff] %vm33_vm1, %v198_v36  ;;  %1455 = vmatpush3.bf16.msra.mxu1 %v575_v30  ;;  %v1601_v30 = vld [vmem:[%s2200_s3 + $0x84] ss:$20 sps:$4 sm:$0xff]   ;;  %v1603_v31 = vld [vmem:[%s2200_s3 + $0xc8] ss:$20 sps:$4 sm:$0xff]  }
 0x12e   :  { %v1605_v33 = vld [vmem:[%s2200_s3 + $0xf4] ss:$20 sps:$4 sm:$0xff]  }
 0x12f   :  { %v323_v37 = vpop.permute.xlu0 %322  ;;  %v325_v38 = vpop.permute.xlu1 %324  ;;  %v1610_v36 = vld [vmem:[%s2200_s3 + $0xa8] ss:$20 sps:$4 sm:$0xff]  }
 0x130   :  { %v330_v41 = vsel %vm326_vm4, %v323_v37, %v325_v38  ;;  %v571_v42 = vld [vmem:[#allocation3 + $0x70] sm:$0xff] }
 0x131   :  { %338 = vst.msk [vmem:[#allocation3 + $0x78] sm:$0xff] %vm33_vm1, %v330_v41  ;;  %1398 = vmatprep.subr.bf16.mxu0 %v571_v42  ;;  %v1611_v37 = vld [vmem:[%s2200_s3 + $0x11c] ss:$20 sps:$4 sm:$0xff]   ;;  %v1613_v38 = vld [vmem:[%s2200_s3 + $0xd4] ss:$20 sps:$4 sm:$0xff]  }
 0x132   :  { %v1617_v41 = vld [vmem:[%s2200_s3 + $0xfc] ss:$20 sps:$4 sm:$0xff]  }
 0x133   :  { %v192_v44 = vpop.permute.xlu0 %191  ;;  %v194_v45 = vpop.permute.xlu1 %193  ;;  %v584_v46 = vld [vmem:[#allocation3 + $0xd8] sm:$0xff]  ;;  %v1619_v42 = vld [vmem:[%s2200_s3 + $0x10] ss:$20 sps:$4 sm:$0xff]  }
 0x134   :  { %v199_v49 = vsel %vm195_vm5, %v192_v44, %v194_v45  ;;  %1456 = vmatprep.subr.bf16.mxu1 %v584_v46  ;;  %v563_v50 = vld [vmem:[#allocation3 + $0x30] sm:$0xff]  ;;  %v1621_v44 = vld [vmem:[%s2200_s3 + $0x38] ss:$20 sps:$4 sm:$0xff]  }
 0x135   :  { %207 = vst.msk [vmem:[#allocation3 + $0x38] sm:$0xff] %vm33_vm1, %v199_v49  ;;  %1399 = vmatpush3.bf16.msra.mxu0 %v563_v50  ;;  %1457 = vmatpush3.bf16.msra.mxu1 %v576_v43  ;;  %v1620_v43 = vld [vmem:[%s2200_s3 + $0xf8] ss:$20 sps:$4 sm:$0xff]   ;;  %v1624_v46 = vld [vmem:[%s2200_s3 + $0x60] ss:$20 sps:$4 sm:$0xff]  }
 0x136   :  { %v1622_v45 = vld [vmem:[%s2200_s3 + $0x124] ss:$20 sps:$4 sm:$0xff]  }
 0x137   :  { %v454_v51 = vpop.permute.xlu0 %453  ;;  %v373_v52 = vpop.permute.xlu1 %372  ;;  %v1627_v49 = vld [vmem:[%s2200_s3 + $0xb0] ss:$20 sps:$4 sm:$0xff]   ;;  %v1628_v50 = vld [vmem:[%s2200_s3 + $0xd8] ss:$20 sps:$4 sm:$0xff]  }
 0x138   :  { %465 = vst.msk [vmem:[#allocation3 + $0xe0] sm:$0xff] %vm33_vm1, %v454_v51  ;;  %384 = vst.msk [vmem:[#allocation3 + $0xa0] sm:$0xff] %vm33_vm1, %v373_v52  ;;  %v572_v53 = vld [vmem:[#allocation3 + $0x78] sm:$0xff]  ;;  %v1629_v51 = vld [vmem:[%s2200_s3 + $0x100] ss:$20 sps:$4 sm:$0xff]  }
 0x139   :  { %1400 = vmatprep.subr.bf16.mxu0 %v572_v53  ;;  %v1630_v52 = vld [vmem:[%s2200_s3 + $0x128] ss:$20 sps:$4 sm:$0xff]  }
 0x13b   :  { %v456_v54 = vpop.permute.xlu0 %455  ;;  %v375_v55 = vpop.permute.xlu1 %374 }
 0x13c   :  { %466 = vst.msk [vmem:[#allocation3 + $0xe8] sm:$0xff] %vm33_vm1, %v456_v54  ;;  %385 = vst.msk [vmem:[#allocation3 + $0xa8] sm:$0xff] %vm33_vm1, %v375_v55  ;;  %v564_v56 = vld [vmem:[#allocation3 + $0x38] sm:$0xff] }
 0x13d   :  { %1401 = vmatpush3.bf16.msra.mxu0 %v564_v56 }
 0x13f   :  { %v458_v59 = vpop.permute.xlu0 %457  ;;  %v377_v60 = vpop.permute.xlu1 %376  ;;  %v585_v61 = vld [vmem:[#allocation3 + $0xe0] sm:$0xff] }
 0x140   :  { %v577_v62 = vld [vmem:[#allocation3 + $0xa0] sm:$0xff]  ;;  %467 = vst.msk [vmem:[#allocation3 + $0xf0] sm:$0xff] %vm33_vm1, %v458_v59  ;;  %386 = vst.msk [vmem:[#allocation3 + $0xb0] sm:$0xff] %vm33_vm1, %v377_v60  ;;  %947 = vmatmul.mubr.bf16.vlgmr.msra.gmra.mrb[0].mxu0 %v1576_v57  ;;  %1458 = vmatprep.subr.bf16.mxu1 %v585_v61 }
 0x141   :  { %1459 = vmatpush3.bf16.msra.mxu1 %v577_v62  ;;  %954 = vmatprep.mubr.bf16.mxu0 %v1579_v58 }
 0x143   :  { %v460_v1 = vpop.permute.xlu0 %459  ;;  %v379_v2 = vpop.permute.xlu1 %378  ;;  %v586_v3 = vld [vmem:[#allocation3 + $0xe8] sm:$0xff] }
 0x144   :  { %v578_v4 = vld [vmem:[#allocation3 + $0xa8] sm:$0xff]  ;;  %468 = vst.msk [vmem:[#allocation3 + $0xf8] sm:$0xff] %vm33_vm1, %v460_v1  ;;  %387 = vst.msk [vmem:[#allocation3 + $0xb8] sm:$0xff] %vm33_vm1, %v379_v2  ;;  %1460 = vmatprep.subr.bf16.mxu1 %v586_v3 }
 0x145   :  { %1461 = vmatpush3.bf16.msra.mxu1 %v578_v4 }
 0x147   :  { %v494_v7 = vpop.permute.xlu0 %493  ;;  %v496_v8 = vpop.permute.xlu1 %495  ;;  %v587_v9 = vld [vmem:[#allocation3 + $0xf0] sm:$0xff] }
 0x148   :  { %v579_v10 = vld [vmem:[#allocation3 + $0xb0] sm:$0xff]  ;;  %505 = vst.msk [vmem:[#allocation3 + $0x100] sm:$0xff] %vm33_vm1, %v494_v7  ;;  %506 = vst.msk [vmem:[#allocation3 + $0x108] sm:$0xff] %vm33_vm1, %v496_v8  ;;  %955 = vmatmul.mubr.bf16.gmra.mrb[4].mxu0 %v1335_v5  ;;  %1462 = vmatprep.subr.bf16.mxu1 %v587_v9 }
 0x149   :  { %1463 = vmatpush3.bf16.msra.mxu1 %v579_v10  ;;  %962 = vmatprep.mubr.bf16.mxu0 %v1581_v6 }
 0x14b   :  { %v498_v11 = vpop.permute.xlu0 %497  ;;  %v500_v12 = vpop.permute.xlu1 %499  ;;  %v588_v13 = vld [vmem:[#allocation3 + $0xf8] sm:$0xff] }
 0x14c   :  { %v580_v14 = vld [vmem:[#allocation3 + $0xb8] sm:$0xff]  ;;  %507 = vst.msk [vmem:[#allocation3 + $0x110] sm:$0xff] %vm33_vm1, %v498_v11  ;;  %508 = vst.msk [vmem:[#allocation3 + $0x118] sm:$0xff] %vm33_vm1, %v500_v12  ;;  %1464 = vmatprep.subr.bf16.mxu1 %v588_v13 }
 0x14d   :  { %1465 = vmatpush3.bf16.msra.mxu1 %v580_v14 }
 0x14f   :  { %v589_v17 = vld [vmem:[#allocation3 + $0x100] sm:$0xff]  ;;  %v590_v18 = vld [vmem:[#allocation3 + $0x108] sm:$0xff] }
 0x150   :  { %963 = vmatmul.mubr.bf16.gmra.mrb[8].mxu0 %v1586_v16  ;;  %1044 = vmatmul.mubr.bf16.vlgmr.msra.gmra.mrb[0].mxu1 %v1583_v15 }
 0x151   :  { %1526 = vmatprep.subr.bf16.mxu0 %v589_v17  ;;  %1550 = vmatprep.subr.bf16.mxu1 %v589_v17 }
 0x152   :  { %1527 = vmatpush3.bf16.msra.mxu0 %v589_v17  ;;  %1554 = vmatpush3.bf16.msra.mxu1 %v589_v17 }
 0x153   :  { %1528 = vmatprep.subr.bf16.mxu0 %v590_v18  ;;  %1551 = vmatprep.subr.bf16.mxu1 %v590_v18  ;;  %v591_v21 = vld [vmem:[#allocation3 + $0x110] sm:$0xff]  ;;  %v592_v26 = vld [vmem:[#allocation3 + $0x118] sm:$0xff] }
 0x154   :  { %970 = vmatprep.mubr.bf16.mxu0 %v1587_v19  ;;  %1051 = vmatprep.mubr.bf16.mxu1 %v1589_v20 }
 0x156   :  { %1529 = vmatpush3.bf16.msra.mxu0 %v590_v18  ;;  %1555 = vmatpush3.bf16.msra.mxu1 %v590_v18 }
 0x157   :  { %1530 = vmatprep.subr.bf16.mxu0 %v591_v21  ;;  %1552 = vmatprep.subr.bf16.mxu1 %v591_v21 }
 0x158   :  { %971 = vmatmul.mubr.bf16.gmra.mrb[12].mxu0 %v1591_v22  ;;  %1052 = vmatmul.mubr.bf16.gmra.mrb[4].mxu1 %v1592_v23 }
 0x159   :  { %978 = vmatprep.mubr.bf16.mxu0 %v1593_v24  ;;  %1059 = vmatprep.mubr.bf16.mxu1 %v1595_v25 }
 0x15a   :  { %1531 = vmatpush3.bf16.msra.mxu0 %v591_v21  ;;  %1556 = vmatpush3.bf16.msra.mxu1 %v591_v21 }
 0x15b   :  { %1532 = vmatprep.subr.bf16.mxu0 %v592_v26  ;;  %1553 = vmatprep.subr.bf16.mxu1 %v592_v26 }
 0x15c   :  { %v612_v1 = vpop.permute.xlu0 %611  ;;  %v617_v2 = vpop.permute.xlu1 %616 }
 0x15e   :  { %1533 = vmatpush3.bf16.msra.mxu0 %v592_v26  ;;  %1557 = vmatpush3.bf16.msra.mxu1 %v592_v26 }
 0x160   :  { %979 = vmatmul.mubr.bf16.gmra.mrb[16].mxu0 %v1597_v27  ;;  %1060 = vmatmul.mubr.bf16.gmra.mrb[8].mxu1 %v1598_v28  ;;  %v627_v19 = vpop.permute.xlu0 %626  ;;  %v622_v20 = vpop.permute.xlu1 %621 }
 0x161   :  { %986 = vmatprep.mubr.bf16.mxu0 %v1599_v29  ;;  %1067 = vmatprep.mubr.bf16.mxu1 %v1601_v30 }
 0x168   :  { %987 = vmatmul.mubr.bf16.gmra.mrb[20].mxu0 %v1603_v31  ;;  %1068 = vmatmul.mubr.bf16.gmra.mrb[12].mxu1 %v1604_v32 }
 0x169   :  { %994 = vmatprep.mubr.bf16.mxu0 %v1605_v33  ;;  %1075 = vmatprep.mubr.bf16.mxu1 %v1607_v34 }
 0x170   :  { %995 = vmatmul.mubr.bf16.gmra.mrb[24].mxu0 %v1609_v35  ;;  %1076 = vmatmul.mubr.bf16.gmra.mrb[16].mxu1 %v1610_v36 }
 0x171   :  { %1002 = vmatprep.mubr.bf16.mxu0 %v1611_v37  ;;  %1083 = vmatprep.mubr.bf16.mxu1 %v1613_v38  ;;  %v637_v37 = vpop.permute.xlu0 %636  ;;  %v632_v38 = vpop.permute.xlu1 %631 }
 0x178   :  { %1003 = vmatmul.mubr.bf16.gmra.mrb[28].mxu0 %v1615_v39  ;;  %1084 = vmatmul.mubr.bf16.gmra.mrb[20].mxu1 %v1616_v40 }
 0x179   :  { %1091 = vmatprep.mubr.bf16.mxu1 %v1617_v41  ;;  %1534 = vmatprep.mubr.msk.bf16.mxu0 %vm889_vm6, %v1619_v42 }
 0x180   :  { %1092 = vmatmul.mubr.bf16.gmra.mrb[24].mxu1 %v1620_v43  ;;  %1535 = vmatmul.mubr.msk.bf16.vlgmr.msra.gmra.mrb[32].mxu0 %vm889_vm6, %v1621_v44 }
 0x181   :  { %1099 = vmatprep.mubr.bf16.mxu1 %v1622_v45  ;;  %1538 = vmatprep.mubr.msk.bf16.mxu0 %vm889_vm6, %v1624_v46 }
 0x188   :  { %1100 = vmatmul.mubr.bf16.gmra.mrb[28].mxu1 %v1625_v47  ;;  %1539 = vmatmul.mubr.msk.bf16.gmra.mrb[36].mxu0 %vm889_vm6, %v1626_v48 }
 0x189   :  { %1542 = vmatprep.mubr.msk.bf16.mxu1 %vm889_vm6, %v1627_v49 }
 0x190   :  { %1543 = vmatmul.mubr.msk.bf16.vlgmr.msra.gmra.mrb[32].mxu1 %vm889_vm6, %v1628_v50 }
 0x191   :  { %1546 = vmatprep.mubr.msk.bf16.mxu1 %vm889_vm6, %v1629_v51 }
 0x198   :  { %1547 = vmatmul.mubr.msk.bf16.gmra.mrb[36].mxu1 %vm889_vm6, %v1630_v52 }
 0x213   :  { %v1402_v53 = vpop.f32.mrb[0].mxu0 }
 0x214   :  { %v1403_v54 = vpop.f32.mrb[1].mxu0 }
 0x215   :  { %v1404_v55 = vadd.f32 %v1403_v54, %v1402_v53  ;;  %v1405_v56 = vpop.f32.mrb[2].mxu0 }
 0x216   :  { %v1406_v57 = vpop.f32.mrb[3].mxu0 }
 0x217   :  { %v1407_v58 = vadd.f32 %v1406_v57, %v1405_v56  ;;  %v949_v9 = vadd.f32 %v1404_v55, %v612_v1  ;;  %v647_v55 = vpop.permute.xlu0 %646  ;;  %v642_v56 = vpop.permute.xlu1 %641 }
 0x219   :  { %v952_v15 = vadd.f32 %v1407_v58, %v617_v2 }
 0x21b   :  { %v1408_v59 = vpop.f32.mrb[4].mxu0 }
 0x21c   :  { %v1409_v60 = vpop.f32.mrb[5].mxu0 }
 0x21d   :  { %v1410_v61 = vadd.f32 %v1409_v60, %v1408_v59  ;;  %v1411_v62 = vpop.f32.mrb[6].mxu0 }
 0x21e   :  { %v1412_v63 = vpop.f32.mrb[7].mxu0 }
 0x21f   :  { %v1413_v0 = vadd.f32 %v1412_v63, %v1411_v62  ;;  %v957_v27 = vadd.f32 %v1410_v61, %v622_v20 }
 0x221   :  { %v960_v32 = vadd.f32 %v1413_v0, %v627_v19 }
 0x223   :  { %v1466_v3 = vpop.f32.mrb[0].mxu1  ;;  %v1414_v4 = vpop.f32.mrb[8].mxu0 }
 0x224   :  { %v1467_v5 = vpop.f32.mrb[1].mxu1  ;;  %v1415_v6 = vpop.f32.mrb[9].mxu0 }
 0x225   :  { %v1468_v7 = vadd.f32 %v1467_v5, %v1466_v3  ;;  %v1469_v8 = vpop.f32.mrb[2].mxu1  ;;  %v1416_v10 = vadd.f32 %v1415_v6, %v1414_v4  ;;  %v1417_v11 = vpop.f32.mrb[10].mxu0 }
 0x226   :  { %v1470_v12 = vpop.f32.mrb[3].mxu1  ;;  %v1418_v13 = vpop.f32.mrb[11].mxu0 }
 0x227   :  { %v1471_v14 = vadd.f32 %v1470_v12, %v1469_v8  ;;  %v1419_v16 = vadd.f32 %v1418_v13, %v1417_v11  ;;  %v2118_v17 = vadd.f32 %v1468_v7, %v949_v9  ;;  %v965_v45 = vadd.f32 %v1416_v10, %v632_v38  ;;  %v657_v9 = vpop.permute.xlu0 %656  ;;  %v652_v10 = vpop.permute.xlu1 %651 }
 0x229   :  { %v2120_v18 = vadd.f32 %v1471_v14, %v952_v15  ;;  %v968_v50 = vadd.f32 %v1419_v16, %v637_v37 }
 0x22b   :  { %v1472_v21 = vpop.f32.mrb[4].mxu1  ;;  %v1420_v22 = vpop.f32.mrb[12].mxu0 }
 0x22c   :  { %v1473_v23 = vpop.f32.mrb[5].mxu1  ;;  %v1421_v24 = vpop.f32.mrb[13].mxu0 }
 0x22d   :  { %v1474_v25 = vadd.f32 %v1473_v23, %v1472_v21  ;;  %v1475_v26 = vpop.f32.mrb[6].mxu1  ;;  %v1422_v28 = vadd.f32 %v1421_v24, %v1420_v22  ;;  %v1423_v29 = vpop.f32.mrb[14].mxu0 }
 0x22e   :  { %v1476_v30 = vpop.f32.mrb[7].mxu1  ;;  %v1424_v31 = vpop.f32.mrb[15].mxu0 }
 0x22f   :  { %v1477_v33 = vadd.f32 %v1476_v30, %v1475_v26  ;;  %v1425_v34 = vadd.f32 %v1424_v31, %v1423_v29  ;;  %v2122_v35 = vadd.f32 %v1474_v25, %v957_v27  ;;  %v973_v63 = vadd.f32 %v1422_v28, %v642_v56  ;;  %v667_v29 = vpop.permute.xlu0 %666  ;;  %v662_v30 = vpop.permute.xlu1 %661 }
 0x231   :  { %v2124_v36 = vadd.f32 %v1477_v33, %v960_v32  ;;  %v976_v4 = vadd.f32 %v1425_v34, %v647_v55 }
 0x233   :  { %v1478_v39 = vpop.f32.mrb[8].mxu1  ;;  %v1426_v40 = vpop.f32.mrb[16].mxu0 }
 0x234   :  { %v1479_v41 = vpop.f32.mrb[9].mxu1  ;;  %v1427_v42 = vpop.f32.mrb[17].mxu0 }
 0x235   :  { %v1480_v43 = vadd.f32 %v1479_v41, %v1478_v39  ;;  %v1481_v44 = vpop.f32.mrb[10].mxu1  ;;  %v1428_v46 = vadd.f32 %v1427_v42, %v1426_v40  ;;  %v1429_v47 = vpop.f32.mrb[18].mxu0 }
 0x236   :  { %v1482_v48 = vpop.f32.mrb[11].mxu1  ;;  %v1430_v49 = vpop.f32.mrb[19].mxu0 }
 0x237   :  { %v1483_v51 = vadd.f32 %v1482_v48, %v1481_v44  ;;  %v1431_v52 = vadd.f32 %v1430_v49, %v1429_v47  ;;  %v2126_v53 = vadd.f32 %v1480_v43, %v965_v45  ;;  %v981_v19 = vadd.f32 %v1428_v46, %v652_v10  ;;  %v677_v49 = vpop.permute.xlu0 %676 }
 0x239   :  { %v2128_v54 = vadd.f32 %v1483_v51, %v968_v50  ;;  %v984_v24 = vadd.f32 %v1431_v52, %v657_v9  ;;  %v672_v50 = vpop.permute.xlu1 %671 }
 0x23b   :  { %v1484_v57 = vpop.f32.mrb[12].mxu1  ;;  %v1432_v58 = vpop.f32.mrb[20].mxu0 }
 0x23c   :  { %v1485_v59 = vpop.f32.mrb[13].mxu1  ;;  %v1433_v60 = vpop.f32.mrb[21].mxu0 }
 0x23d   :  { %v1486_v61 = vadd.f32 %v1485_v59, %v1484_v57  ;;  %v1487_v62 = vpop.f32.mrb[14].mxu1  ;;  %v1434_v0 = vadd.f32 %v1433_v60, %v1432_v58  ;;  %v1435_v1 = vpop.f32.mrb[22].mxu0 }
 0x23e   :  { %v1488_v2 = vpop.f32.mrb[15].mxu1  ;;  %v1436_v3 = vpop.f32.mrb[23].mxu0 }
 0x23f   :  { %v1489_v5 = vadd.f32 %v1488_v2, %v1487_v62  ;;  %v1437_v6 = vadd.f32 %v1436_v3, %v1435_v1  ;;  %v2130_v7 = vadd.f32 %v1486_v61, %v973_v63  ;;  %v989_v39 = vadd.f32 %v1434_v0, %v662_v30 }
 0x241   :  { %v2132_v8 = vadd.f32 %v1489_v5, %v976_v4  ;;  %v992_v44 = vadd.f32 %v1437_v6, %v667_v29 }
 0x243   :  { %v1490_v11 = vpop.f32.mrb[16].mxu1  ;;  %v1438_v12 = vpop.f32.mrb[24].mxu0 }
 0x244   :  { %v1491_v13 = vpop.f32.mrb[17].mxu1  ;;  %v1439_v14 = vpop.f32.mrb[25].mxu0 }
 0x245   :  { %v1492_v15 = vadd.f32 %v1491_v13, %v1490_v11  ;;  %v1493_v16 = vpop.f32.mrb[18].mxu1  ;;  %v1440_v20 = vadd.f32 %v1439_v14, %v1438_v12  ;;  %v1441_v21 = vpop.f32.mrb[26].mxu0 }
 0x246   :  { %v1494_v22 = vpop.f32.mrb[19].mxu1  ;;  %v1442_v23 = vpop.f32.mrb[27].mxu0 }
 0x247   :  { %v1495_v25 = vadd.f32 %v1494_v22, %v1493_v16  ;;  %v1443_v26 = vadd.f32 %v1442_v23, %v1441_v21  ;;  %v2134_v27 = vadd.f32 %v1492_v15, %v981_v19  ;;  %v997_v62 = vadd.f32 %v1440_v20, %v672_v50  ;;  %v682_v12 = vpop.permute.xlu1 %681 }
 0x249   :  { %v2136_v28 = vadd.f32 %v1495_v25, %v984_v24  ;;  %v1000_v0 = vadd.f32 %v1443_v26, %v677_v49 }
 0x24b   :  { %v1496_v31 = vpop.f32.mrb[20].mxu1  ;;  %v1444_v32 = vpop.f32.mrb[28].mxu0 }
 0x24c   :  { %v1497_v33 = vpop.f32.mrb[21].mxu1  ;;  %v1445_v34 = vpop.f32.mrb[29].mxu0 }
 0x24d   :  { %v1498_v37 = vadd.f32 %v1497_v33, %v1496_v31  ;;  %v1499_v38 = vpop.f32.mrb[22].mxu1  ;;  %v1446_v40 = vadd.f32 %v1445_v34, %v1444_v32  ;;  %v1447_v41 = vpop.f32.mrb[30].mxu0 }
 0x24e   :  { %v1500_v42 = vpop.f32.mrb[23].mxu1  ;;  %v1448_v43 = vpop.f32.mrb[31].mxu0 }
 0x24f   :  { %v1501_v45 = vadd.f32 %v1500_v42, %v1499_v38  ;;  %v1449_v46 = vadd.f32 %v1448_v43, %v1447_v41  ;;  %v1086_v47 = vadd.f32 %v1498_v37, %v989_v39  ;;  %v1005_v22 = vadd.f32 %v1446_v40, %v682_v12 }
 0x251   :  { %v2138_v48 = vadd.f32 %v1501_v45, %v992_v44 }
 0x253   :  { %v1502_v51 = vpop.f32.mrb[24].mxu1  ;;  %v1536_v52 = vpop.f32.mrb[32].mxu0 }
 0x254   :  { %v1151_v55 = vadd.f32 %v1536_v52, %v2122_v35  ;;  %v1503_v56 = vpop.f32.mrb[25].mxu1  ;;  %v1142_v57 = vpop.f32.mrb[33].mxu0 }
 0x255   :  { %v1504_v58 = vadd.f32 %v1503_v56, %v1502_v51  ;;  %v1143_v59 = vadd.f32 %v1142_v57, %v2118_v17  ;;  %v1505_v60 = vpop.f32.mrb[26].mxu1  ;;  %v1537_v61 = vpop.f32.mrb[34].mxu0 }
 0x256   :  { %v1154_v63 = vadd.f32 %v1537_v61, %v2124_v36  ;;  %v1506_v1 = vpop.f32.mrb[27].mxu1  ;;  %v1145_v2 = vpop.f32.mrb[35].mxu0  ;;  %v1207_v3 = vmul.f32 0.5, %v1151_v55 }
 0x257   :  { %v1507_v4 = vadd.f32 %v1506_v1, %v1505_v60  ;;  %v1146_v5 = vadd.f32 %v1145_v2, %v2120_v18  ;;  %v2144_v6 = vadd.f32 %v1504_v58, %v997_v62  ;;  %v1205_v35 = vmul.f32 0.5, %v1143_v59  ;;  %v687_v17 = vpop.permute.xlu0 %686  ;;  %v1259_v1 = vld [vmem:[%s2199_s2 + $0x10] sm:$0xff] }
 0x258   :  { %v1208_v9 = vmul.f32 0.5, %v1154_v63  ;;  %1631 = vtanh.f32 %v1207_v3  ;;  %v1008_v24 = vadd.f32 %v1449_v46, %v687_v17 }
 0x259   :  { %v2146_v10 = vadd.f32 %v1507_v4, %v1000_v0  ;;  %v1206_v11 = vmul.f32 0.5, %v1146_v5  ;;  %1633 = vtanh.f32 %v1205_v35 }
 0x25a   :  { %1635 = vtanh.f32 %v1208_v9 }
 0x25b   :  { %v1508_v13 = vpop.f32.mrb[28].mxu1  ;;  %v1540_v14 = vpop.f32.mrb[36].mxu0  ;;  %1637 = vtanh.f32 %v1206_v11  ;;  %v1257_v11 = vld [vmem:[%s2199_s2] sm:$0xff] }
 0x25c   :  { %v1167_v36 = vadd.f32 %v1540_v14, %v2130_v7  ;;  %v1509_v15 = vpop.f32.mrb[29].mxu1  ;;  %v1158_v16 = vpop.f32.mrb[37].mxu0 }
 0x25d   :  { %v1510_v19 = vadd.f32 %v1509_v15, %v1508_v13  ;;  %v1159_v18 = vadd.f32 %v1158_v16, %v2126_v53  ;;  %v1511_v20 = vpop.f32.mrb[30].mxu1  ;;  %v1541_v21 = vpop.f32.mrb[38].mxu0 }
 0x25e   :  { %v1223_v23 = vmul.f32 0.5, %v1167_v36  ;;  %v1170_v25 = vadd.f32 %v1541_v21, %v2132_v8  ;;  %v1512_v26 = vpop.f32.mrb[31].mxu1  ;;  %v1161_v29 = vpop.f32.mrb[39].mxu0  ;;  %v1260_v36 = vld [vmem:[%s2199_s2 + $0x18] sm:$0xff] }
 0x25f   :  { %v1221_v30 = vmul.f32 0.5, %v1159_v18  ;;  %v1513_v31 = vadd.f32 %v1512_v26, %v1511_v20  ;;  %v1162_v7 = vadd.f32 %v1161_v29, %v2128_v54  ;;  %v1102_v32 = vadd.f32 %v1510_v19, %v1005_v22  ;;  %v1258_v20 = vld [vmem:[%s2199_s2 + $0x8] sm:$0xff]  ;;  %s1671_s2 = scalar_lea.vmem %s1314_s21, 512 }
 0x260   :  { %1639 = vtanh.f32 %v1223_v23  ;;  %v1224_v33 = vmul.f32 0.5, %v1170_v25  ;;  %p1672_p0 = scmp.ne.s32.totalorder %s1314_s21, %s1671_s2  ;;  %p1677_p2 = scmp.lt.s32.totalorder %s1671_s2, %s1671_s2 }
 0x261   :  { %1641 = vtanh.f32 %v1221_v30  ;;  %v1222_v34 = vmul.f32 0.5, %v1162_v7  ;;  %v1105_v53 = vadd.f32 %v1513_v31, %v1008_v24 }
 0x262   :  { %1643 = vtanh.f32 %v1224_v33  ;;  %v1632_v40 = vpop.eup %1631  ;;  %p1678_p3 = por %p1677_p2, %p1676_p1 }
 0x263   :  { %1645 = vtanh.f32 %v1222_v34  ;;  %v1544_v37 = vpop.f32.mrb[32].mxu1  ;;  %v1634_v42 = vpop.eup %1633  ;;  %v1215_v49 = vmul.f32 0.5, %v1632_v40 }
 0x264   :  { %v1183_v38 = vadd.f32 %v1544_v37, %v1086_v47  ;;  %v1174_v39 = vpop.f32.mrb[33].mxu1  ;;  %v1636_v44 = vpop.eup %1635  ;;  %v1213_v51 = vmul.f32 0.5, %v1634_v42  ;;  %p1679_p4 = pnand %p1678_p3, %p1672_p0 }
 0x265   :  { %v1175_v8 = vadd.f32 %v1174_v39, %v2134_v27  ;;  %v1545_v41 = vpop.f32.mrb[34].mxu1  ;;  %v1638_v46 = vpop.eup %1637  ;;  %v1219_v56 = vadd.f32 0.5, %v1215_v49  ;;  %v1216_v57 = vmul.f32 0.5, %v1636_v44 }
 0x266   :  { %1647 = vtanh.f32 %v1183_v38  ;;  %v1186_v43 = vadd.f32 %v1545_v41, %v2138_v48  ;;  %v1177_v54 = vpop.f32.mrb[35].mxu1  ;;  %v1214_v61 = vmul.f32 0.5, %v1638_v46  ;;  %v1217_v9 = vadd.f32 0.5, %v1213_v51 }
 0x267   :  { %1649 = vtanh.f32 %v1175_v8  ;;  %v1178_v45 = vadd.f32 %v1177_v54, %v2136_v28  ;;  %v1220_v14 = vadd.f32 0.5, %v1216_v57 }
 0x268   :  { %1651 = vtanh.f32 %v1186_v43 }
 0x269   :  { %1653 = vtanh.f32 %v1178_v45 }
 0x26a   :  { %v1640_v50 = vpop.eup %1639 }
 0x26b   :  { %v1642_v47 = vpop.eup %1641  ;;  %v1231_v52 = vmul.f32 0.5, %v1640_v50  ;;  %v1548_v55 = vpop.f32.mrb[36].mxu1 }
 0x26c   :  { %v1644_v27 = vpop.eup %1643  ;;  %v1229_v58 = vmul.f32 0.5, %v1642_v47  ;;  %v1199_v59 = vadd.f32 %v1548_v55, %v1102_v32  ;;  %v1190_v48 = vpop.f32.mrb[37].mxu1 }
 0x26d   :  { %v1646_v60 = vpop.eup %1645  ;;  %v1235_v62 = vadd.f32 0.5, %v1231_v52  ;;  %v1232_v63 = vmul.f32 0.5, %v1644_v27  ;;  %v1191_v28 = vadd.f32 %v1190_v48, %v2144_v6  ;;  %v1549_v0 = vpop.f32.mrb[38].mxu1 }
 0x26e   :  { %v1233_v2 = vadd.f32 0.5, %v1229_v58  ;;  %v1230_v3 = vmul.f32 0.5, %v1646_v60  ;;  %v1243_v4 = vmul.f32 0.5, %v1199_v59  ;;  %v1202_v5 = vadd.f32 %v1549_v0, %v1105_v53  ;;  %v1193_v35 = vpop.f32.mrb[39].mxu1 }
 0x26f   :  { %v1236_v17 = vadd.f32 0.5, %v1232_v63  ;;  %v1241_v12 = vmul.f32 0.5, %v1191_v28  ;;  %v1194_v13 = vadd.f32 %v1193_v35, %v2146_v10  ;;  %v1263_v18 = vmul.f32 %v1259_v1, %v1235_v62 }
 0x270   :  { %v1648_v6 = vpop.eup %1647  ;;  %v1234_v15 = vadd.f32 0.5, %v1230_v3  ;;  %1655 = vtanh.f32 %v1243_v4  ;;  %v1244_v16 = vmul.f32 0.5, %v1202_v5  ;;  %v1218_v10 = vadd.f32 0.5, %v1214_v61 }
 0x271   :  { %v1650_v19 = vpop.eup %1649  ;;  %v1267_v21 = vmul.f32 %v1648_v6, %v1219_v56  ;;  %1657 = vtanh.f32 %v1241_v12  ;;  %v1242_v22 = vmul.f32 0.5, %v1194_v13  ;;  %v1261_v24 = vmul.f32 %v1257_v11, %v1233_v2 }
 0x272   :  { %v1652_v23 = vpop.eup %1651  ;;  %v1265_v25 = vmul.f32 %v1650_v19, %v1217_v9  ;;  %1659 = vtanh.f32 %v1244_v16  ;;  %v1264_v29 = vmul.f32 %v1260_v36, %v1236_v17  ;;  %v1262_v7 = vmul.f32 %v1258_v20, %v1234_v15 }
 0x273   :  { %v1654_v26 = vpop.eup %1653  ;;  %v1271_v30 = vadd.f32 %v1267_v21, %v1263_v18  ;;  %v1268_v31 = vmul.f32 %v1652_v23, %v1220_v14  ;;  %1661 = vtanh.f32 %v1242_v22 }
 0x274   :  { %v1269_v32 = vadd.f32 %v1265_v25, %v1261_v24  ;;  %v1266_v33 = vmul.f32 %v1654_v26, %v1218_v10 }
 0x275   :  { %1663 = vtanh.f32 %v1271_v30  ;;  %1304 = vst.msk [vmem:[#allocation4 + $0x10] sm:$0xff] %vm33_vm1, %v1271_v30  ;;  %v1272_v34 = vadd.f32 %v1268_v31, %v1264_v29 }
 0x276   :  { %1665 = vtanh.f32 %v1269_v32  ;;  %1302 = vst.msk [vmem:[#allocation4] sm:$0xff] %vm33_vm1, %v1269_v32  ;;  %v1270_v53 = vadd.f32 %v1266_v33, %v1262_v7 }
 0x277   :  { %1667 = vtanh.f32 %v1272_v34  ;;  %1305 = vst.msk [vmem:[#allocation4 + $0x18] sm:$0xff] %vm33_vm1, %v1272_v34 }
 0x278   :  { %1669 = vtanh.f32 %v1270_v53  ;;  %1303 = vst.msk [vmem:[#allocation4 + $0x8] sm:$0xff] %vm33_vm1, %v1270_v53 }
 0x279   :  { %1682 = shalt.err (!%p1679_p4)
}
 0x27a   :  { %s1683_s24 = scalar_lea.hbm %s2204_s7, 512 }
 0x27b   :  { %p1684_p5 = scmp.ne.s32.totalorder %s2204_s7, %s1683_s24  ;;  %p1687_p6 = scmp.lt.u32.totalorder %s1683_s24, %s2204_s7 }
 0x27d   :  { %p1689_p7 = pnand %p1687_p6, %p1684_p5 }
 0x27f   :  { %1692 = shalt.err (!%p1689_p7)
}
 0x280   :  { %s1705_s1 = smov 128   ;;  %s1706_s27 = smov 8   ;;  %v1656_v37 = vpop.eup %1655  ;;  %vm1297_vm7 = vcmask 257024  }
 0x281   :  { %1319 = dma.vmem_to_hbm [thread:$0]  %s1314_s21, 512, %s2204_s7, [#allocation5], %s1705_s1, %s1705_s1, %s1706_s27   ;;  %v1658_v38 = vpop.eup %1657  ;;  %v1251_v39 = vmul.f32 0.5, %v1656_v37 }
 0x282   :  { %v1660_v40 = vpop.eup %1659  ;;  %v1249_v8 = vmul.f32 0.5, %v1658_v38 }
 0x283   :  { %v1662_v41 = vpop.eup %1661  ;;  %v1255_v42 = vadd.f32 0.5, %v1251_v39  ;;  %v1252_v43 = vmul.f32 0.5, %v1660_v40 }
 0x284   :  { %v1253_v54 = vadd.f32 0.5, %v1249_v8  ;;  %v1250_v44 = vmul.f32 0.5, %v1662_v41  ;;  %v1664_v45 = vpop.eup %1663 }
 0x285   :  { %v1256_v46 = vadd.f32 0.5, %v1252_v43  ;;  %v1666_v49 = vpop.eup %1665  ;;  %v1279_v50 = vmul.f32 %v1664_v45, %v1255_v42 }
 0x286   :  { %v1254_v47 = vadd.f32 0.5, %v1250_v44  ;;  %v1668_v51 = vpop.eup %1667  ;;  %v1277_v52 = vmul.f32 %v1666_v49, %v1253_v54 }
 0x287   :  { %v1670_v55 = vpop.eup %1669  ;;  %v1384_v27 = vpack.c.bf16 %v1279_v50, %v1279_v50  ;;  %v1280_v56 = vmul.f32 %v1668_v51, %v1256_v46 }
 0x288   :  { %v1382_v57 = vpack.c.bf16 %v1277_v52, %v1277_v52  ;;  %v1278_v58 = vmul.f32 %v1670_v55, %v1254_v47 }
 0x289   :  { %1300 = vst.msk [vmem:[%s2203_s6 + $0x8] sm:$0xf] %vm1297_vm7, %v1384_v27  ;;  %v1385_v59 = vpack.c.bf16 %v1280_v56, %v1280_v56 }
 0x28a   :  { %1298 = vst.msk [vmem:[%s2203_s6] sm:$0xf] %vm1297_vm7, %v1382_v57  ;;  %v1383_v48 = vpack.c.bf16 %v1278_v58, %v1278_v58 }
 0x28b   :  { %1301 = vst.msk [vmem:[%s2203_s6 + $0xc] sm:$0xf] %vm1297_vm7, %v1385_v59 }
 0x28c   :  { %1299 = vst.msk [vmem:[%s2203_s6 + $0x4] sm:$0xf] %vm1297_vm7, %v1383_v48 }
 0x28d   :  { %1693 = dma.done.wait [#allocation5], 512  }
 0x28e   :  { %1694 = vsyncadd [#allocation5], 4294966784 }
 0x28f   :  { %1325 = vsyncpa [#allocation5], 1 }

// kernel: ms_cms_lstm_forward.15
= control target key start
LH: loop header
LB: loop body
LE: loop exit
PB: predicated region body
PF: predicated region fallthrough
CT: control target
= control target key end

     0   :  { %v188_v1 = vmov 0   ;;  %vm70_vm0 = vcmask 261120   ;;  %s251_s0 = inlined_call_operand.vmem [shape: bf16[32,512], index: 0, kind: input, shape index: {}]   ;;  %s252_s2 = inlined_call_operand.vmem [shape: f32[8,1], index: 2, kind: input, shape index: {}]   ;;  %s253_s1 = inlined_call_operand.vmem [shape: bf16[8,32], index: 1, kind: input, shape index: {}]   ;;  %s254_s3 = inlined_call_operand.vmem [shape: f32[8,512], index: 3, kind: output, shape index: {}]  }
   0x1   :  { %v176_v0 = vld [vmem:[%s251_s0 + $0x4] ss:$16 sps:$4 sm:$0xff]   ;;  %106 = vmatprep.mubr.bf16.mxu0 %v188_v1  ;;  %147 = vmatprep.mubr.bf16.mxu1 %v188_v1  ;;  %v178_v2 = vld [vmem:[%s251_s0 + $0xc] ss:$16 sps:$4 sm:$0xff]   ;;  %v180_v3 = vld [vmem:[%s251_s0] ss:$16 sps:$4 sm:$0xff]  }
   0x2   :  { %175 = vset.pattern.permute.xlu0 %v188_v1  ;;  %74 = vmatprep.subr.bf16.mxu0 %v176_v0  ;;  %v181_v4 = vld [vmem:[%s251_s0 + $0x8] ss:$16 sps:$4 sm:$0xff]   ;;  %v182_v5 = vld [vmem:[%s251_s0 + $0x24] ss:$16 sps:$4 sm:$0xff]   ;;  %v184_v6 = vld [vmem:[%s251_s0 + $0x2c] ss:$16 sps:$4 sm:$0xff]  }
   0x3   :  { %115 = vmatprep.subr.bf16.mxu1 %v178_v2  ;;  %75 = vmatpush1.bf16.msra.mxu0 %v180_v3  ;;  %v186_v7 = vld [vmem:[%s251_s0 + $0x20] ss:$16 sps:$4 sm:$0xff]   ;;  %v187_v8 = vld [vmem:[%s251_s0 + $0x28] ss:$16 sps:$4 sm:$0xff]  }
   0x4   :  { %116 = vmatpush1.bf16.msra.mxu1 %v181_v4  ;;  %76 = vmatprep.subr.bf16.mxu0 %v182_v5  ;;  %v24_v9 = vld [vmem:[%s252_s2] sm:$0xff] }
   0x5   :  { %117 = vmatprep.subr.bf16.mxu1 %v184_v6  ;;  %27 = vperm.xlu0 %175, %v24_v9   ;;  %v15_v10 = vld [vmem:[%s253_s1] sm:$0xf] }
   0x7   :  { %77 = vmatpush1.bf16.msra.mxu0 %v186_v7 }
   0x8   :  { %118 = vmatpush1.bf16.msra.mxu1 %v187_v8 }
   0xa   :  { %172 = vmatmul.mubr.msk.bf16.vlgmr.msra.gmra.mrb[0].mxu0 %vm70_vm0, %v15_v10 }
   0xb   :  { %173 = vmatmul.mubr.msk.bf16.vlgmr.msra.gmra.mrb[0].mxu1 %vm70_vm0, %v15_v10 }
  0x84   :  { %v28_v11 = vpop.permute.xlu0 %27 }
  0xdd   :  { %v108_v12 = vpop.f32.mrb[0].mxu0 }
  0xde   :  { %v149_v13 = vpop.f32.mrb[0].mxu1  ;;  %v109_v14 = vadd.f32 %v108_v12, %v28_v11  ;;  %v110_v16 = vpop.f32.mrb[1].mxu0 }
  0xdf   :  { %v150_v15 = vadd.f32 %v149_v13, %v28_v11  ;;  %v151_v17 = vpop.f32.mrb[1].mxu1  ;;  %v111_v18 = vadd.f32 %v110_v16, %v28_v11  ;;  %v112_v20 = vpop.f32.mrb[2].mxu0 }
  0xe0   :  { %v152_v19 = vadd.f32 %v151_v17, %v28_v11  ;;  %v153_v21 = vpop.f32.mrb[2].mxu1  ;;  %156 = vst [vmem:[%s254_s3] sm:$0xff] %v109_v14  ;;  %v113_v22 = vpop.f32.mrb[3].mxu0 }
  0xe1   :  { %158 = vst [vmem:[%s254_s3 + $0x10] sm:$0xff] %v150_v15  ;;  %v154_v23 = vpop.f32.mrb[3].mxu1  ;;  %157 = vst [vmem:[%s254_s3 + $0x8] sm:$0xff] %v111_v18 }
  0xe2   :  { %159 = vst [vmem:[%s254_s3 + $0x18] sm:$0xff] %v152_v19 }

</bundles_post_ra>
